<compile_context>
chip_gen: v7x
topology: tpu7x:2x2x1
jax: 0.10.0
libtpu: 0.0.40
codegen_flags: <defaults>
</compile_context>

<pallas_src>
import functools

import jax
import jax.numpy as jnp
from jax.experimental import pallas as pl
from jax.experimental.pallas import tpu as pltpu

BN_EPS = 1e-5


# ----------------------------------------------------------------------------
# Parameter construction (deterministic, BN folded into convs)
# ----------------------------------------------------------------------------
def _fold_bn(w_oc_ic, gamma, beta, mean, var):
    """Fold inference-mode BatchNorm into a preceding bias-free conv weight."""
    scale = gamma / jnp.sqrt(var + BN_EPS)
    shape = (-1,) + (1,) * (w_oc_ic.ndim - 1)
    return w_oc_ic * scale.reshape(shape), beta - mean * scale


def init_params(key, in_places, cardinality, bottleneck_width, expansion,
                downsampling):
    places = cardinality * bottleneck_width
    c2 = places * expansion
    hidden = c2 // 16
    ks = iter(jax.random.split(key, 32))
    nrm = lambda shape, s=0.1: s * jax.random.normal(next(ks), shape, jnp.float32)
    bn = lambda c: (1.0 + 0.1 * jax.random.normal(next(ks), (c,), jnp.float32),   # gamma
                    0.1 * jax.random.normal(next(ks), (c,), jnp.float32),         # beta
                    0.1 * jax.random.normal(next(ks), (c,), jnp.float32),         # running_mean
                    0.5 + jax.random.uniform(next(ks), (c,), jnp.float32))        # running_var

    p = {}
    # conv1: 1x1 (places, in_places) + BN1 — weights stored bf16 for the MXU.
    w1, b1 = _fold_bn(nrm((places, in_places)), *bn(places))
    p['w1'] = jnp.transpose(w1).astype(jnp.bfloat16)            # (Cin, P)
    p['b1'] = b1.reshape(1, places)

    # conv2: 3x3 grouped -> dense block-diagonal, kw folded into K.
    # TODO(synk): for P > 128 (v5e) / P > 256 (v6e/v7x) the dense block-diag
    # wastes MXU FLOPs; tile over group blocks instead.  For the default
    # ResNeXt config (P = 128) dense exactly fills a 128-wide MXU tile.
    gsz = places // cardinality
    w2g = nrm((places, gsz, 3, 3))
    w2d = jnp.zeros((places, places, 3, 3), jnp.float32)
    for g in range(cardinality):
        w2d = w2d.at[g * gsz:(g + 1) * gsz, g * gsz:(g + 1) * gsz].set(
            w2g[g * gsz:(g + 1) * gsz])
    w2d, b2 = _fold_bn(w2d, *bn(places))
    # (oc, ic, kh, kw) -> (kh, kw, ic, oc) -> (3, 3P, P); K index = kw*P + ic.
    p['w2'] = jnp.transpose(w2d, (2, 3, 1, 0)).reshape(
        3, 3 * places, places).astype(jnp.bfloat16)
    p['b2'] = b2.reshape(1, places)

    # conv3: 1x1 (c2, places) + BN3
    w3, b3 = _fold_bn(nrm((c2, places)), *bn(c2))
    p['w3'] = jnp.transpose(w3).astype(jnp.bfloat16)            # (P, C2)
    p['b3'] = b3.reshape(1, c2)

    # SE: biased 1x1 convs on the pooled channel vector (tiny, kept f32).
    p['sw1'] = jnp.transpose(nrm((hidden, c2)))                 # (C2, hidden)
    p['sb1'] = nrm((hidden,)).reshape(1, hidden)
    p['sw2'] = jnp.transpose(nrm((c2, hidden)))                 # (hidden, C2)
    p['sb2'] = nrm((c2,)).reshape(1, c2)

    if downsampling:
        wd, bd = _fold_bn(nrm((c2, in_places)), *bn(c2))
        p['wd'] = jnp.transpose(wd).astype(jnp.bfloat16)        # (Cin, C2)
        p['bd'] = bd.reshape(1, c2)
    return p


# ----------------------------------------------------------------------------
# Pallas kernel (fully fused: conv1 -> conv2 -> conv3 -> SE -> residual -> ReLU)
# ----------------------------------------------------------------------------
def _bottleneck_kernel(x_ref, w1_ref, b1_ref, w2_ref, b2_ref, w3_ref, b3_ref,
                       sw1_ref, sb1_ref, sw2_ref, sb2_ref, *rest,
                       stride, downsample):
    if downsample:
        wd_ref, bd_ref, o_ref, pad_ref = rest
    else:
        o_ref, pad_ref = rest

    _, H, W, Cin = x_ref.shape
    P = w1_ref.shape[1]
    C2 = w3_ref.shape[1]
    _, Ho, Wo, _ = o_ref.shape
    HW = H * W
    bf16 = jnp.bfloat16

    x2d = x_ref[0].reshape(HW, Cin)                              # f32

    # ---- conv1 (1x1) + folded BN + ReLU: bf16 MXU operands, f32 accumulate.
    h1 = jnp.dot(x2d.astype(bf16), w1_ref[...],
                 preferred_element_type=jnp.float32) + b1_ref[...]
    h1 = jnp.maximum(h1, 0.0)                                    # (HW, P) f32

    # ---- conv2 (3x3 grouped, pad=1): stage h1 once in a flat, zero-padded
    # VMEM scratch; each kh tap is a contiguous pl.ds slice and the kw taps
    # are folded into the contraction dim -> 3 matmuls with K = 3P.
    A = ((W + 1 + 7) // 8) * 8            # sublane-aligned start of h1 data
    pad_len = pad_ref.shape[0]
    pad_ref[pl.ds(0, A)] = jnp.zeros((A, P), jnp.float32)
    pad_ref[pl.ds(A + HW, pad_len - A - HW)] = jnp.zeros(
        (pad_len - A - HW, P), jnp.float32)
    pad_ref[pl.ds(A, HW)] = h1

    col = jax.lax.broadcasted_iota(jnp.int32, (HW, P), 0) % W
    has_left = col >= 1                   # column j-1 exists
    has_right = col <= W - 2              # column j+1 exists

    acc = jnp.zeros((HW, P), jnp.float32)
    for kh in range(3):
        base = A + (kh - 1) * W
        t_l = jnp.where(has_left, pad_ref[pl.ds(base - 1, HW)], 0.0)
        t_c = pad_ref[pl.ds(base, HW)]
        t_r = jnp.where(has_right, pad_ref[pl.ds(base + 1, HW)], 0.0)
        taps = jnp.concatenate([t_l, t_c, t_r], axis=-1)         # (HW, 3P)
        acc = acc + jnp.dot(taps.astype(bf16), w2_ref[kh],
                            preferred_element_type=jnp.float32)
    h2 = jnp.maximum(acc + b2_ref[...], 0.0)                     # (HW, P) f32

    if stride != 1:
        # TODO(synk): stride > 1 computes the 3x3 at stride 1 and subsamples
        # (mathematically exact, redundant compute); unexercised by the demo.
        h2 = h2.reshape(H, W, P)[::stride, ::stride, :][:Ho, :Wo, :]
        h2 = h2.reshape(Ho * Wo, P)

    # ---- conv3 (1x1) + folded BN
    h3 = jnp.dot(h2.astype(bf16), w3_ref[...],
                 preferred_element_type=jnp.float32) + b3_ref[...]

    # ---- Squeeze-and-Excitation gate: global avg pool -> fc -> relu -> fc -> sigmoid
    pooled = jnp.mean(h3, axis=0, keepdims=True)                 # (1, C2)
    s1 = jnp.maximum(
        jnp.dot(pooled, sw1_ref[...], preferred_element_type=jnp.float32)
        + sb1_ref[...], 0.0)
    gate = jax.nn.sigmoid(
        jnp.dot(s1, sw2_ref[...], preferred_element_type=jnp.float32)
        + sb2_ref[...])
    out = h3 * gate                                              # broadcast over rows

    # ---- residual: read x_ref directly (no second HBM stream); the downsample
    # 1x1 + BN projection is fused in-kernel.
    if downsample:
        xs = x_ref[0]
        if stride != 1:
            xs = xs[::stride, ::stride, :][:Ho, :Wo, :]
        res = jnp.dot(xs.reshape(Ho * Wo, Cin).astype(bf16), wd_ref[...],
                      preferred_element_type=jnp.float32) + bd_ref[...]
    else:
        res = x2d                                                # Cin == C2, stride == 1

    out = jnp.maximum(out + res, 0.0)
    o_ref[...] = out.reshape(1, Ho, Wo, C2).astype(o_ref.dtype)


# ----------------------------------------------------------------------------
# Wrapper
# ----------------------------------------------------------------------------
def _full_spec(arr):
    nd = arr.ndim
    return pl.BlockSpec(arr.shape, lambda n, _nd=nd: (0,) * _nd)


def bottleneck_x_se(x, params, *, stride=1, downsampling=False):
    """x: (N, H, W, Cin) float32 NHWC."""
    N, H, W, Cin = x.shape
    P = params['w1'].shape[1]
    C2 = params['w3'].shape[1]
    Ho = (H + 2 - 3) // stride + 1
    Wo = (W + 2 - 3) // stride + 1
    if not downsampling:
        assert stride == 1 and Cin == C2, (
            "identity residual requires stride == 1 and in_places == places*expansion")

    A = ((W + 1 + 7) // 8) * 8
    pad_len = A + H * W + W + 8

    kern = functools.partial(_bottleneck_kernel, stride=stride,
                             downsample=downsampling)
    in_arrays = [x, params['w1'], params['b1'], params['w2'], params['b2'],
                 params['w3'], params['b3'], params['sw1'], params['sb1'],
                 params['sw2'], params['sb2']]
    if downsampling:
        in_arrays += [params['wd'], params['bd']]

    in_specs = [pl.BlockSpec((1, H, W, Cin), lambda n: (n, 0, 0, 0))]
    in_specs += [_full_spec(a) for a in in_arrays[1:]]

    return pl.pallas_call(
        kern,
        out_shape=jax.ShapeDtypeStruct((N, Ho, Wo, C2), x.dtype),
        grid=(N,),
        in_specs=in_specs,
        out_specs=pl.BlockSpec((1, Ho, Wo, C2), lambda n: (n, 0, 0, 0)),
        scratch_shapes=[pltpu.VMEM((pad_len, P), jnp.float32)],
        compiler_params=pltpu.CompilerParams(
            dimension_semantics=("parallel",),
            vmem_limit_bytes=32 * 1024 * 1024),
    )(*in_arrays)


# ----------------------------------------------------------------------------
# Pure-JAX reference (same folded bf16 weights) for correctness checking
# ----------------------------------------------------------------------------
def reference(x, params, *, stride=1, downsampling=False):
    N, H, W, Cin = x.shape
    P = params['w1'].shape[1]
    Ho = (H + 2 - 3) // stride + 1
    Wo = (W + 2 - 3) // stride + 1
    bf, f32 = jnp.bfloat16, jnp.float32
    h1 = jnp.maximum(
        jnp.einsum('nhwc,cp->nhwp', x.astype(bf), params['w1'],
                   preferred_element_type=f32) + params['b1'][0], 0.0)
    hp = jnp.pad(h1, ((0, 0), (1, 1), (1, 1), (0, 0))).astype(bf)
    w2taps = params['w2'].reshape(3, 3, P, P)
    acc = jnp.zeros((N, Ho, Wo, P), f32)
    for kh in range(3):
        for kw in range(3):
            patch = hp[:, kh:kh + (Ho - 1) * stride + 1:stride,
                          kw:kw + (Wo - 1) * stride + 1:stride, :]
            acc = acc + jnp.einsum('nhwc,cp->nhwp', patch, w2taps[kh, kw],
                                   preferred_element_type=f32)
    h2 = jnp.maximum(acc + params['b2'][0], 0.0)
    h3 = jnp.einsum('nhwc,cp->nhwp', h2.astype(bf), params['w3'],
                    preferred_element_type=f32) + params['b3'][0]
    pooled = h3.mean(axis=(1, 2))
    s1 = jnp.maximum(pooled @ params['sw1'] + params['sb1'][0], 0.0)
    gate = jax.nn.sigmoid(s1 @ params['sw2'] + params['sb2'][0])
    out = h3 * gate[:, None, None, :]
    if downsampling:
        xs = x[:, ::stride, ::stride, :][:, :Ho, :Wo, :]
        residual = jnp.einsum('nhwc,cp->nhwp', xs.astype(bf), params['wd'],
                              preferred_element_type=f32) + params['bd'][0]
    else:
        residual = x
    return jnp.maximum(out + residual, 0.0)


if __name__ == "__main__":
    key = jax.random.PRNGKey(0)
    k_x, k_x2, k_p1, k_p2 = jax.random.split(key, 4)

    # Default ResNeXt config: cardinality=32, width=4 -> places=128, expansion=2
    # -> C2=256 (lane-dense channels).  Small batch / spatial dims.
    N, H, W = 2, 16, 16
    cardinality, bottleneck_width, expansion = 32, 4, 2
    places = cardinality * bottleneck_width
    c2 = places * expansion

    # Case 1: identity residual (downsampling=False) -> in_places == C2.
    in_places = c2  # 256
    x = jax.random.normal(k_x, (N, H, W, in_places), jnp.float32)
    params = init_params(k_p1, in_places, cardinality, bottleneck_width,
                         expansion, False)
    out = jax.block_until_ready(
        bottleneck_x_se(x, params, stride=1, downsampling=False))
    ref = reference(x, params, stride=1, downsampling=False)
    assert out.shape == (N, H, W, c2)
    assert jnp.allclose(out, ref, rtol=2e-2, atol=2e-2), \
        float(jnp.abs(out - ref).max())

    # Case 2: projection residual (downsampling=True), different input width.
    in_places2 = 128
    x2 = jax.random.normal(k_x2, (N, H, W, in_places2), jnp.float32)
    params2 = init_params(k_p2, in_places2, cardinality, bottleneck_width,
                          expansion, True)
    out2 = jax.block_until_ready(
        bottleneck_x_se(x2, params2, stride=1, downsampling=True))
    ref2 = reference(x2, params2, stride=1, downsampling=True)
    assert out2.shape == (N, H, W, c2)
    assert jnp.allclose(out2, ref2, rtol=2e-2, atol=2e-2), \
        float(jnp.abs(out2 - ref2).max())

    print("KERNEL_OK")
</pallas_src>

<mosaic_0001>
module attributes {stable_mosaic.version = 11 : i64} {
  func.func @_bottleneck_kernel(%arg0: i32, %arg1: memref<1x16x16x256xf32, #tpu.memory_space<vmem>>, %arg2: memref<256x128xbf16, #tpu.memory_space<vmem>>, %arg3: memref<1x128xf32, #tpu.memory_space<vmem>>, %arg4: memref<3x384x128xbf16, #tpu.memory_space<vmem>>, %arg5: memref<1x128xf32, #tpu.memory_space<vmem>>, %arg6: memref<128x256xbf16, #tpu.memory_space<vmem>>, %arg7: memref<1x256xf32, #tpu.memory_space<vmem>>, %arg8: memref<256x16xf32, #tpu.memory_space<vmem>>, %arg9: memref<1x16xf32, #tpu.memory_space<vmem>>, %arg10: memref<16x256xf32, #tpu.memory_space<vmem>>, %arg11: memref<1x256xf32, #tpu.memory_space<vmem>>, %arg12: memref<1x16x16x256xf32, #tpu.memory_space<vmem>>, %arg13: memref<304x128xf32, #tpu.memory_space<vmem>>) attributes {dimension_semantics = [#tpu.dimension_semantics<parallel>], iteration_bounds = array<i64: 2>, scalar_prefetch = 0 : i64, scratch_operands = 1 : i64, tpu.core_type = #tpu.core_type<tc>, window_params = [{transform_indices = @transform_0, window_bounds = array<i64: 1, 16, 16, 256>}, {pipeline_mode = #tpu.pipeline_mode<synchronous>, transform_indices = @transform_1, window_bounds = array<i64: 256, 128>}, {pipeline_mode = #tpu.pipeline_mode<synchronous>, transform_indices = @transform_2, window_bounds = array<i64: 1, 128>}, {pipeline_mode = #tpu.pipeline_mode<synchronous>, transform_indices = @transform_3, window_bounds = array<i64: 3, 384, 128>}, {pipeline_mode = #tpu.pipeline_mode<synchronous>, transform_indices = @transform_4, window_bounds = array<i64: 1, 128>}, {pipeline_mode = #tpu.pipeline_mode<synchronous>, transform_indices = @transform_5, window_bounds = array<i64: 128, 256>}, {pipeline_mode = #tpu.pipeline_mode<synchronous>, transform_indices = @transform_6, window_bounds = array<i64: 1, 256>}, {pipeline_mode = #tpu.pipeline_mode<synchronous>, transform_indices = @transform_7, window_bounds = array<i64: 256, 16>}, {pipeline_mode = #tpu.pipeline_mode<synchronous>, transform_indices = @transform_8, window_bounds = array<i64: 1, 16>}, {pipeline_mode = #tpu.pipeline_mode<synchronous>, transform_indices = @transform_9, window_bounds = array<i64: 16, 256>}, {pipeline_mode = #tpu.pipeline_mode<synchronous>, transform_indices = @transform_10, window_bounds = array<i64: 1, 256>}, {transform_indices = @transform_11, window_bounds = array<i64: 1, 16, 16, 256>}]} {
    %c0 = arith.constant 0 : index
    %c0_0 = arith.constant 0 : index
    %c0_1 = arith.constant 0 : index
    %c0_2 = arith.constant 0 : index
    %0 = vector.load %arg1[%c0, %c0_0, %c0_1, %c0_2] : memref<1x16x16x256xf32, #tpu.memory_space<vmem>>, vector<1x16x16x256xf32>
    %1 = vector.shape_cast %0 : vector<1x16x16x256xf32> to vector<16x16x256xf32>
    %2 = vector.shape_cast %1 : vector<16x16x256xf32> to vector<256x256xf32>
    %3 = arith.truncf %2 : vector<256x256xf32> to vector<256x256xbf16>
    %c0_3 = arith.constant 0 : index
    %c0_4 = arith.constant 0 : index
    %4 = vector.load %arg2[%c0_3, %c0_4] : memref<256x128xbf16, #tpu.memory_space<vmem>>, vector<256x128xbf16>
    %cst = arith.constant dense<0.000000e+00> : vector<256x128xf32>
    %5 = tpu.matmul %3, %4, %cst {dimension_numbers = #tpu.dot_dimension_numbers<[1], [0], [0], [1], [0, 0, 1, 1], [], []>} : vector<256x256xbf16>, vector<256x128xbf16>, vector<256x128xf32> -> vector<256x128xf32>
    %c0_5 = arith.constant 0 : index
    %c0_6 = arith.constant 0 : index
    %6 = vector.load %arg3[%c0_5, %c0_6] : memref<1x128xf32, #tpu.memory_space<vmem>>, vector<1x128xf32>
    %7 = vector.broadcast %6 : vector<1x128xf32> to vector<256x128xf32>
    %8 = arith.addf %5, %7 : vector<256x128xf32>
    %cst_7 = arith.constant 0.000000e+00 : f32
    %9 = vector.broadcast %cst_7 : f32 to vector<256x128xf32>
    %10 = arith.maximumf %8, %9 : vector<256x128xf32>
    %cst_8 = arith.constant 0.000000e+00 : f32
    %11 = vector.broadcast %cst_8 : f32 to vector<24x128xf32>
    %c0_9 = arith.constant 0 : index
    %c0_10 = arith.constant 0 : index
    %12 = vector.load %arg13[%c0_9, %c0_10] : memref<304x128xf32, #tpu.memory_space<vmem>>, vector<24x128xf32>
    tpu.vector_store %arg13[%c0_9, %c0_10], %11 {strides = array<i32>} : memref<304x128xf32, #tpu.memory_space<vmem>>, vector<24x128xf32>,
    %cst_11 = arith.constant 0.000000e+00 : f32
    %13 = vector.broadcast %cst_11 : f32 to vector<24x128xf32>
    %c280 = arith.constant 280 : index
    %c0_12 = arith.constant 0 : index
    %14 = vector.load %arg13[%c280, %c0_12] : memref<304x128xf32, #tpu.memory_space<vmem>>, vector<24x128xf32>
    tpu.vector_store %arg13[%c280, %c0_12], %13 {strides = array<i32>} : memref<304x128xf32, #tpu.memory_space<vmem>>, vector<24x128xf32>,
    %c24 = arith.constant 24 : index
    %c0_13 = arith.constant 0 : index
    %15 = vector.load %arg13[%c24, %c0_13] : memref<304x128xf32, #tpu.memory_space<vmem>>, vector<256x128xf32>
    tpu.vector_store %arg13[%c24, %c0_13], %10 {strides = array<i32>} : memref<304x128xf32, #tpu.memory_space<vmem>>, vector<256x128xf32>,
    %16 = tpu.iota {dimensions = array<i32: 0>} : vector<256x128xi32>
    %c16_i32 = arith.constant 16 : i32
    %c0_i32 = arith.constant 0 : i32
    %17 = arith.cmpi eq, %c16_i32, %c0_i32 : i32
    %c1_i32 = arith.constant 1 : i32
    %18 = arith.select %17, %c1_i32, %c16_i32 : i32
    %19 = vector.broadcast %18 : i32 to vector<256x128xi32>
    %20 = arith.remsi %16, %19 : vector<256x128xi32>
    %c0_i32_14 = arith.constant 0 : i32
    %21 = vector.broadcast %c0_i32_14 : i32 to vector<256x128xi32>
    %22 = arith.cmpi ne, %20, %21 : vector<256x128xi32>
    %c0_i32_15 = arith.constant 0 : i32
    %23 = vector.broadcast %c0_i32_15 : i32 to vector<256x128xi32>
    %24 = arith.cmpi slt, %20, %23 : vector<256x128xi32>
    %c0_i32_16 = arith.constant 0 : i32
    %25 = arith.cmpi slt, %18, %c0_i32_16 : i32
    %26 = vector.broadcast %25 : i1 to vector<256x128xi1>
    %27 = vector.broadcast %26 : vector<256x128xi1> to vector<256x128xi1>
    %28 = arith.xori %24, %27 : vector<256x128xi1>
    %29 = arith.andi %28, %22 : vector<256x128xi1>
    %30 = vector.broadcast %18 : i32 to vector<256x128xi32>
    %31 = arith.addi %20, %30 : vector<256x128xi32>
    %32 = arith.select %29, %31, %20 : vector<256x128xi1>, vector<256x128xi32>
    %c1_i32_17 = arith.constant 1 : i32
    %33 = vector.broadcast %c1_i32_17 : i32 to vector<256x128xi32>
    %34 = arith.cmpi sge, %32, %33 : vector<256x128xi32>
    %c14_i32 = arith.constant 14 : i32
    %35 = vector.broadcast %c14_i32 : i32 to vector<256x128xi32>
    %36 = arith.cmpi sle, %32, %35 : vector<256x128xi32>
    %cst_18 = arith.constant 0.000000e+00 : f32
    %37 = vector.broadcast %cst_18 : f32 to vector<256x128xf32>
    %c7 = arith.constant 7 : index
    %c0_19 = arith.constant 0 : index
    %38 = vector.load %arg13[%c7, %c0_19] : memref<304x128xf32, #tpu.memory_space<vmem>>, vector<256x128xf32>
    %cst_20 = arith.constant 0.000000e+00 : f32
    %39 = vector.broadcast %cst_20 : f32 to vector<256x128xf32>
    %40 = arith.select %34, %38, %39 : vector<256x128xi1>, vector<256x128xf32>
    %c8 = arith.constant 8 : index
    %c0_21 = arith.constant 0 : index
    %41 = vector.load %arg13[%c8, %c0_21] : memref<304x128xf32, #tpu.memory_space<vmem>>, vector<256x128xf32>
    %c9 = arith.constant 9 : index
    %c0_22 = arith.constant 0 : index
    %42 = vector.load %arg13[%c9, %c0_22] : memref<304x128xf32, #tpu.memory_space<vmem>>, vector<256x128xf32>
    %cst_23 = arith.constant 0.000000e+00 : f32
    %43 = vector.broadcast %cst_23 : f32 to vector<256x128xf32>
    %44 = arith.select %36, %42, %43 : vector<256x128xi1>, vector<256x128xf32>
    %45 = tpu.concatenate %40, %41, %44 in 1 : vector<256x128xf32>, vector<256x128xf32>, vector<256x128xf32> -> vector<256x384xf32>
    %46 = arith.truncf %45 : vector<256x384xf32> to vector<256x384xbf16>
    %c0_24 = arith.constant 0 : index
    %c0_25 = arith.constant 0 : index
    %c0_26 = arith.constant 0 : index
    %47 = vector.load %arg4[%c0_24, %c0_25, %c0_26] : memref<3x384x128xbf16, #tpu.memory_space<vmem>>, vector<1x384x128xbf16>
    %48 = vector.shape_cast %47 : vector<1x384x128xbf16> to vector<384x128xbf16>
    %cst_27 = arith.constant dense<0.000000e+00> : vector<256x128xf32>
    %49 = tpu.matmul %46, %48, %cst_27 {dimension_numbers = #tpu.dot_dimension_numbers<[1], [0], [0], [1], [0, 0, 1, 1], [], []>} : vector<256x384xbf16>, vector<384x128xbf16>, vector<256x128xf32> -> vector<256x128xf32>
    %50 = arith.addf %37, %49 : vector<256x128xf32>
    %c23 = arith.constant 23 : index
    %c0_28 = arith.constant 0 : index
    %51 = vector.load %arg13[%c23, %c0_28] : memref<304x128xf32, #tpu.memory_space<vmem>>, vector<256x128xf32>
    %cst_29 = arith.constant 0.000000e+00 : f32
    %52 = vector.broadcast %cst_29 : f32 to vector<256x128xf32>
    %53 = arith.select %34, %51, %52 : vector<256x128xi1>, vector<256x128xf32>
    %c24_30 = arith.constant 24 : index
    %c0_31 = arith.constant 0 : index
    %54 = vector.load %arg13[%c24_30, %c0_31] : memref<304x128xf32, #tpu.memory_space<vmem>>, vector<256x128xf32>
    %c25 = arith.constant 25 : index
    %c0_32 = arith.constant 0 : index
    %55 = vector.load %arg13[%c25, %c0_32] : memref<304x128xf32, #tpu.memory_space<vmem>>, vector<256x128xf32>
    %cst_33 = arith.constant 0.000000e+00 : f32
    %56 = vector.broadcast %cst_33 : f32 to vector<256x128xf32>
    %57 = arith.select %36, %55, %56 : vector<256x128xi1>, vector<256x128xf32>
    %58 = tpu.concatenate %53, %54, %57 in 1 : vector<256x128xf32>, vector<256x128xf32>, vector<256x128xf32> -> vector<256x384xf32>
    %59 = arith.truncf %58 : vector<256x384xf32> to vector<256x384xbf16>
    %c1 = arith.constant 1 : index
    %c0_34 = arith.constant 0 : index
    %c0_35 = arith.constant 0 : index
    %60 = vector.load %arg4[%c1, %c0_34, %c0_35] : memref<3x384x128xbf16, #tpu.memory_space<vmem>>, vector<1x384x128xbf16>
    %61 = vector.shape_cast %60 : vector<1x384x128xbf16> to vector<384x128xbf16>
    %cst_36 = arith.constant dense<0.000000e+00> : vector<256x128xf32>
    %62 = tpu.matmul %59, %61, %cst_36 {dimension_numbers = #tpu.dot_dimension_numbers<[1], [0], [0], [1], [0, 0, 1, 1], [], []>} : vector<256x384xbf16>, vector<384x128xbf16>, vector<256x128xf32> -> vector<256x128xf32>
    %63 = arith.addf %50, %62 : vector<256x128xf32>
    %c39 = arith.constant 39 : index
    %c0_37 = arith.constant 0 : index
    %64 = vector.load %arg13[%c39, %c0_37] : memref<304x128xf32, #tpu.memory_space<vmem>>, vector<256x128xf32>
    %cst_38 = arith.constant 0.000000e+00 : f32
    %65 = vector.broadcast %cst_38 : f32 to vector<256x128xf32>
    %66 = arith.select %34, %64, %65 : vector<256x128xi1>, vector<256x128xf32>
    %c40 = arith.constant 40 : index
    %c0_39 = arith.constant 0 : index
    %67 = vector.load %arg13[%c40, %c0_39] : memref<304x128xf32, #tpu.memory_space<vmem>>, vector<256x128xf32>
    %c41 = arith.constant 41 : index
    %c0_40 = arith.constant 0 : index
    %68 = vector.load %arg13[%c41, %c0_40] : memref<304x128xf32, #tpu.memory_space<vmem>>, vector<256x128xf32>
    %cst_41 = arith.constant 0.000000e+00 : f32
    %69 = vector.broadcast %cst_41 : f32 to vector<256x128xf32>
    %70 = arith.select %36, %68, %69 : vector<256x128xi1>, vector<256x128xf32>
    %71 = tpu.concatenate %66, %67, %70 in 1 : vector<256x128xf32>, vector<256x128xf32>, vector<256x128xf32> -> vector<256x384xf32>
    %72 = arith.truncf %71 : vector<256x384xf32> to vector<256x384xbf16>
    %c2 = arith.constant 2 : index
    %c0_42 = arith.constant 0 : index
    %c0_43 = arith.constant 0 : index
    %73 = vector.load %arg4[%c2, %c0_42, %c0_43] : memref<3x384x128xbf16, #tpu.memory_space<vmem>>, vector<1x384x128xbf16>
    %74 = vector.shape_cast %73 : vector<1x384x128xbf16> to vector<384x128xbf16>
    %cst_44 = arith.constant dense<0.000000e+00> : vector<256x128xf32>
    %75 = tpu.matmul %72, %74, %cst_44 {dimension_numbers = #tpu.dot_dimension_numbers<[1], [0], [0], [1], [0, 0, 1, 1], [], []>} : vector<256x384xbf16>, vector<384x128xbf16>, vector<256x128xf32> -> vector<256x128xf32>
    %76 = arith.addf %63, %75 : vector<256x128xf32>
    %c0_45 = arith.constant 0 : index
    %c0_46 = arith.constant 0 : index
    %77 = vector.load %arg5[%c0_45, %c0_46] : memref<1x128xf32, #tpu.memory_space<vmem>>, vector<1x128xf32>
    %78 = vector.broadcast %77 : vector<1x128xf32> to vector<256x128xf32>
    %79 = arith.addf %76, %78 : vector<256x128xf32>
    %cst_47 = arith.constant 0.000000e+00 : f32
    %80 = vector.broadcast %cst_47 : f32 to vector<256x128xf32>
    %81 = arith.maximumf %79, %80 : vector<256x128xf32>
    %82 = arith.truncf %81 : vector<256x128xf32> to vector<256x128xbf16>
    %c0_48 = arith.constant 0 : index
    %c0_49 = arith.constant 0 : index
    %83 = vector.load %arg6[%c0_48, %c0_49] : memref<128x256xbf16, #tpu.memory_space<vmem>>, vector<128x256xbf16>
    %cst_50 = arith.constant dense<0.000000e+00> : vector<256x256xf32>
    %84 = tpu.matmul %82, %83, %cst_50 {dimension_numbers = #tpu.dot_dimension_numbers<[1], [0], [0], [1], [0, 0, 1, 1], [], []>} : vector<256x128xbf16>, vector<128x256xbf16>, vector<256x256xf32> -> vector<256x256xf32>
    %c0_51 = arith.constant 0 : index
    %c0_52 = arith.constant 0 : index
    %85 = vector.load %arg7[%c0_51, %c0_52] : memref<1x256xf32, #tpu.memory_space<vmem>>, vector<1x256xf32>
    %86 = vector.broadcast %85 : vector<1x256xf32> to vector<256x256xf32>
    %87 = arith.addf %84, %86 : vector<256x256xf32>
    %cst_53 = arith.constant dense<0.000000e+00> : vector<256xf32>
    %88 = vector.multi_reduction <add>, %87, %cst_53 [0] : vector<256x256xf32> to vector<256xf32>
    %89 = vector.shape_cast %88 : vector<256xf32> to vector<1x256xf32>
    %cst_54 = arith.constant 2.560000e+02 : f32
    %90 = vector.broadcast %cst_54 : f32 to vector<1x256xf32>
    %91 = arith.divf %89, %90 : vector<1x256xf32>
    %c0_55 = arith.constant 0 : index
    %c0_56 = arith.constant 0 : index
    %92 = vector.load %arg8[%c0_55, %c0_56] : memref<256x16xf32, #tpu.memory_space<vmem>>, vector<256x16xf32>
    %cst_57 = arith.constant dense<0.000000e+00> : vector<1x16xf32>
    %93 = tpu.matmul %91, %92, %cst_57 {dimension_numbers = #tpu.dot_dimension_numbers<[1], [0], [0], [1], [0, 0, 1, 1], [], []>} : vector<1x256xf32>, vector<256x16xf32>, vector<1x16xf32> -> vector<1x16xf32>
    %c0_58 = arith.constant 0 : index
    %c0_59 = arith.constant 0 : index
    %94 = vector.load %arg9[%c0_58, %c0_59] : memref<1x16xf32, #tpu.memory_space<vmem>>, vector<1x16xf32>
    %95 = arith.addf %93, %94 : vector<1x16xf32>
    %cst_60 = arith.constant 0.000000e+00 : f32
    %96 = vector.broadcast %cst_60 : f32 to vector<1x16xf32>
    %97 = arith.maximumf %95, %96 : vector<1x16xf32>
    %c0_61 = arith.constant 0 : index
    %c0_62 = arith.constant 0 : index
    %98 = vector.load %arg10[%c0_61, %c0_62] : memref<16x256xf32, #tpu.memory_space<vmem>>, vector<16x256xf32>
    %cst_63 = arith.constant dense<0.000000e+00> : vector<1x256xf32>
    %99 = tpu.matmul %97, %98, %cst_63 {dimension_numbers = #tpu.dot_dimension_numbers<[1], [0], [0], [1], [0, 0, 1, 1], [], []>} : vector<1x16xf32>, vector<16x256xf32>, vector<1x256xf32> -> vector<1x256xf32>
    %c0_64 = arith.constant 0 : index
    %c0_65 = arith.constant 0 : index
    %100 = vector.load %arg11[%c0_64, %c0_65] : memref<1x256xf32, #tpu.memory_space<vmem>>, vector<1x256xf32>
    %101 = arith.addf %99, %100 : vector<1x256xf32>
    %102 = arith.negf %101 : vector<1x256xf32>
    %103 = math.exp %102 : vector<1x256xf32>
    %cst_66 = arith.constant 1.000000e+00 : f32
    %104 = vector.broadcast %cst_66 : f32 to vector<1x256xf32>
    %105 = arith.addf %104, %103 : vector<1x256xf32>
    %106 = arith.divf %104, %105 : vector<1x256xf32>
    %107 = vector.broadcast %106 : vector<1x256xf32> to vector<256x256xf32>
    %108 = arith.mulf %87, %107 : vector<256x256xf32>
    %109 = arith.addf %108, %2 : vector<256x256xf32>
    %cst_67 = arith.constant 0.000000e+00 : f32
    %110 = vector.broadcast %cst_67 : f32 to vector<256x256xf32>
    %111 = arith.maximumf %109, %110 : vector<256x256xf32>
    %112 = vector.shape_cast %111 : vector<256x256xf32> to vector<1x16x16x256xf32>
    %c0_68 = arith.constant 0 : index
    %c0_69 = arith.constant 0 : index
    %c0_70 = arith.constant 0 : index
    %c0_71 = arith.constant 0 : index
    %113 = vector.load %arg12[%c0_68, %c0_69, %c0_70, %c0_71] : memref<1x16x16x256xf32, #tpu.memory_space<vmem>>, vector<1x16x16x256xf32>
    tpu.vector_store %arg12[%c0_68, %c0_69, %c0_70, %c0_71], %112 {strides = array<i32>} : memref<1x16x16x256xf32, #tpu.memory_space<vmem>>, vector<1x16x16x256xf32>,
    return
  }
  func.func @transform_0(%arg0: i32) -> (i32, i32, i32, i32) {
    %c0_i32 = arith.constant 0 : i32
    %c0_i32_0 = arith.constant 0 : i32
    %c0_i32_1 = arith.constant 0 : i32
    %c0_i32_2 = arith.constant 0 : i32
    return %arg0, %c0_i32, %c0_i32_0, %c0_i32_1 : i32, i32, i32, i32
  }
  func.func @transform_1(%arg0: i32) -> (i32, i32) {
    %c0_i32 = arith.constant 0 : i32
    %c0_i32_0 = arith.constant 0 : i32
    %c0_i32_1 = arith.constant 0 : i32
    return %c0_i32, %c0_i32_0 : i32, i32
  }
  func.func @transform_2(%arg0: i32) -> (i32, i32) {
    %c0_i32 = arith.constant 0 : i32
    %c0_i32_0 = arith.constant 0 : i32
    %c0_i32_1 = arith.constant 0 : i32
    return %c0_i32, %c0_i32_0 : i32, i32
  }
  func.func @transform_3(%arg0: i32) -> (i32, i32, i32) {
    %c0_i32 = arith.constant 0 : i32
    %c0_i32_0 = arith.constant 0 : i32
    %c0_i32_1 = arith.constant 0 : i32
    %c0_i32_2 = arith.constant 0 : i32
    return %c0_i32, %c0_i32_0, %c0_i32_1 : i32, i32, i32
  }
  func.func @transform_4(%arg0: i32) -> (i32, i32) {
    %c0_i32 = arith.constant 0 : i32
    %c0_i32_0 = arith.constant 0 : i32
    %c0_i32_1 = arith.constant 0 : i32
    return %c0_i32, %c0_i32_0 : i32, i32
  }
  func.func @transform_5(%arg0: i32) -> (i32, i32) {
    %c0_i32 = arith.constant 0 : i32
    %c0_i32_0 = arith.constant 0 : i32
    %c0_i32_1 = arith.constant 0 : i32
    return %c0_i32, %c0_i32_0 : i32, i32
  }
  func.func @transform_6(%arg0: i32) -> (i32, i32) {
    %c0_i32 = arith.constant 0 : i32
    %c0_i32_0 = arith.constant 0 : i32
    %c0_i32_1 = arith.constant 0 : i32
    return %c0_i32, %c0_i32_0 : i32, i32
  }
  func.func @transform_7(%arg0: i32) -> (i32, i32) {
    %c0_i32 = arith.constant 0 : i32
    %c0_i32_0 = arith.constant 0 : i32
    %c0_i32_1 = arith.constant 0 : i32
    return %c0_i32, %c0_i32_0 : i32, i32
  }
  func.func @transform_8(%arg0: i32) -> (i32, i32) {
    %c0_i32 = arith.constant 0 : i32
    %c0_i32_0 = arith.constant 0 : i32
    %c0_i32_1 = arith.constant 0 : i32
    return %c0_i32, %c0_i32_0 : i32, i32
  }
  func.func @transform_9(%arg0: i32) -> (i32, i32) {
    %c0_i32 = arith.constant 0 : i32
    %c0_i32_0 = arith.constant 0 : i32
    %c0_i32_1 = arith.constant 0 : i32
    return %c0_i32, %c0_i32_0 : i32, i32
  }
  func.func @transform_10(%arg0: i32) -> (i32, i32) {
    %c0_i32 = arith.constant 0 : i32
    %c0_i32_0 = arith.constant 0 : i32
    %c0_i32_1 = arith.constant 0 : i32
    return %c0_i32, %c0_i32_0 : i32, i32
  }
  func.func @transform_11(%arg0: i32) -> (i32, i32, i32, i32) {
    %c0_i32 = arith.constant 0 : i32
    %c0_i32_0 = arith.constant 0 : i32
    %c0_i32_1 = arith.constant 0 : i32
    %c0_i32_2 = arith.constant 0 : i32
    return %arg0, %c0_i32, %c0_i32_0, %c0_i32_1 : i32, i32, i32, i32
  }
}

</mosaic_0001>

<bundles_post_ra>
// kernel: tpu_custom_call.1
= control target key start
LH: loop header
LB: loop body
LE: loop exit
PB: predicated region body
PF: predicated region fallthrough
CT: control target
= control target key end

     0   :  { %s8702_s0 = inlined_call_operand.hbm [shape: f32[2,16,16,256], index: 0, kind: input, shape index: {}]   ;;  %s8703_s1 = inlined_call_operand.vmem [shape: bf16[256,128], index: 1, kind: input, shape index: {}]   ;;  %s8704_s2 = inlined_call_operand.vmem [shape: f32[1,128], index: 2, kind: input, shape index: {}]   ;;  %s8705_s3 = inlined_call_operand.hbm [shape: bf16[3,384,128], index: 3, kind: input, shape index: {}]   ;;  %s8706_s4 = inlined_call_operand.vmem [shape: f32[1,128], index: 4, kind: input, shape index: {}]   ;;  %s8707_s5 = inlined_call_operand.vmem [shape: bf16[128,256], index: 5, kind: input, shape index: {}]   ;;  %s8708_s6 = inlined_call_operand.vmem [shape: f32[1,256], index: 6, kind: input, shape index: {}]   ;;  %s8709_s7 = inlined_call_operand.vmem [shape: f32[256,16], index: 7, kind: input, shape index: {}]   ;;  %s8710_s8 = inlined_call_operand.vmem [shape: f32[1,16], index: 8, kind: input, shape index: {}]   ;;  %s8711_s9 = inlined_call_operand.vmem [shape: f32[16,256], index: 9, kind: input, shape index: {}]   ;;  %s8712_s10 = inlined_call_operand.vmem [shape: f32[1,256], index: 10, kind: input, shape index: {}]   ;;  %s8713_s11 = inlined_call_operand.hbm [shape: f32[2,16,16,256], index: 11, kind: output, shape index: {}]  }
   0x1   :  { %8812 = sst [smem:[#allocation42_spill]] %s8713_s11 }
   0x2   :  { %16 = vsyncpa [#allocation4], 0 }
   0x3   :  { %18 = vsyncpa [#allocation4 + $0x1], 0 }
   0x4   :  { %19 = vsyncpa [#allocation7], 0 }
   0x5   :  { %20 = vsyncpa [#allocation5], 0 }
   0x6   :  { %22 = vsyncpa [#allocation5 + $0x1], 0  ;;  %s6273_s17 = smov 0   ;;  %s6275_s18 = smov 0  }
   0x7   :  { %s6277_s19 = smov 0   ;;  %s6279_s20 = smov 0  }
   0x8 LB: > { %8813 = sst [smem:[#allocation12_spill]] %s6187_s17  ;;  %s6294_s21 = sadd.s32 4294967295, %s6199_s20   ;;  %s6199_s20 = sphi %s6279_s20, %s9072_s20   ;;  %s6195_s19 = sphi %s6277_s19, %s9075_s19   ;;  %s6191_s18 = sphi %s6275_s18, %s9074_s18   ;;  %s6187_s17 = sphi %s6273_s17, %s9073_s17  }
   0x9   : > { %s4492_s22 = sadd.s32 4294967294, %s6199_s20   ;;  %p48_p0 = scmp.ne.s32.totalorder %s6191_s18, %s6187_s17 }
   0xa   : > { %p8717_p1 = scmp.eq.s32.totalorder %s6294_s21, 0  ;;  %p288_p3 = scmp.eq.s32.totalorder %s4492_s22, 1 }
   0xb   : > { %p4493_p5 = scmp.ge.s32.totalorder %s6199_s20, 1  ;;  %p295_p7 = scmp.lt.s32.totalorder %s6199_s20, 3 }
   0xc   : > { %p6303_p4 = por %p8717_p1, %p48_p0  ;;  %p6308_p6 = por %p288_p3, %p48_p0 }
   0xd   : > { %p6313_p8 = pnand %p4493_p5, %p295_p7  ;;  %s6201_s26 = smov [#allocation6]  }
   0xe   : > { %s8814_s23 = scalar_select %p6303_p4, 1, 0 }
   0xf   : > { %s8815_s24 = scalar_select %p6308_p6, 1, 0 }
  0x10   : > { %s8817_s25 = scalar_select %p6313_p8, 1, 0 }
  0x11   : > { %8816 = sst [smem:[#allocation13_spill]] %s8815_s24  ;;  %s313_s27 = sshll.u32 %s6201_s26, 4  ;;  %s6317_s27 = int_to_ptr.vmem [resolvable:$true] %s313_s27 }
  0x12   : > { %p5826_p9 = pneg %p6313_p8  ;;  %s6329_s29 = sadd.s32 1, %s6199_s20  }
  0x13   : > { %8819 = sst [smem:[#allocation14_spill]] %s6329_s29  ;;  %s35_s30 = sadd.s32 1, %s6195_s19 }
  0x14   : > { %p6324_p11 = pnand %p5826_p9, %p8717_p1  ;;  %s32_s12 = ssub.s32 %s6199_s20, %s6329_s29 }
  0x15   : > { %s6071_s15 = scalar_lea.hbm %s8705_s3, 9216 }
  0x16   : > { %p6072_p12 = scmp.ne.s32.totalorder %s8705_s3, %s6071_s15  ;;  %p6073_p13 = pneg %p6324_p11 }
  0x17   : > { %p6078_p5 = scmp.lt.u32.totalorder %s6071_s15, %s8705_s3 }
  0x18   : > { %p6074_p0 = pnand %p6073_p13, %p6072_p12 }
  0x1a   : > { %p6075_p3 = pneg %p6074_p0 }
  0x1c   : > { %p6080_p7 = pnand %p6078_p5, %p6075_p3 }
  0x1e   : > { %6083 = shalt.err (!%p6080_p7)
}
  0x1f   : > { %s6084_s29 = scalar_lea.vmem %s6317_s27, 9216  ;;  %p6092_p2 = scmp.lt.s32.totalorder %s6317_s27, %s6317_s27 }
  0x20   : > { %p6085_p9 = scmp.ne.s32.totalorder %s6317_s27, %s6084_s29  ;;  %p6093_p6 = scmp.lt.s32.totalorder %s6084_s29, %s6084_s29 }
  0x22   : > { %p6087_p10 = pnand %p6085_p9, %p6073_p13  ;;  %p6094_p4 = por %p6093_p6, %p6092_p2 }
  0x24   : > { %p6088_p1 = pneg %p6087_p10 }
  0x26   : > { %p6095_p8 = pnand %p6094_p4, %p6088_p1 }
  0x28   : > { %6098 = shalt.err (!%p6095_p8)
}
  0x29   : > { %s6202_s13 = smov 64   ;;  %s6203_s24 = smov 4  }
  0x2a   : > { %5829 = dma.hbm_to_vmem [thread:$0]  (!%p6324_p11), %s8705_s3, 9216, %s6317_s27, [#allocation7], %s6202_s13, %s6202_s13, %s6203_s24  }
  0x2b   : > { %p33_p2 = scmp.eq.s32.totalorder %s32_s12, 0  ;;  %p42_p1 = scmp.ne.s32.totalorder %s6195_s19, %s6191_s18 }
  0x2c   : > { %p43_p4 = scmp.eq.s32.totalorder %s6199_s20, 0  ;;  %p5839_p6 = scmp.lt.s32.totalorder %s6199_s20, 2 }
  0x2d   : > { %s6360_s29 = scalar_select %p33_p2, %s6195_s19, %s35_s30  }
  0x2e   : > { %p44_p8 = por %p43_p4, %p42_p1  ;;  %p8820_p10 = scmp.eq.s32.totalorder %s6294_s21, 1 }
  0x2f   : > { %s348_s22 = sand.u32 1, %s6195_s19   ;;  %s4905_s26 = sshll.u32 %s6199_s20, 13 }
  0x30   : > { %p6364_p12 = por %p8820_p10, %p42_p1  ;;  %s4496_s17 = sshll.u32 %s348_s22, 9 }
  0x31   : > { %s6373_s14 = scalar_lea.hbm %s8702_s0, %s4905_s26  ;;  %s352_s27 = scalar_lea.vmem [#allocation3], %s4496_s17 }
  0x32   : > { %s359_s30 = sshll.u32 %s352_s27, 4  ;;  %p6375_p11 = pnand %p5839_p6, %p44_p8  ;;  %s6379_s30 = int_to_ptr.vmem [resolvable:$true] %s359_s30 }
  0x33   : > { %s6381_s13 = scalar_lea.sflag [#allocation4], %s348_s22  ;;  %s6099_s24 = scalar_lea.hbm %s6373_s14, 8192 }
  0x34   : > { %p6100_p13 = scmp.ne.s32.totalorder %s6373_s14, %s6099_s24  ;;  %p6101_p0 = pneg %p6375_p11 }
  0x35   : > { %s6104_s15 = scalar_lea.hbm %s8702_s0, 16384  ;;  %p6105_p7 = scmp.lt.u32.totalorder %s6373_s14, %s8702_s0 }
  0x36   : > { %p6102_p3 = pnand %p6101_p0, %p6100_p13  ;;  %p6106_p9 = scmp.lt.u32.totalorder %s6104_s15, %s6099_s24 }
  0x37   : > { %p6108_p1 = scmp.lt.u32.totalorder %s6099_s24, %s6373_s14 }
  0x38   : > { %p6103_p5 = pneg %p6102_p3  ;;  %p6107_p2 = por %p6106_p9, %p6105_p7 }
  0x3a   : > { %p6109_p4 = por %p6108_p1, %p6107_p2 }
  0x3c   : > { %p6110_p6 = pnand %p6109_p4, %p6103_p5 }
  0x3e   : > { %6113 = shalt.err (!%p6110_p6)
}
  0x3f   : > { %s6114_s22 = scalar_lea.vmem %s6379_s30, 8192  ;;  %s6204_s27 = smov [#allocation3]  }
  0x40   : > { %p6115_p8 = scmp.ne.s32.totalorder %s6379_s30, %s6114_s22  ;;  %s6119_s11 = sshll.u32 %s6204_s27, 4  ;;  %s6120_s11 = int_to_ptr.vmem [resolvable:$false] %s6119_s11 }
  0x41   : > { %s6121_s17 = scalar_lea.vmem %s6120_s11, 16384  ;;  %p6122_p3 = scmp.lt.s32.totalorder %s6379_s30, %s6120_s11 }
  0x42   : > { %p6117_p10 = pnand %p6115_p8, %p6101_p0  ;;  %p6123_p7 = scmp.lt.s32.totalorder %s6121_s17, %s6114_s22 }
  0x44   : > { %p6118_p13 = pneg %p6117_p10  ;;  %p6124_p9 = por %p6123_p7, %p6122_p3 }
  0x46   : > { %p6125_p2 = pnand %p6124_p9, %p6118_p13 }
  0x48   : > { %6128 = shalt.err (!%p6125_p2)
}
  0x49   : > { %s6205_s24 = smov 256   ;;  %s6206_s15 = smov 16  }
  0x4a   : > { %5833 = dma.hbm_to_vmem [thread:$0]  (!%p6375_p11), %s6373_s14, 8192, %s6379_s30, %s6381_s13, %s6205_s24, %s6205_s24, %s6206_s15  }
  0x4b   : > { %p8823_p0 = scmp.ne.s32.totalorder %s8817_s25, 0 }
  0x4d   : > { %371 = sbr.rel (%p8823_p0) target bundleno = 1751 (0x6d7), region = 64 }
  0x54   : > { %s6412_s26 = sand.u32 1, %s6191_s18   ;;  %p8824_p5 = scmp.ne.s32.totalorder %s8814_s23, 0 }
  0x55   : > { %s4500_s28 = sshll.u32 %s6412_s26, 9  ;;  %s374_s22 = scalar_lea.sflag [#allocation4], %s6412_s26 }
  0x56   : > { %s6418_s27 = scalar_lea.vmem [#allocation3], %s4500_s28 }
  0x57   : > { %6174 = dma.done.wait (%p8824_p5), %s374_s22, 8192  }
  0x58   : > { %6176 = vsyncadd (%p8824_p5), %s374_s22, 4294959104  ;;  %p8825_p11 = scmp.eq.s32.totalorder %s6294_s21, 0 }
  0x5a   : > { %6178 = dma.done.wait (%p8825_p11), [#allocation7], 9216   ;;  %p8826_p1 = pmov %p8825_p11 }
  0x5b   : > { %v5884_v0 = vld [vmem:[%s8703_s1 + $0x40] sm:$0xff]   ;;  %v5886_v2 = vld [vmem:[%s8703_s1 + $0x48] sm:$0xff]   ;;  %v5888_v4 = vld [vmem:[%s8703_s1 + $0x50] sm:$0xff]   ;;  %vm8736_vm1 = vmmov 1   ;;  %s9064_s17 = sld [smem:[#allocation42_spill]]  ;;  %s4396_s22 = scalar_lea.sflag [#allocation5], %s6412_s26 }
  0x5c   : > { %6180 = vsyncadd (%p8826_p1), [#allocation7], 4294958080  ;;  %v5885_v1 = vld [vmem:[%s8703_s1] sm:$0xff]   ;;  %4907 = vmatprep.subr.bf16.mxu0 %v5884_v0  ;;  %v5887_v3 = vld [vmem:[%s8703_s1 + $0x8] sm:$0xff]   ;;  %s6210_s14 = smov [#allocation8]  }
  0x5d   : > { %4908 = vmatpush3.bf16.msra.mxu0 %v5885_v1  ;;  %v5889_v5 = vld [vmem:[%s8703_s1 + $0x10] sm:$0xff]   ;;  %v5890_v6 = vld [vmem:[%s8703_s1 + $0x58] sm:$0xff]   ;;  %v5892_v8 = vld [vmem:[%s8703_s1 + $0x60] sm:$0xff]   ;;  %s6133_s30 = sshll.u32 %s6210_s14, 4  ;;  %s6134_s30 = int_to_ptr.vmem [resolvable:$false] %s6133_s30 }
  0x5e   : > { %4909 = vmatprep.subr.bf16.mxu0 %v5886_v2  ;;  %v5891_v7 = vld [vmem:[%s8703_s1 + $0x18] sm:$0xff]   ;;  %v5893_v9 = vld [vmem:[%s8703_s1 + $0x20] sm:$0xff]   ;;  %v5894_v10 = vld [vmem:[%s8703_s1 + $0x68] sm:$0xff]   ;;  %s6135_s12 = scalar_lea.vmem %s6134_s30, 16384 }
  0x5f   : > { %v422_v11 = vld [vmem:[%s6418_s27 + $0x8] sm:$0xff]  ;;  %v424_v12 = vld [vmem:[%s6418_s27 + $0x18] sm:$0xff]  ;;  %v5896_v15 = vld [vmem:[%s8703_s1 + $0x70] sm:$0xff]  }
  0x60   : > { %v486_v13 = vpack.c.bf16 %v424_v12, %v422_v11  ;;  %v5895_v14 = vld [vmem:[%s8703_s1 + $0x28] sm:$0xff]   ;;  %v5897_v16 = vld [vmem:[%s8703_s1 + $0x30] sm:$0xff]   ;;  %v5898_v17 = vld [vmem:[%s8703_s1 + $0x78] sm:$0xff]  }
  0x61   : > { %4910 = vmatpush3.bf16.msra.mxu0 %v5887_v3  ;;  %v5899_v18 = vld [vmem:[%s8703_s1 + $0x38] sm:$0xff]   ;;  %v421_v19 = vld [vmem:[%s6418_s27] sm:$0xff]  ;;  %v423_v20 = vld [vmem:[%s6418_s27 + $0x10] sm:$0xff]  ;;  %s9065_s24 = smov %s9064_s17 }
  0x62   : > { %4911 = vmatprep.subr.bf16.mxu0 %v5888_v4  ;;  %684 = vmatprep.mubr.bf16.mxu0 %v486_v13  ;;  %v426_v21 = vld [vmem:[%s6418_s27 + $0x28] sm:$0xff]  ;;  %v428_v22 = vld [vmem:[%s6418_s27 + $0x38] sm:$0xff]  ;;  %v485_v23 = vpack.c.bf16 %v423_v20, %v421_v19  ;;  %v425_v25 = vld [vmem:[%s6418_s27 + $0x20] sm:$0xff] }
  0x63   : > { %v488_v24 = vpack.c.bf16 %v428_v22, %v426_v21  ;;  %v427_v26 = vld [vmem:[%s6418_s27 + $0x30] sm:$0xff]  ;;  %v430_v27 = vld [vmem:[%s6418_s27 + $0x48] sm:$0xff]  ;;  %v432_v28 = vld [vmem:[%s6418_s27 + $0x58] sm:$0xff] }
  0x64   : > { %v487_v29 = vpack.c.bf16 %v427_v26, %v425_v25  ;;  %v6486_v30 = vld [vmem:[#allocation6 + $0x140] sm:$0xff]   ;;  %v490_v31 = vpack.c.bf16 %v432_v28, %v430_v27  ;;  %v6488_v32 = vld [vmem:[#allocation6 + $0x148] sm:$0xff]   ;;  %v431_v34 = vld [vmem:[%s6418_s27 + $0x50] sm:$0xff] }
  0x65   : > { %4912 = vmatpush3.bf16.msra.mxu0 %v5889_v5  ;;  %v429_v33 = vld [vmem:[%s6418_s27 + $0x40] sm:$0xff]  ;;  %v6494_v35 = vld [vmem:[#allocation6 + $0x150] sm:$0xff]   ;;  %v434_v36 = vld [vmem:[%s6418_s27 + $0x68] sm:$0xff] }
  0x66   : > { %4913 = vmatprep.subr.bf16.mxu0 %v5890_v6  ;;  %v436_v37 = vld [vmem:[%s6418_s27 + $0x78] sm:$0xff]  ;;  %v5904_v38 = vld [vmem:[#allocation6 + $0x100] sm:$0xff]   ;;  %v5906_v40 = vld [vmem:[#allocation6 + $0x108] sm:$0xff]   ;;  %v489_v42 = vpack.c.bf16 %v431_v34, %v429_v33 }
  0x67   : > { %v5905_v39 = vld [vmem:[#allocation6 + $0xc0] sm:$0xff]   ;;  %5019 = vmatprep.subr.bf16.mxu1 %v5904_v38  ;;  %v6500_v41 = vld [vmem:[#allocation6 + $0x158] sm:$0xff]   ;;  %v5908_v43 = vld [vmem:[#allocation6 + $0xc8] sm:$0xff]   ;;  %v492_v44 = vpack.c.bf16 %v436_v37, %v434_v36 }
  0x68   : > { %5020 = vmatpush3.bf16.msra.mxu1 %v5905_v39  ;;  %v5909_v45 = vld [vmem:[#allocation6 + $0x110] sm:$0xff]   ;;  %v6503_v46 = vld [vmem:[#allocation6 + $0x160] sm:$0xff]   ;;  %v438_v50 = vld [vmem:[%s6418_s27 + $0x88] sm:$0xff] }
  0x69   : > { %4914 = vmatpush3.bf16.msra.mxu0 %v5891_v7  ;;  %5021 = vmatprep.subr.bf16.mxu1 %v5906_v40  ;;  %v5910_v47 = vld [vmem:[#allocation6 + $0xd0] sm:$0xff]   ;;  %v433_v48 = vld [vmem:[%s6418_s27 + $0x60] sm:$0xff]  ;;  %v440_v51 = vld [vmem:[%s6418_s27 + $0x98] sm:$0xff] }
  0x6a   : > { %4915 = vmatprep.subr.bf16.mxu0 %v5892_v8  ;;  %v435_v49 = vld [vmem:[%s6418_s27 + $0x70] sm:$0xff]  ;;  %v494_v53 = vpack.c.bf16 %v440_v51, %v438_v50  ;;  %v437_v54 = vld [vmem:[%s6418_s27 + $0x80] sm:$0xff]  ;;  %v442_v56 = vld [vmem:[%s6418_s27 + $0xa8] sm:$0xff] }
  0x6b   : > { %v491_v52 = vpack.c.bf16 %v435_v49, %v433_v48  ;;  %v439_v55 = vld [vmem:[%s6418_s27 + $0x90] sm:$0xff]  ;;  %v444_v57 = vld [vmem:[%s6418_s27 + $0xb8] sm:$0xff]  ;;  %v441_v60 = vld [vmem:[%s6418_s27 + $0xa0] sm:$0xff] }
  0x6c   : > { %5022 = vmatpush3.bf16.msra.mxu1 %v5908_v43  ;;  %v493_v58 = vpack.c.bf16 %v439_v55, %v437_v54  ;;  %v496_v59 = vpack.c.bf16 %v444_v57, %v442_v56  ;;  %v443_v61 = vld [vmem:[%s6418_s27 + $0xb0] sm:$0xff]  ;;  %v446_v62 = vld [vmem:[%s6418_s27 + $0xc8] sm:$0xff]  ;;  %v448_v63 = vld [vmem:[%s6418_s27 + $0xd8] sm:$0xff] }
  0x6d   : > { %4916 = vmatpush3.bf16.msra.mxu0 %v5893_v9  ;;  %5023 = vmatprep.subr.bf16.mxu1 %v5909_v45  ;;  %v495_v0 = vpack.c.bf16 %v443_v61, %v441_v60  ;;  %v498_v1 = vpack.c.bf16 %v448_v63, %v446_v62  ;;  %v445_v2 = vld [vmem:[%s6418_s27 + $0xc0] sm:$0xff]  ;;  %v447_v3 = vld [vmem:[%s6418_s27 + $0xd0] sm:$0xff]  ;;  %v450_v4 = vld [vmem:[%s6418_s27 + $0xe8] sm:$0xff] }
  0x6e   : > { %4917 = vmatprep.subr.bf16.mxu0 %v5894_v10  ;;  %v452_v5 = vld [vmem:[%s6418_s27 + $0xf8] sm:$0xff]  ;;  %v497_v6 = vpack.c.bf16 %v447_v3, %v445_v2  ;;  %v449_v8 = vld [vmem:[%s6418_s27 + $0xe0] sm:$0xff]  ;;  %v451_v9 = vld [vmem:[%s6418_s27 + $0xf0] sm:$0xff] }
  0x6f   : > { %v500_v7 = vpack.c.bf16 %v452_v5, %v450_v4  ;;  %v454_v10 = vld [vmem:[%s6418_s27 + $0x108] sm:$0xff]  ;;  %v456_v11 = vld [vmem:[%s6418_s27 + $0x118] sm:$0xff]  ;;  %v499_v12 = vpack.c.bf16 %v451_v9, %v449_v8  ;;  %v457_v20 = vld [vmem:[%s6418_s27 + $0x120] sm:$0xff] }
  0x70   : > { %5024 = vmatpush3.bf16.msra.mxu1 %v5910_v47  ;;  %v502_v13 = vpack.c.bf16 %v456_v11, %v454_v10  ;;  %v459_v21 = vld [vmem:[%s6418_s27 + $0x130] sm:$0xff]  ;;  %v462_v22 = vld [vmem:[%s6418_s27 + $0x148] sm:$0xff]  ;;  %v461_v26 = vld [vmem:[%s6418_s27 + $0x140] sm:$0xff] }
  0x71   : > { %4918 = vmatpush3.bf16.msra.mxu0 %v5895_v14  ;;  %v453_v14 = vld [vmem:[%s6418_s27 + $0x100] sm:$0xff]  ;;  %v463_v27 = vld [vmem:[%s6418_s27 + $0x150] sm:$0xff]  ;;  %v466_v28 = vld [vmem:[%s6418_s27 + $0x168] sm:$0xff] }
  0x72   : > { %4919 = vmatprep.subr.bf16.mxu0 %v5896_v15  ;;  %v455_v15 = vld [vmem:[%s6418_s27 + $0x110] sm:$0xff]  ;;  %v465_v34 = vld [vmem:[%s6418_s27 + $0x160] sm:$0xff]  ;;  %v5911_v37 = vld [vmem:[#allocation6 + $0x118] sm:$0xff]  }
  0x73   : > { %v467_v36 = vld [vmem:[%s6418_s27 + $0x170] sm:$0xff]  ;;  %v470_v38 = vld [vmem:[%s6418_s27 + $0x188] sm:$0xff]  ;;  %v472_v39 = vld [vmem:[%s6418_s27 + $0x198] sm:$0xff]  ;;  %5025 = vmatprep.subr.bf16.mxu1 %v5911_v37 }
  0x74   : > { %v5912_v40 = vld [vmem:[#allocation6 + $0xd8] sm:$0xff]   ;;  %v510_v43 = vpack.c.bf16 %v472_v39, %v470_v38  ;;  %v5914_v45 = vld [vmem:[#allocation6 + $0xe0] sm:$0xff]   ;;  %v471_v48 = vld [vmem:[%s6418_s27 + $0x190] sm:$0xff] }
  0x75   : > { %4920 = vmatpush3.bf16.msra.mxu0 %v5897_v16  ;;  %v458_v16 = vld [vmem:[%s6418_s27 + $0x128] sm:$0xff]  ;;  %5026 = vmatpush3.bf16.msra.mxu1 %v5912_v40  ;;  %v469_v47 = vld [vmem:[%s6418_s27 + $0x180] sm:$0xff]  ;;  %v476_v51 = vld [vmem:[%s6418_s27 + $0x1b8] sm:$0xff] }
  0x76   : > { %4921 = vmatprep.subr.bf16.mxu0 %v5898_v17  ;;  %v460_v17 = vld [vmem:[%s6418_s27 + $0x138] sm:$0xff]  ;;  %v5915_v49 = vld [vmem:[#allocation6 + $0x128] sm:$0xff]   ;;  %v509_v54 = vpack.c.bf16 %v471_v48, %v469_v47  ;;  %v5918_v56 = vld [vmem:[#allocation6 + $0x130] sm:$0xff]  }
  0x77   : > { %v504_v19 = vpack.c.bf16 %v460_v17, %v458_v16  ;;  %v474_v50 = vld [vmem:[%s6418_s27 + $0x1a8] sm:$0xff]  ;;  %v5919_v57 = vld [vmem:[#allocation6 + $0xf0] sm:$0xff]   ;;  %v5920_v60 = vld [vmem:[#allocation6 + $0x138] sm:$0xff]  }
  0x78   : > { %v512_v55 = vpack.c.bf16 %v476_v51, %v474_v50  ;;  %v478_v61 = vld [vmem:[%s6418_s27 + $0x1c8] sm:$0xff]  ;;  %v480_v62 = vld [vmem:[%s6418_s27 + $0x1d8] sm:$0xff]  ;;  %v477_v3 = vld [vmem:[%s6418_s27 + $0x1c0] sm:$0xff] }
  0x79   : > { %4922 = vmatpush3.bf16.msra.mxu0 %v5899_v18  ;;  %v501_v18 = vpack.c.bf16 %v455_v15, %v453_v14  ;;  %v5921_v63 = vld [vmem:[#allocation6 + $0xf8] sm:$0xff]   ;;  %v514_v2 = vpack.c.bf16 %v480_v62, %v478_v61  ;;  %v479_v4 = vld [vmem:[%s6418_s27 + $0x1d0] sm:$0xff]  ;;  %v482_v5 = vld [vmem:[%s6418_s27 + $0x1e8] sm:$0xff] }
  0x7a   : > { %5462 = vmatprep.subr.bf16.mxu0 %v6486_v30  ;;  %v513_v8 = vpack.c.bf16 %v479_v4, %v477_v3  ;;  %v6567_v10 = vld [vmem:[#allocation6 + $0x178] sm:$0xff]   ;;  %v481_v11 = vld [vmem:[%s6418_s27 + $0x1e0] sm:$0xff]  ;;  %v6579_v16 = vld [vmem:[%s8704_s2] ss:$0 sm:$0xff]  ;;  %v8830_v4 = vmov 0 }
  0x7b   : > { %v6573_v14 = vld [vmem:[#allocation6 + $0x80] sm:$0xff]  }
  0x7c   : > { %685 = vmatmul.mubr.bf16.vlgmr.msra.gmra.mrb[0].mxu0 %v485_v23  ;;  %v464_v23 = vld [vmem:[%s6418_s27 + $0x158] sm:$0xff] }
  0x7d   : > { %692 = vmatprep.mubr.bf16.mxu0 %v488_v24  ;;  %5463 = vmatpush3.bf16.msra.mxu0 %v6486_v30  ;;  %v503_v24 = vpack.c.bf16 %v459_v21, %v457_v20  ;;  %v506_v25 = vpack.c.bf16 %v464_v23, %v462_v22 }
  0x7e   : > { %5464 = vmatprep.subr.bf16.mxu0 %v6488_v32 }
  0x81   : > { %5465 = vmatpush3.bf16.msra.mxu0 %v6488_v32 }
  0x82   : > { %5466 = vmatprep.subr.bf16.mxu0 %v6494_v35 }
  0x84   : > { %693 = vmatmul.mubr.bf16.gmra.mrb[4].mxu0 %v487_v29  ;;  %v468_v29 = vld [vmem:[%s6418_s27 + $0x178] sm:$0xff] }
  0x85   : > { %700 = vmatprep.mubr.bf16.mxu0 %v490_v31  ;;  %5467 = vmatpush3.bf16.msra.mxu0 %v6494_v35  ;;  %v505_v31 = vpack.c.bf16 %v463_v27, %v461_v26  ;;  %v508_v33 = vpack.c.bf16 %v468_v29, %v466_v28 }
  0x86   : > { %5468 = vmatprep.subr.bf16.mxu0 %v6500_v41 }
  0x89   : > { %5469 = vmatpush3.bf16.msra.mxu0 %v6500_v41 }
  0x8a   : > { %5470 = vmatprep.subr.bf16.mxu0 %v6503_v46 }
  0x8c   : > { %701 = vmatmul.mubr.bf16.gmra.mrb[8].mxu0 %v489_v42  ;;  %v507_v42 = vpack.c.bf16 %v467_v36, %v465_v34 }
  0x8d   : > { %708 = vmatprep.mubr.bf16.mxu0 %v492_v44  ;;  %5471 = vmatpush3.bf16.msra.mxu0 %v6503_v46  ;;  %v5913_v44 = vld [vmem:[#allocation6 + $0x120] sm:$0xff]  }
  0x8e   : > { %5027 = vmatprep.subr.bf16.mxu1 %v5913_v44 }
  0x8f   : > { %5028 = vmatpush3.bf16.msra.mxu1 %v5914_v45 }
  0x90   : > { %5029 = vmatprep.subr.bf16.mxu1 %v5915_v49 }
  0x94   : > { %709 = vmatmul.mubr.bf16.gmra.mrb[12].mxu0 %v491_v52  ;;  %v5917_v52 = vld [vmem:[#allocation6 + $0xe8] sm:$0xff]  }
  0x95   : > { %716 = vmatprep.mubr.bf16.mxu0 %v494_v53  ;;  %v6207_v53 = vmov 0.0   ;;  %5030 = vmatpush3.bf16.msra.mxu1 %v5917_v52 }
  0x96   : > { %847 = vst [vmem:[#allocation2 + $0x10] sm:$0xff] %v6207_v53  ;;  %845 = vst [vmem:[#allocation2] sm:$0xff] %v6207_v53  ;;  %5031 = vmatprep.subr.bf16.mxu1 %v5918_v56 }
  0x97   : > { %846 = vst [vmem:[#allocation2 + $0x8] sm:$0xff] %v6207_v53  ;;  %848 = vst [vmem:[#allocation2 + $0x118] sm:$0xff] %v6207_v53 }
  0x98   : > { %849 = vst [vmem:[#allocation2 + $0x120] sm:$0xff] %v6207_v53  ;;  %850 = vst [vmem:[#allocation2 + $0x128] sm:$0xff] %v6207_v53 }
  0x99   : > { %5032 = vmatpush3.bf16.msra.mxu1 %v5919_v57 }
  0x9a   : > { %5033 = vmatprep.subr.bf16.mxu1 %v5920_v60 }
  0x9c   : > { %717 = vmatmul.mubr.bf16.gmra.mrb[16].mxu0 %v493_v58  ;;  %v473_v58 = vld [vmem:[%s6418_s27 + $0x1a0] sm:$0xff] }
  0x9d   : > { %724 = vmatprep.mubr.bf16.mxu0 %v496_v59  ;;  %v475_v59 = vld [vmem:[%s6418_s27 + $0x1b0] sm:$0xff]  ;;  %5034 = vmatpush3.bf16.msra.mxu1 %v5921_v63 }
  0x9e   : > { %5642 = vmatprep.subr.bf16.mxu1 %v6486_v30 }
  0xa4   : > { %725 = vmatmul.mubr.bf16.gmra.mrb[20].mxu0 %v495_v0  ;;  %v6554_v0 = vld [vmem:[#allocation6 + $0x168] sm:$0xff]  }
  0xa5   : > { %732 = vmatprep.mubr.bf16.mxu0 %v498_v1  ;;  %v511_v1 = vpack.c.bf16 %v475_v59, %v473_v58  ;;  %5472 = vmatprep.subr.bf16.mxu0 %v6554_v0 }
  0xa6   : > { %5473 = vmatpush3.bf16.msra.mxu0 %v6554_v0 }
  0xac   : > { %733 = vmatmul.mubr.bf16.gmra.mrb[24].mxu0 %v497_v6  ;;  %v484_v6 = vld [vmem:[%s6418_s27 + $0x1f8] sm:$0xff] }
  0xad   : > { %740 = vmatprep.mubr.bf16.mxu0 %v500_v7  ;;  %v6563_v7 = vld [vmem:[#allocation6 + $0x170] sm:$0xff]   ;;  %v516_v9 = vpack.c.bf16 %v484_v6, %v482_v5 }
  0xae   : > { %5474 = vmatprep.subr.bf16.mxu0 %v6563_v7 }
  0xaf   : > { %5475 = vmatpush3.bf16.msra.mxu0 %v6563_v7 }
  0xb0   : > { %5476 = vmatprep.subr.bf16.mxu0 %v6567_v10 }
  0xb3   : > { %5477 = vmatpush3.bf16.msra.mxu0 %v6567_v10 }
  0xb4   : > { %741 = vmatmul.mubr.bf16.gmra.mrb[28].mxu0 %v499_v12  ;;  %v483_v12 = vld [vmem:[%s6418_s27 + $0x1f0] sm:$0xff]  ;;  %5510 = vmatprep.subr.bf16.mxu0 %v6573_v14 }
  0xb5   : > { %748 = vmatprep.mubr.bf16.mxu0 %v502_v13  ;;  %v515_v13 = vpack.c.bf16 %v483_v12, %v481_v11 }
  0xbc   : > { %749 = vmatmul.mubr.bf16.gmra.mrb[32].mxu0 %v501_v18  ;;  %v883_v18 = vlaneseq }
  0xbd   : > { %756 = vmatprep.mubr.bf16.mxu0 %v504_v19 }
  0xc4   : > { %757 = vmatmul.mubr.bf16.gmra.mrb[36].mxu0 %v503_v24  ;;  %v6582_v24 = vshrl.u32 %v883_v18, 7 }
  0xc5   : > { %764 = vmatprep.mubr.bf16.mxu0 %v506_v25 }
  0xc6   : > { %8827 = vst [vmem:[#allocation15_spill] sm:$0xff] %v6582_v24  ;;  %v885_v40 = vadd.s32 8, %v6582_v24  ;;  %v886_v44 = vadd.s32 16, %v6582_v24  ;;  %v887_v61 = vadd.s32 24, %v6582_v24 }
  0xc8   : > { %v927_v48 = vand.u32 15, %v885_v40  ;;  %v934_v57 = vand.u32 15, %v886_v44 }
  0xca   : > { %vm1333_vm3 = vcmp.le.s32.totalorder %v927_v48, 14  ;;  %vm1302_vm4 = vcmp.ge.s32.totalorder %v934_v57, 1  ;;  %v5926_v57 = vld [vmem:[#allocation6 + $0x90] sm:$0xff]  }
  0xcb   : > { %vm6613_vm5 = vmpackc.low %vm1333_vm3, %vm8736_vm1 }
  0xcc   : > { %765 = vmatmul.mubr.bf16.gmra.mrb[40].mxu0 %v505_v31  ;;  %v920_v31 = vand.u32 15, %v6582_v24  ;;  %v8831_v4 = vsel %vm6613_vm5, 4294967295, %v8830_v4  ;;  %vm6620_vm6 = vmpackc.low %vm8736_vm1, %vm1302_vm4 }
  0xcd   : > { %772 = vmatprep.mubr.bf16.mxu0 %v508_v33  ;;  %8832 = vst [vmem:[#allocation16_spill] sm:$0xff] %v8831_v4  ;;  %v5947_v4 = vld [vmem:[#allocation6 + $0x1b8] sm:$0xff]  }
  0xce   : > { %vm1300_vm0 = vcmp.ge.s32.totalorder %v920_v31, 1 }
  0xcf   : > { %vm6594_vm2 = vmpackc.low %vm8736_vm1, %vm1300_vm0 }
  0xd4   : > { %773 = vmatmul.mubr.bf16.gmra.mrb[44].mxu0 %v507_v42 }
  0xd5   : > { %780 = vmatprep.mubr.bf16.mxu0 %v510_v43 }
  0xdc   : > { %781 = vmatmul.mubr.bf16.gmra.mrb[48].mxu0 %v509_v54 }
  0xdd   : > { %788 = vmatprep.mubr.bf16.mxu0 %v512_v55 }
  0xe4   : > { %789 = vmatmul.mubr.bf16.gmra.mrb[52].mxu0 %v511_v1  ;;  %v888_v1 = vadd.s32 32, %v6582_v24 }
  0xe5   : > { %796 = vmatprep.mubr.bf16.mxu0 %v514_v2 }
  0xec   : > { %797 = vmatmul.mubr.bf16.gmra.mrb[56].mxu0 %v513_v8 }
  0xed   : > { %804 = vmatprep.mubr.bf16.mxu0 %v516_v9 }
  0xf4   : > { %805 = vmatmul.mubr.bf16.gmra.mrb[60].mxu0 %v515_v13 }
 0x14f   : > { %v4923_v15 = vpop.f32.mrb[0].mxu0 }
 0x150   : > { %v4924_v17 = vpop.f32.mrb[1].mxu0 }
 0x151   : > { %v4925_v19 = vadd.f32 %v4924_v17, %v4923_v15  ;;  %v4926_v20 = vpop.f32.mrb[2].mxu0 }
 0x152   : > { %v4927_v21 = vpop.f32.mrb[3].mxu0 }
 0x153   : > { %v687_v22 = vadd.f32 %v4925_v19, %v6579_v16  ;;  %v4928_v23 = vadd.f32 %v4927_v21, %v4926_v20  ;;  %v948_v20 = vand.u32 15, %v888_v1 }
 0x155   : > { %v813_v25 = vmax.f32 %v687_v22, 0.0  ;;  %v690_v26 = vadd.f32 %v4928_v23, %v6579_v16  ;;  %vm6641_vm8 = vcmp.ge.s32.totalorder %v948_v20, 1 }
 0x156   : > { %vm6657_vm10 = vmpackc.low %vm8736_vm1, %vm6641_vm8 }
 0x157   : > { %851 = vst [vmem:[#allocation2 + $0x18] sm:$0xff] %v813_v25  ;;  %v814_v27 = vmax.f32 %v690_v26, 0.0  ;;  %v4929_v28 = vpop.f32.mrb[4].mxu0 }
 0x158   : > { %v4930_v29 = vpop.f32.mrb[5].mxu0 }
 0x159   : > { %852 = vst [vmem:[#allocation2 + $0x20] sm:$0xff] %v814_v27  ;;  %v4931_v33 = vadd.f32 %v4930_v29, %v4929_v28  ;;  %v4932_v34 = vpop.f32.mrb[6].mxu0  ;;  %v6586_v36 = vpack.c.bf16 %v814_v27, %v813_v25  ;;  %v890_v28 = vadd.s32 48, %v6582_v24 }
 0x15a   : > { %v4933_v37 = vpop.f32.mrb[7].mxu0 }
 0x15b   : > { %v695_v38 = vadd.f32 %v4931_v33, %v6579_v16  ;;  %v4934_v39 = vadd.f32 %v4933_v37, %v4932_v34  ;;  %1948 = vmatprep.mubr.bf16.mxu1 %v6586_v36  ;;  %v8837_v33 = vmov 0 }
 0x15d   : > { %v815_v42 = vmax.f32 %v695_v38, 0.0  ;;  %v698_v43 = vadd.f32 %v4934_v39, %v6579_v16  ;;  %v5925_v39 = vld [vmem:[#allocation6 + $0x88] sm:$0xff]  }
 0x15e   : > { %v1366_v50 = vld [vmem:[#allocation2 + $0x17] sm:$0xff] }
 0x15f   : > { %853 = vst [vmem:[#allocation2 + $0x28] sm:$0xff] %v815_v42  ;;  %v816_v45 = vmax.f32 %v698_v43, 0.0  ;;  %v4935_v47 = vpop.f32.mrb[8].mxu0 }
 0x160   : > { %v4936_v49 = vpop.f32.mrb[9].mxu0  ;;  %v1367_v51 = vld [vmem:[#allocation2 + $0x1f] sm:$0xff] }
 0x161   : > { %854 = vst [vmem:[#allocation2 + $0x30] sm:$0xff] %v816_v45  ;;  %v4937_v53 = vadd.f32 %v4936_v49, %v4935_v47  ;;  %v4938_v54 = vpop.f32.mrb[10].mxu0  ;;  %v6598_v55 = vpack.c.bf16 %v1367_v51, %v1366_v50  ;;  %v6600_v56 = vpack.c.bf16 %v816_v45, %v815_v42  ;;  %v1462_v2 = vld [vmem:[#allocation2 + $0x19] sm:$0xff]  ;;  %v962_v50 = vand.u32 15, %v890_v28 }
 0x162   : > { %v4939_v58 = vpop.f32.mrb[11].mxu0 }
 0x163   : > { %v703_v59 = vadd.f32 %v4937_v53, %v6579_v16  ;;  %v4940_v60 = vadd.f32 %v4939_v58, %v4938_v54  ;;  %4546 = vmatmul.mubr.msk.bf16.vlgmr.msra.gmra.mrb[0].mxu1 %vm6594_vm2, %v6598_v55  ;;  %v891_v54 = vadd.s32 56, %v6582_v24  ;;  %vm6679_vm12 = vcmp.ge.s32.totalorder %v962_v50, 1 }
 0x164   : > { %1956 = vmatprep.mubr.bf16.mxu1 %v6600_v56  ;;  %5650 = vmatpush3.bf16.msra.mxu1 %v6486_v30  ;;  %v941_v30 = vand.u32 15, %v887_v61  ;;  %vm6695_vm14 = vmpackc.low %vm8736_vm1, %vm6679_vm12 }
 0x165   : > { %v817_v62 = vmax.f32 %v703_v59, 0.0  ;;  %v706_v63 = vadd.f32 %v4940_v60, %v6579_v16  ;;  %5643 = vmatprep.subr.bf16.mxu1 %v6488_v32  ;;  %v892_v60 = vadd.s32 64, %v6582_v24 }
 0x166   : > { %v1463_v3 = vld [vmem:[#allocation2 + $0x21] sm:$0xff]  ;;  %vm1335_vm7 = vcmp.le.s32.totalorder %v941_v30, 14 }
 0x167   : > { %855 = vst [vmem:[#allocation2 + $0x38] sm:$0xff] %v817_v62  ;;  %v818_v5 = vmax.f32 %v706_v63, 0.0  ;;  %v4941_v6 = vpop.f32.mrb[12].mxu0  ;;  %v6617_v8 = vpack.c.bf16 %v1463_v3, %v1462_v2  ;;  %v1368_v11 = vld [vmem:[#allocation2 + $0x27] sm:$0xff]  ;;  %vm6648_vm9 = vmpackc.low %vm1335_vm7, %vm8736_vm1  ;;  %v8844_v63 = vmov 0  ;;  %v969_v3 = vand.u32 15, %v891_v54 }
 0x168   : > { %v4942_v9 = vpop.f32.mrb[13].mxu0  ;;  %v1369_v12 = vld [vmem:[#allocation2 + $0x2f] sm:$0xff]  ;;  %5651 = vmatpush3.bf16.msra.mxu1 %v6488_v32  ;;  %v889_v32 = vadd.s32 40, %v6582_v24  ;;  %v8838_v33 = vsel %vm6648_vm9, 4294967295, %v8837_v33 }
 0x169   : > { %856 = vst [vmem:[#allocation2 + $0x40] sm:$0xff] %v818_v5  ;;  %v4943_v15 = vadd.f32 %v4942_v9, %v4941_v6  ;;  %v4944_v17 = vpop.f32.mrb[14].mxu0  ;;  %5478 = vmatprep.mubr.msk.bf16.mxu0 %vm6613_vm5, %v6617_v8  ;;  %v6628_v18 = vpack.c.bf16 %v1369_v12, %v1368_v11  ;;  %v6630_v19 = vpack.c.bf16 %v818_v5, %v817_v62  ;;  %v1464_v29 = vld [vmem:[#allocation2 + $0x29] sm:$0xff]  ;;  %8839 = vst [vmem:[#allocation17_spill] sm:$0xff] %v8838_v33 }
 0x16a   : > { %5644 = vmatprep.subr.bf16.mxu1 %v6494_v35  ;;  %v4945_v21 = vpop.f32.mrb[15].mxu0  ;;  %v955_v38 = vand.u32 15, %v889_v32  ;;  %v5927_v5 = vld [vmem:[#allocation6 + $0x98] sm:$0xff]   ;;  %vm1339_vm15 = vcmp.le.s32.totalorder %v969_v3, 14  ;;  %v896_v3 = vadd.s32 96, %v6582_v24 }
 0x16b   : > { %v711_v22 = vadd.f32 %v4943_v15, %v6579_v16  ;;  %v4946_v23 = vadd.f32 %v4945_v21, %v4944_v17  ;;  %4549 = vmatmul.mubr.msk.bf16.gmra.mrb[4].mxu1 %vm6620_vm6, %v6628_v18  ;;  %v976_v21 = vand.u32 15, %v892_v60  ;;  %vm6723_vm3 = vmpackc.low %vm1339_vm15, %vm8736_vm1 }
 0x16c   : > { %1964 = vmatprep.mubr.bf16.mxu1 %v6630_v19  ;;  %5652 = vmatpush3.bf16.msra.mxu1 %v6494_v35  ;;  %vm1337_vm11 = vcmp.le.s32.totalorder %v955_v38, 14  ;;  %v8851_v38 = vmov 0 }
 0x16d   : > { %v819_v25 = vmax.f32 %v711_v22, 0.0  ;;  %v714_v26 = vadd.f32 %v4946_v23, %v6579_v16  ;;  %5645 = vmatprep.subr.bf16.mxu1 %v6500_v41  ;;  %vm6686_vm13 = vmpackc.low %vm1337_vm11, %vm8736_vm1  ;;  %vm6716_vm0 = vcmp.ge.s32.totalorder %v976_v21, 1  ;;  %v8852_v38 = vsel %vm6723_vm3, 4294967295, %v8851_v38 }
 0x16e   : > { %v1465_v31 = vld [vmem:[#allocation2 + $0x31] sm:$0xff]  ;;  %v8845_v63 = vsel %vm6686_vm13, 4294967295, %v8844_v63  ;;  %8853 = vst [vmem:[#allocation19_spill] sm:$0xff] %v8852_v38  ;;  %vm6732_vm4 = vmpackc.low %vm8736_vm1, %vm6716_vm0 }
 0x16f   : > { %857 = vst [vmem:[#allocation2 + $0x48] sm:$0xff] %v819_v25  ;;  %v820_v35 = vmax.f32 %v714_v26, 0.0  ;;  %v4947_v34 = vpop.f32.mrb[16].mxu0  ;;  %v6652_v37 = vpack.c.bf16 %v1465_v31, %v1464_v29  ;;  %v1370_v42 = vld [vmem:[#allocation2 + $0x37] sm:$0xff]  ;;  %8846 = vst [vmem:[#allocation18_spill] sm:$0xff] %v8845_v63  ;;  %v894_v29 = vadd.s32 80, %v6582_v24 }
 0x170   : > { %v4948_v40 = vpop.f32.mrb[17].mxu0  ;;  %v1371_v43 = vld [vmem:[#allocation2 + $0x3f] sm:$0xff]  ;;  %5653 = vmatpush3.bf16.msra.mxu1 %v6500_v41  ;;  %v5948_v31 = vld [vmem:[#allocation6 + $0x40] sm:$0xff]   ;;  %v5939_v63 = vld [vmem:[#allocation6 + $0x198] sm:$0xff]  }
 0x171   : > { %858 = vst [vmem:[#allocation2 + $0x50] sm:$0xff] %v820_v35  ;;  %v4949_v45 = vadd.f32 %v4948_v40, %v4947_v34  ;;  %v4950_v47 = vpop.f32.mrb[18].mxu0  ;;  %5479 = vmatmul.mubr.msk.bf16.vlgmr.msra.gmra.mrb[64].mxu0 %vm6648_vm9, %v6652_v37  ;;  %v6665_v48 = vpack.c.bf16 %v1371_v43, %v1370_v42  ;;  %v6667_v49 = vpack.c.bf16 %v820_v35, %v819_v25  ;;  %v1466_v61 = vld [vmem:[#allocation2 + $0x39] sm:$0xff]  ;;  %v5928_v25 = vld [vmem:[#allocation6 + $0xa0] sm:$0xff]  }
 0x172   : > { %5646 = vmatprep.subr.bf16.mxu1 %v6503_v46  ;;  %v4951_v51 = vpop.f32.mrb[19].mxu0  ;;  %5511 = vmatpush3.bf16.msra.mxu0 %v6573_v14  ;;  %v5929_v43 = vld [vmem:[#allocation6 + $0xa8] sm:$0xff]  }
 0x173   : > { %v719_v53 = vadd.f32 %v4949_v45, %v6579_v16  ;;  %v4952_v41 = vadd.f32 %v4951_v51, %v4950_v47  ;;  %4552 = vmatmul.mubr.msk.bf16.gmra.mrb[8].mxu1 %vm6657_vm10, %v6665_v48  ;;  %5512 = vmatprep.subr.bf16.mxu0 %v5925_v39  ;;  %v8854_v51 = vmov 0  ;;  %v5943_v38 = vld [vmem:[#allocation6 + $0x1a8] sm:$0xff]  }
 0x174   : > { %1972 = vmatprep.mubr.bf16.mxu1 %v6667_v49  ;;  %5654 = vmatpush3.bf16.msra.mxu1 %v6503_v46  ;;  %v8855_v51 = vsel %vm6732_vm4, 4294967295, %v8854_v51 }
 0x175   : > { %v821_v58 = vmax.f32 %v719_v53, 0.0  ;;  %v722_v59 = vadd.f32 %v4952_v41, %v6579_v16  ;;  %5647 = vmatprep.subr.bf16.mxu1 %v6554_v0 }
 0x176   : > { %v1467_v62 = vld [vmem:[#allocation2 + $0x41] sm:$0xff]  ;;  %5513 = vmatpush3.bf16.msra.mxu0 %v5925_v39 }
 0x177   : > { %859 = vst [vmem:[#allocation2 + $0x58] sm:$0xff] %v821_v58  ;;  %v822_v46 = vmax.f32 %v722_v59, 0.0  ;;  %v4953_v1 = vpop.f32.mrb[20].mxu0  ;;  %v6690_v2 = vpack.c.bf16 %v1467_v62, %v1466_v61  ;;  %5514 = vmatprep.subr.bf16.mxu0 %v5926_v57  ;;  %v1372_v30 = vld [vmem:[#allocation2 + $0x47] sm:$0xff] }
 0x178   : > { %v4954_v6 = vpop.f32.mrb[21].mxu0  ;;  %v1373_v9 = vld [vmem:[#allocation2 + $0x4f] sm:$0xff]  ;;  %5655 = vmatpush3.bf16.msra.mxu1 %v6554_v0  ;;  %v893_v0 = vadd.s32 72, %v6582_v24  ;;  %v5930_v61 = vld [vmem:[#allocation6 + $0xb0] sm:$0xff]  }
 0x179   : > { %860 = vst [vmem:[#allocation2 + $0x60] sm:$0xff] %v822_v46  ;;  %v4955_v12 = vadd.f32 %v4954_v6, %v4953_v1  ;;  %v4956_v15 = vpop.f32.mrb[22].mxu0  ;;  %5482 = vmatprep.mubr.msk.bf16.mxu0 %vm6686_vm13, %v6690_v2  ;;  %v6703_v17 = vpack.c.bf16 %v1373_v9, %v1372_v30  ;;  %v6705_v20 = vpack.c.bf16 %v822_v46, %v821_v58  ;;  %v1468_v35 = vld [vmem:[#allocation2 + $0x49] sm:$0xff]  ;;  %v990_v58 = vand.u32 15, %v894_v29 }
 0x17a   : > { %5648 = vmatprep.subr.bf16.mxu1 %v6563_v7  ;;  %v4957_v22 = vpop.f32.mrb[23].mxu0  ;;  %5515 = vmatpush3.bf16.msra.mxu0 %v5926_v57  ;;  %v983_v42 = vand.u32 15, %v893_v0  ;;  %v8858_v30 = vmov 0  ;;  %v8868_v1 = vmov 0 }
 0x17b   : > { %v727_v23 = vadd.f32 %v4955_v12, %v6579_v16  ;;  %v4958_v32 = vadd.f32 %v4957_v22, %v4956_v15  ;;  %4555 = vmatmul.mubr.msk.bf16.gmra.mrb[12].mxu1 %vm6695_vm14, %v6703_v17  ;;  %5516 = vmatprep.subr.bf16.mxu0 %v5927_v5  ;;  %vm6751_vm8 = vcmp.ge.s32.totalorder %v990_v58, 1  ;;  %v5931_v22 = vld [vmem:[#allocation6 + $0xb8] sm:$0xff]   ;;  %v8865_v58 = vmov 0 }
 0x17c   : > { %1980 = vmatprep.mubr.bf16.mxu1 %v6705_v20  ;;  %5656 = vmatpush3.bf16.msra.mxu1 %v6563_v7  ;;  %vm1341_vm7 = vcmp.le.s32.totalorder %v983_v42, 14  ;;  %vm6766_vm12 = vmpackc.low %vm8736_vm1, %vm6751_vm8  ;;  %v5932_v42 = vld [vmem:[#allocation6 + $0x1c0] sm:$0xff]  }
 0x17d   : > { %v823_v26 = vmax.f32 %v727_v23, 0.0  ;;  %v730_v27 = vadd.f32 %v4958_v32, %v6579_v16  ;;  %5649 = vmatprep.subr.bf16.mxu1 %v6567_v10  ;;  %vm6757_vm11 = vmpackc.low %vm1341_vm7, %vm8736_vm1 }
 0x17e   : > { %v1469_v34 = vld [vmem:[#allocation2 + $0x51] sm:$0xff]  ;;  %5517 = vmatpush3.bf16.msra.mxu0 %v5927_v5  ;;  %v8859_v30 = vsel %vm6757_vm11, 4294967295, %v8858_v30 }
 0x17f   : > { %861 = vst [vmem:[#allocation2 + $0x68] sm:$0xff] %v823_v26  ;;  %v824_v7 = vmax.f32 %v730_v27, 0.0  ;;  %v4959_v39 = vpop.f32.mrb[24].mxu0  ;;  %v6727_v40 = vpack.c.bf16 %v1469_v34, %v1468_v35  ;;  %5518 = vmatprep.subr.bf16.mxu0 %v5928_v25  ;;  %v1374_v47 = vld [vmem:[#allocation2 + $0x57] sm:$0xff]  ;;  %8860 = vst [vmem:[#allocation20_spill] sm:$0xff] %v8859_v30 }
 0x180   : > { %v4960_v45 = vpop.f32.mrb[25].mxu0  ;;  %v1375_v50 = vld [vmem:[#allocation2 + $0x5f] sm:$0xff]  ;;  %5657 = vmatpush3.bf16.msra.mxu1 %v6567_v10  ;;  %v895_v10 = vadd.s32 88, %v6582_v24 }
 0x181   : > { %862 = vst [vmem:[#allocation2 + $0x70] sm:$0xff] %v824_v7  ;;  %v4961_v53 = vadd.f32 %v4960_v45, %v4959_v39  ;;  %v4962_v41 = vpop.f32.mrb[26].mxu0  ;;  %5483 = vmatmul.mubr.msk.bf16.gmra.mrb[68].mxu0 %vm6723_vm3, %v6727_v40  ;;  %v6740_v54 = vpack.c.bf16 %v1375_v50, %v1374_v47  ;;  %v6742_v57 = vpack.c.bf16 %v824_v7, %v823_v26  ;;  %v1470_v5 = vld [vmem:[#allocation2 + $0x59] sm:$0xff]  ;;  %v897_v39 = vadd.s32 104, %v6582_v24 }
 0x182   : > { %5155 = vmatprep.subr.bf16.mxu1 %v5948_v31  ;;  %v4963_v59 = vpop.f32.mrb[27].mxu0  ;;  %5519 = vmatpush3.bf16.msra.mxu0 %v5928_v25  ;;  %v997_v21 = vand.u32 15, %v895_v10  ;;  %v8861_v25 = vmov 0  ;;  %v1004_v31 = vand.u32 15, %v896_v3  ;;  %v898_v50 = vadd.s32 112, %v6582_v24 }
 0x183   : > { %v735_v14 = vadd.f32 %v4961_v53, %v6579_v16  ;;  %v4964_v60 = vadd.f32 %v4963_v59, %v4962_v41  ;;  %4558 = vmatmul.mubr.msk.bf16.gmra.mrb[16].mxu1 %vm6732_vm4, %v6740_v54  ;;  %5520 = vmatprep.subr.bf16.mxu0 %v5929_v43  ;;  %v8862_v25 = vsel %vm6766_vm12, 4294967295, %v8861_v25  ;;  %v1011_v10 = vand.u32 15, %v897_v39 }
 0x184   : > { %1988 = vmatprep.mubr.bf16.mxu1 %v6742_v57  ;;  %vm1343_vm15 = vcmp.le.s32.totalorder %v997_v21, 14  ;;  %vm6784_vm0 = vcmp.ge.s32.totalorder %v1004_v31, 1 }
 0x185   : > { %v825_v62 = vmax.f32 %v735_v14, 0.0  ;;  %v738_v46 = vadd.f32 %v4964_v60, %v6579_v16  ;;  %vm6790_vm7 = vmpackc.low %vm1343_vm15, %vm8736_vm1  ;;  %vm1345_vm15 = vcmp.le.s32.totalorder %v1011_v10, 14 }
 0x186   : > { %v1471_v6 = vld [vmem:[#allocation2 + $0x61] sm:$0xff]  ;;  %5521 = vmatpush3.bf16.msra.mxu0 %v5929_v43  ;;  %v8866_v58 = vsel %vm6790_vm7, 4294967295, %v8865_v58  ;;  %vm6799_vm8 = vmpackc.low %vm8736_vm1, %vm6784_vm0 }
 0x187   : > { %863 = vst [vmem:[#allocation2 + $0x78] sm:$0xff] %v825_v62  ;;  %v826_v9 = vmax.f32 %v738_v46, 0.0  ;;  %v4965_v12 = vpop.f32.mrb[28].mxu0  ;;  %v6761_v15 = vpack.c.bf16 %v1471_v6, %v1470_v5  ;;  %5522 = vmatprep.subr.bf16.mxu0 %v5930_v61  ;;  %v1376_v32 = vld [vmem:[#allocation2 + $0x67] sm:$0xff]  ;;  %8867 = vst [vmem:[#allocation21_spill] sm:$0xff] %v8866_v58  ;;  %v8869_v1 = vsel %vm6799_vm8, 4294967295, %v8868_v1 }
 0x188   : > { %v4966_v23 = vpop.f32.mrb[29].mxu0  ;;  %v1377_v0 = vld [vmem:[#allocation2 + $0x6f] sm:$0xff] }
 0x189   : > { %864 = vst [vmem:[#allocation2 + $0x80] sm:$0xff] %v826_v9  ;;  %v4967_v26 = vadd.f32 %v4966_v23, %v4965_v12  ;;  %v4968_v27 = vpop.f32.mrb[30].mxu0  ;;  %5486 = vmatprep.mubr.msk.bf16.mxu0 %vm6757_vm11, %v6761_v15  ;;  %v6773_v28 = vpack.c.bf16 %v1377_v0, %v1376_v32  ;;  %v6775_v29 = vpack.c.bf16 %v826_v9, %v825_v62  ;;  %v1472_v53 = vld [vmem:[#allocation2 + $0x69] sm:$0xff]  ;;  %v1018_v12 = vand.u32 15, %v898_v50 }
 0x18a   : > { %v4969_v35 = vpop.f32.mrb[31].mxu0  ;;  %5523 = vmatpush3.bf16.msra.mxu0 %v5930_v61  ;;  %v899_v32 = vadd.s32 120, %v6582_v24 }
 0x18b   : > { %v743_v34 = vadd.f32 %v4967_v26, %v6579_v16  ;;  %v4970_v7 = vadd.f32 %v4969_v35, %v4968_v27  ;;  %4561 = vmatmul.mubr.msk.bf16.gmra.mrb[20].mxu1 %vm6766_vm12, %v6773_v28  ;;  %5524 = vmatprep.subr.bf16.mxu0 %v5931_v22  ;;  %vm1314_vm0 = vcmp.ge.s32.totalorder %v1018_v12, 1  ;;  %v900_v27 = vadd.s32 128, %v6582_v24  ;;  %vm6819_vm12 = vmpackc.low %vm1345_vm15, %vm8736_vm1 }
 0x18c   : > { %1996 = vmatprep.mubr.bf16.mxu1 %v6775_v29 }
 0x18d   : > { %v827_v43 = vmax.f32 %v743_v34, 0.0  ;;  %v746_v45 = vadd.f32 %v4970_v7, %v6579_v16  ;;  %v8870_v34 = vmov 0 }
 0x18e   : > { %v1473_v41 = vld [vmem:[#allocation2 + $0x71] sm:$0xff]  ;;  %5525 = vmatpush3.bf16.msra.mxu0 %v5931_v22  ;;  %v8871_v34 = vsel %vm6819_vm12, 4294967295, %v8870_v34 }
 0x18f   : > { %865 = vst [vmem:[#allocation2 + $0x88] sm:$0xff] %v827_v43  ;;  %v828_v59 = vmax.f32 %v746_v45, 0.0  ;;  %v4971_v14 = vpop.f32.mrb[32].mxu0  ;;  %v6794_v60 = vpack.c.bf16 %v1473_v41, %v1472_v53  ;;  %5291 = vmatprep.subr.bf16.mxu0 %v5932_v42  ;;  %v1378_v62 = vld [vmem:[#allocation2 + $0x77] sm:$0xff]  ;;  %8872 = vst [vmem:[#allocation22_spill] sm:$0xff] %v8871_v34  ;;  %v8873_v53 = vmov 0 }
 0x190   : > { %v4972_v61 = vpop.f32.mrb[33].mxu0  ;;  %v1379_v46 = vld [vmem:[#allocation2 + $0x7f] sm:$0xff] }
 0x191   : > { %866 = vst [vmem:[#allocation2 + $0x90] sm:$0xff] %v828_v59  ;;  %v4973_v3 = vadd.f32 %v4972_v61, %v4971_v14  ;;  %v4974_v5 = vpop.f32.mrb[34].mxu0  ;;  %5487 = vmatmul.mubr.msk.bf16.gmra.mrb[72].mxu0 %vm6790_vm7, %v6794_v60  ;;  %v6806_v6 = vpack.c.bf16 %v1379_v46, %v1378_v62  ;;  %v6808_v9 = vpack.c.bf16 %v828_v59, %v827_v43  ;;  %v1474_v31 = vld [vmem:[#allocation2 + $0x79] sm:$0xff]  ;;  %v1025_v43 = vand.u32 15, %v899_v32 }
 0x192   : > { %v4975_v21 = vpop.f32.mrb[35].mxu0  ;;  %v1032_v61 = vand.u32 15, %v900_v27  ;;  %v2715_v52 = vld [vmem:[#allocation2 + $0x7f] sm:$0xff] }
 0x193   : > { %v751_v22 = vadd.f32 %v4973_v3, %v6579_v16  ;;  %v4976_v23 = vadd.f32 %v4975_v21, %v4974_v5  ;;  %4564 = vmatmul.mubr.msk.bf16.gmra.mrb[24].mxu1 %vm6799_vm8, %v6806_v6  ;;  %vm6826_vm8 = vmpackc.low %vm8736_vm1, %vm1314_vm0  ;;  %vm1347_vm15 = vcmp.le.s32.totalorder %v1025_v43, 14  ;;  %v1460_v21 = vld [vmem:[#allocation2 + $0x9] sm:$0xff] }
 0x194   : > { %2004 = vmatprep.mubr.bf16.mxu1 %v6808_v9  ;;  %v8874_v53 = vsel %vm6826_vm8, 4294967295, %v8873_v53  ;;  %vm1316_vm0 = vcmp.ge.s32.totalorder %v1032_v61, 1  ;;  %vm6845_vm4 = vmpackc.low %vm1347_vm15, %vm8736_vm1 }
 0x195   : > { %v829_v0 = vmax.f32 %v751_v22, 0.0  ;;  %v754_v26 = vadd.f32 %v4976_v23, %v6579_v16  ;;  %v1461_v22 = vld [vmem:[#allocation2 + $0x11] sm:$0xff]  ;;  %v902_v23 = vadd.s32 144, %v6582_v24 }
 0x196   : > { %v1475_v35 = vld [vmem:[#allocation2 + $0x81] sm:$0xff] }
 0x197   : > { %867 = vst [vmem:[#allocation2 + $0x98] sm:$0xff] %v829_v0  ;;  %v830_v7 = vmax.f32 %v754_v26, 0.0  ;;  %v4977_v39 = vpop.f32.mrb[36].mxu0  ;;  %v6823_v42 = vpack.c.bf16 %v1475_v35, %v1474_v31  ;;  %v1380_v47 = vld [vmem:[#allocation2 + $0x87] sm:$0xff]  ;;  %v8875_v26 = vmov 0 }
 0x198   : > { %v4978_v45 = vpop.f32.mrb[37].mxu0  ;;  %v1381_v50 = vld [vmem:[#allocation2 + $0x8f] sm:$0xff]  ;;  %v8876_v26 = vsel %vm6845_vm4, 4294967295, %v8875_v26 }
 0x199   : > { %868 = vst [vmem:[#allocation2 + $0xa0] sm:$0xff] %v830_v7  ;;  %v4979_v41 = vadd.f32 %v4978_v45, %v4977_v39  ;;  %v4980_v59 = vpop.f32.mrb[38].mxu0  ;;  %5490 = vmatprep.mubr.msk.bf16.mxu0 %vm6819_vm12, %v6823_v42  ;;  %v6833_v14 = vpack.c.bf16 %v1381_v50, %v1380_v47  ;;  %v6835_v10 = vpack.c.bf16 %v830_v7, %v829_v0  ;;  %v1476_v32 = vld [vmem:[#allocation2 + $0x89] sm:$0xff]  ;;  %8877 = vst [vmem:[#allocation23_spill] sm:$0xff] %v8876_v26  ;;  %v8878_v47 = vmov 0 }
 0x19a   : > { %v4981_v62 = vpop.f32.mrb[39].mxu0  ;;  %v4713_v39 = vpack.c.bf16 %v1461_v22, %v1460_v21 }
 0x19b   : > { %v759_v46 = vadd.f32 %v4979_v41, %v6579_v16  ;;  %v4982_v3 = vadd.f32 %v4981_v62, %v4980_v59  ;;  %4567 = vmatmul.mubr.msk.bf16.gmra.mrb[28].mxu1 %vm6826_vm8, %v6833_v14  ;;  %vm6852_vm8 = vmpackc.low %vm8736_vm1, %vm1316_vm0  ;;  %v1046_v62 = vand.u32 15, %v902_v23  ;;  %v5933_v23 = vld [vmem:[#allocation6 + $0x180] sm:$0xff]  }
 0x19c   : > { %2012 = vmatprep.mubr.bf16.mxu1 %v6835_v10  ;;  %v8879_v47 = vsel %vm6852_vm8, 4294967295, %v8878_v47 }
 0x19d   : > { %v831_v5 = vmax.f32 %v759_v46, 0.0  ;;  %v762_v12 = vadd.f32 %v4982_v3, %v6579_v16  ;;  %vm1318_vm15 = vcmp.ge.s32.totalorder %v1046_v62, 1 }
 0x19e   : > { %v1477_v0 = vld [vmem:[#allocation2 + $0x91] sm:$0xff]  ;;  %vm6875_vm0 = vmpackc.low %vm8736_vm1, %vm1318_vm15 }
 0x19f   : > { %869 = vst [vmem:[#allocation2 + $0xa8] sm:$0xff] %v831_v5  ;;  %v832_v27 = vmax.f32 %v762_v12, 0.0  ;;  %v4983_v31 = vpop.f32.mrb[40].mxu0  ;;  %v6849_v35 = vpack.c.bf16 %v1477_v0, %v1476_v32  ;;  %v1382_v43 = vld [vmem:[#allocation2 + $0x97] sm:$0xff] }
 0x1a0   : > { %v4984_v7 = vpop.f32.mrb[41].mxu0  ;;  %v1383_v45 = vld [vmem:[#allocation2 + $0x9f] sm:$0xff] }
 0x1a1   : > { %870 = vst [vmem:[#allocation2 + $0xb0] sm:$0xff] %v832_v27  ;;  %v4985_v50 = vadd.f32 %v4984_v7, %v4983_v31  ;;  %v4986_v41 = vpop.f32.mrb[42].mxu0  ;;  %5491 = vmatmul.mubr.msk.bf16.gmra.mrb[76].mxu0 %vm6845_vm4, %v6849_v35  ;;  %v6859_v59 = vpack.c.bf16 %v1383_v45, %v1382_v43  ;;  %v6861_v61 = vpack.c.bf16 %v832_v27, %v831_v5  ;;  %v904_v5 = vadd.s32 160, %v6582_v24  ;;  %v5934_v27 = vld [vmem:[#allocation6 + $0x1c8] sm:$0xff]   ;;  %v2783_v13 = vld [vmem:[#allocation2 + $0xa0] sm:$0xff] }
 0x1a2   : > { %v4987_v46 = vpop.f32.mrb[43].mxu0  ;;  %5526 = vmatprep.mubr.msk.bf16.mxu0 %vm6613_vm5, %v4713_v39  ;;  %v8881_v43 = vmov 0 }
 0x1a3   : > { %8880 = vst [vmem:[#allocation24_spill] sm:$0xff] %v6861_v61  ;;  %v767_v3 = vadd.f32 %v4985_v50, %v6579_v16  ;;  %v4988_v12 = vadd.f32 %v4987_v46, %v4986_v41  ;;  %4570 = vmatmul.mubr.msk.bf16.gmra.mrb[32].mxu1 %vm6852_vm8, %v6859_v59  ;;  %v8882_v43 = vsel %vm6875_vm0, 4294967295, %v8881_v43  ;;  %v1060_v46 = vand.u32 15, %v904_v5 }
 0x1a4   : > { %2020 = vmatprep.mubr.bf16.mxu1 %v6861_v61 }
 0x1a5   : > { %v833_v21 = vmax.f32 %v767_v3, 0.0  ;;  %v770_v22 = vadd.f32 %v4988_v12, %v6579_v16  ;;  %v5935_v12 = vld [vmem:[#allocation6 + $0x188] sm:$0xff]   ;;  %vm1320_vm15 = vcmp.ge.s32.totalorder %v1060_v46, 1 }
 0x1a6   : > { %v1384_v7 = vld [vmem:[#allocation2 + $0xa7] sm:$0xff] }
 0x1a7   : > { %871 = vst [vmem:[#allocation2 + $0xb8] sm:$0xff] %v833_v21  ;;  %v6872_v32 = vmax.f32 %v770_v22, 0.0  ;;  %v4989_v0 = vpop.f32.mrb[44].mxu0 }
 0x1a8   : > { %v4990_v31 = vpop.f32.mrb[45].mxu0  ;;  %v1385_v39 = vld [vmem:[#allocation2 + $0xaf] sm:$0xff] }
 0x1a9   : > { %872 = vst [vmem:[#allocation2 + $0xc0] sm:$0xff] %v6872_v32  ;;  %v4991_v45 = vadd.f32 %v4990_v31, %v4989_v0  ;;  %v4992_v50 = vpop.f32.mrb[46].mxu0  ;;  %5527 = vmatmul.mubr.msk.bf16.vlgmr.msra.gmra.mrb[64].mxu0 %vm6648_vm9, %v6617_v8  ;;  %v6883_v41 = vpack.c.bf16 %v1385_v39, %v1384_v7  ;;  %v6886_v62 = vpack.c.bf16 %v6872_v32, %v833_v21  ;;  %v5936_v8 = vld [vmem:[#allocation6 + $0x1d0] sm:$0xff]   ;;  %v5938_v39 = vld [vmem:[#allocation6 + $0x1d8] sm:$0xff]  }
 0x1aa   : > { %5292 = vmatpush3.bf16.msra.mxu0 %v5933_v23  ;;  %v4993_v3 = vpop.f32.mrb[47].mxu0  ;;  %5530 = vmatprep.mubr.msk.bf16.mxu0 %vm6686_vm13, %v6652_v37  ;;  %v906_v23 = vadd.s32 176, %v6582_v24  ;;  %v5937_v37 = vld [vmem:[#allocation6 + $0x190] sm:$0xff]   ;;  %vm6899_vm13 = vmpackc.low %vm8736_vm1, %vm1320_vm15 }
 0x1ab   : > { %8883 = vst [vmem:[#allocation25_spill] sm:$0xff] %v6886_v62  ;;  %v775_v22 = vadd.f32 %v4991_v45, %v6579_v16  ;;  %v4994_v0 = vadd.f32 %v4993_v3, %v4992_v50  ;;  %4573 = vmatmul.mubr.msk.bf16.gmra.mrb[36].mxu1 %vm6875_vm0, %v6883_v41  ;;  %5293 = vmatprep.subr.bf16.mxu0 %v5934_v27  ;;  %v8884_v27 = vmov 0 }
 0x1ac   : > { %2028 = vmatprep.mubr.bf16.mxu1 %v6886_v62  ;;  %v8885_v27 = vsel %vm6899_vm13, 4294967295, %v8884_v27 }
 0x1ad   : > { %v835_v21 = vmax.f32 %v775_v22, 0.0  ;;  %v778_v5 = vadd.f32 %v4994_v0, %v6579_v16 }
 0x1ae   : > { %5294 = vmatpush3.bf16.msra.mxu0 %v5935_v12  ;;  %v1386_v50 = vld [vmem:[#allocation2 + $0xb7] sm:$0xff] }
 0x1af   : > { %873 = vst [vmem:[#allocation2 + $0xc8] sm:$0xff] %v835_v21  ;;  %v836_v31 = vmax.f32 %v778_v5, 0.0  ;;  %v4995_v7 = vpop.f32.mrb[48].mxu0  ;;  %5295 = vmatprep.subr.bf16.mxu0 %v5936_v8  ;;  %v1074_v8 = vand.u32 15, %v906_v23 }
 0x1b0   : > { %v4996_v45 = vpop.f32.mrb[49].mxu0  ;;  %v1387_v3 = vld [vmem:[#allocation2 + $0xbf] sm:$0xff] }
 0x1b1   : > { %874 = vst [vmem:[#allocation2 + $0xd0] sm:$0xff] %v836_v31  ;;  %v4997_v22 = vadd.f32 %v4996_v45, %v4995_v7  ;;  %v4998_v46 = vpop.f32.mrb[50].mxu0  ;;  %5531 = vmatmul.mubr.msk.bf16.gmra.mrb[68].mxu0 %vm6723_vm3, %v6690_v2  ;;  %v6906_v12 = vpack.c.bf16 %v1387_v3, %v1386_v50  ;;  %v6908_v0 = vpack.c.bf16 %v836_v31, %v835_v21  ;;  %v5940_v2 = vld [vmem:[#allocation6 + $0x1e0] sm:$0xff]   ;;  %v901_v21 = vadd.s32 136, %v6582_v24  ;;  %v5942_v3 = vld [vmem:[#allocation6 + $0x1e8] sm:$0xff]  }
 0x1b2   : > { %v4999_v5 = vpop.f32.mrb[51].mxu0  ;;  %5534 = vmatprep.mubr.msk.bf16.mxu0 %vm6757_vm11, %v6727_v40  ;;  %5296 = vmatpush3.bf16.msra.mxu0 %v5937_v37  ;;  %vm1322_vm15 = vcmp.ge.s32.totalorder %v1074_v8, 1  ;;  %v908_v40 = vadd.s32 192, %v6582_v24  ;;  %v5941_v37 = vld [vmem:[#allocation6 + $0x1a0] sm:$0xff]  }
 0x1b3   : > { %v783_v33 = vadd.f32 %v4997_v22, %v6579_v16  ;;  %v5000_v7 = vadd.f32 %v4999_v5, %v4998_v46  ;;  %4576 = vmatmul.mubr.msk.bf16.gmra.mrb[40].mxu1 %vm6899_vm13, %v6906_v12  ;;  %5297 = vmatprep.subr.bf16.mxu0 %v5938_v39  ;;  %vm6922_vm11 = vmpackc.low %vm8736_vm1, %vm1322_vm15  ;;  %v8886_v5 = vmov 0 }
 0x1b4   : > { %2036 = vmatprep.mubr.bf16.mxu1 %v6908_v0  ;;  %v8887_v5 = vsel %vm6922_vm11, 4294967295, %v8886_v5 }
 0x1b5   : > { %v837_v23 = vmax.f32 %v783_v33, 0.0  ;;  %v786_v31 = vadd.f32 %v5000_v7, %v6579_v16  ;;  %v1039_v33 = vand.u32 15, %v901_v21 }
 0x1b6   : > { %5298 = vmatpush3.bf16.msra.mxu0 %v5939_v63  ;;  %v1388_v39 = vld [vmem:[#allocation2 + $0xc7] sm:$0xff] }
 0x1b7   : > { %875 = vst [vmem:[#allocation2 + $0xd8] sm:$0xff] %v837_v23  ;;  %v838_v45 = vmax.f32 %v786_v31, 0.0  ;;  %v5001_v50 = vpop.f32.mrb[52].mxu0  ;;  %5299 = vmatprep.subr.bf16.mxu0 %v5940_v2  ;;  %v1088_v31 = vand.u32 15, %v908_v40  ;;  %vm1349_vm15 = vcmp.le.s32.totalorder %v1039_v33, 14  ;;  %v905_v40 = vadd.s32 168, %v6582_v24 }
 0x1b8   : > { %v5002_v22 = vpop.f32.mrb[53].mxu0  ;;  %v1389_v46 = vld [vmem:[#allocation2 + $0xcf] sm:$0xff] }
 0x1b9   : > { %876 = vst [vmem:[#allocation2 + $0xe0] sm:$0xff] %v838_v45  ;;  %v5003_v8 = vadd.f32 %v5002_v22, %v5001_v50  ;;  %v5004_v7 = vpop.f32.mrb[54].mxu0  ;;  %5535 = vmatmul.mubr.msk.bf16.gmra.mrb[72].mxu0 %vm6790_vm7, %v6761_v15  ;;  %v6929_v63 = vpack.c.bf16 %v1389_v46, %v1388_v39  ;;  %v6931_v2 = vpack.c.bf16 %v838_v45, %v837_v23  ;;  %v903_v15 = vadd.s32 152, %v6582_v24  ;;  %v5944_v23 = vld [vmem:[#allocation6 + $0x1f0] sm:$0xff]   ;;  %v5946_v33 = vld [vmem:[#allocation6 + $0x1f8] sm:$0xff]  }
 0x1ba   : > { %v5005_v30 = vpop.f32.mrb[55].mxu0  ;;  %5538 = vmatprep.mubr.msk.bf16.mxu0 %vm6819_vm12, %v6794_v60  ;;  %5300 = vmatpush3.bf16.msra.mxu0 %v5941_v37  ;;  %vm1324_vm1 = vcmp.ge.s32.totalorder %v1088_v31, 1  ;;  %v910_v37 = vadd.s32 208, %v6582_v24  ;;  %vm8888_vm12 = vmmov 1   ;;  %v8892_v31 = vmov 0 }
 0x1bb   : > { %v791_v21 = vadd.f32 %v5003_v8, %v6579_v16  ;;  %v5006_v50 = vadd.f32 %v5005_v30, %v5004_v7  ;;  %4579 = vmatmul.mubr.msk.bf16.gmra.mrb[44].mxu1 %vm6922_vm11, %v6929_v63  ;;  %5301 = vmatprep.subr.bf16.mxu0 %v5942_v3  ;;  %v5945_v30 = vld [vmem:[#allocation6 + $0x1b0] sm:$0xff]   ;;  %vm6946_vm7 = vmpackc.low %vm1349_vm15, %vm8888_vm12  ;;  %v8889_v3 = vmov 0  ;;  %v1053_v46 = vand.u32 15, %v903_v15 }
 0x1bc   : > { %2044 = vmatprep.mubr.bf16.mxu1 %v6931_v2  ;;  %v8890_v3 = vsel %vm6946_vm7, 4294967295, %v8889_v3  ;;  %vm6951_vm3 = vmpackc.low %vm8888_vm12, %vm1324_vm1 }
 0x1bd   : > { %v839_v45 = vmax.f32 %v791_v21, 0.0  ;;  %v794_v60 = vadd.f32 %v5006_v50, %v6579_v16  ;;  %8891 = vst [vmem:[#allocation26_spill] sm:$0xff] %v8890_v3  ;;  %v8893_v31 = vsel %vm6951_vm3, 4294967295, %v8892_v31  ;;  %vm6969_vm1 = vcmp.le.s32.totalorder %v1053_v46, 14  ;;  %v2704_v3 = vld [vmem:[#allocation2 + $0x27] sm:$0xff] }
 0x1be   : > { %5302 = vmatpush3.bf16.msra.mxu0 %v5943_v38  ;;  %v1390_v7 = vld [vmem:[#allocation2 + $0xd7] sm:$0xff]  ;;  %8894 = vst [vmem:[#allocation27_spill] sm:$0xff] %v8893_v31  ;;  %v1067_v38 = vand.u32 15, %v905_v40  ;;  %vm6991_vm9 = vmpackc.low %vm6969_vm1, %vm8888_vm12 }
 0x1bf   : > { %877 = vst [vmem:[#allocation2 + $0xe8] sm:$0xff] %v839_v45  ;;  %v840_v22 = vmax.f32 %v794_v60, 0.0  ;;  %v5007_v39 = vpop.f32.mrb[56].mxu0  ;;  %5303 = vmatprep.subr.bf16.mxu0 %v5944_v23  ;;  %v1102_v23 = vand.u32 15, %v910_v37  ;;  %v6974_v37 = vld [vmem:[#allocation6 + $0x200] sm:$0xff]  }
 0x1c0   : > { %v5008_v8 = vpop.f32.mrb[57].mxu0  ;;  %v1391_v21 = vld [vmem:[#allocation2 + $0xdf] sm:$0xff]  ;;  %vm6976_vm15 = vcmp.le.s32.totalorder %v1067_v38, 14  ;;  %v8901_v38 = vmov 0 }
 0x1c1   : > { %878 = vst [vmem:[#allocation2 + $0xf0] sm:$0xff] %v840_v22  ;;  %v5009_v50 = vadd.f32 %v5008_v8, %v5007_v39  ;;  %v5010_v60 = vpop.f32.mrb[58].mxu0  ;;  %5539 = vmatmul.mubr.msk.bf16.gmra.mrb[76].mxu0 %vm6845_vm4, %v6823_v42  ;;  %v6958_v34 = vpack.c.bf16 %v1391_v21, %v1390_v7  ;;  %v6960_v15 = vpack.c.bf16 %v840_v22, %v839_v45  ;;  %v907_v45 = vadd.s32 184, %v6582_v24  ;;  %v1479_v22 = vld [vmem:[#allocation2 + $0xa1] sm:$0xff]  ;;  %v1480_v8 = vld [vmem:[#allocation2 + $0xa9] sm:$0xff]  ;;  %v1481_v7 = vld [vmem:[#allocation2 + $0xb1] sm:$0xff] }
 0x1c2   : > { %v5011_v58 = vpop.f32.mrb[59].mxu0  ;;  %5542 = vmatprep.mubr.msk.bf16.mxu0 %vm6946_vm7, %v6849_v35  ;;  %5304 = vmatpush3.bf16.msra.mxu0 %v5945_v30  ;;  %vm6983_vm4 = vcmp.ge.s32.totalorder %v1102_v23, 1  ;;  %v8902_v38 = vsel %vm6991_vm9, 4294967295, %v8901_v38  ;;  %vm7000_vm5 = vmpackc.low %vm6976_vm15, %vm8888_vm12  ;;  %v7005_v62 = vpack.c.bf16 %v1481_v7, %v1480_v8 }
 0x1c3   : > { %v799_v40 = vadd.f32 %v5009_v50, %v6579_v16  ;;  %v5012_v39 = vadd.f32 %v5011_v58, %v5010_v60  ;;  %4582 = vmatmul.mubr.msk.bf16.gmra.mrb[48].mxu1 %vm6951_vm3, %v6958_v34  ;;  %5305 = vmatprep.subr.bf16.mxu0 %v5946_v33  ;;  %v909_v58 = vadd.s32 200, %v6582_v24  ;;  %v912_v33 = vadd.s32 224, %v6582_v24  ;;  %v1478_v50 = vld [vmem:[#allocation2 + $0x99] sm:$0xff]  ;;  %8903 = vst [vmem:[#allocation28_spill] sm:$0xff] %v8902_v38  ;;  %vm7010_vm1 = vmpackc.low %vm8888_vm12, %vm6983_vm4  ;;  %v5955_v38 = vld [vmem:[#allocation6 + $0x58] sm:$0xff]  }
 0x1c4   : > { %2052 = vmatprep.mubr.bf16.mxu1 %v6960_v15  ;;  %v1081_v26 = vand.u32 15, %v907_v45 }
 0x1c5   : > { %v841_v30 = vmax.f32 %v799_v40, 0.0  ;;  %v802_v46 = vadd.f32 %v5012_v39, %v6579_v16  ;;  %v6995_v39 = vpack.c.bf16 %v1479_v22, %v1478_v50  ;;  %v8907_v22 = vmov 0 }
 0x1c6   : > { %5306 = vmatpush3.bf16.msra.mxu0 %v5947_v4  ;;  %v1392_v61 = vld [vmem:[#allocation2 + $0xe7] sm:$0xff]  ;;  %v8908_v22 = vsel %vm7010_vm1, 4294967295, %v8907_v22  ;;  %v1095_v35 = vand.u32 15, %v909_v58  ;;  %v1116_v7 = vand.u32 15, %v912_v33  ;;  %vm1355_vm4 = vcmp.le.s32.totalorder %v1081_v26, 14 }
 0x1c7   : > { %879 = vst [vmem:[#allocation2 + $0xf8] sm:$0xff] %v841_v30  ;;  %v842_v60 = vmax.f32 %v802_v46, 0.0  ;;  %v5013_v40 = vpop.f32.mrb[60].mxu0  ;;  %8904 = vst [vmem:[#allocation29_spill] sm:$0xff] %v6995_v39  ;;  %5558 = vmatprep.subr.bf16.mxu0 %v6974_v37  ;;  %v914_v26 = vadd.s32 240, %v6582_v24 }
 0x1c8   : > { %v5014_v42 = vpop.f32.mrb[61].mxu0  ;;  %v1393_v4 = vld [vmem:[#allocation2 + $0xef] sm:$0xff]  ;;  %8909 = vst [vmem:[#allocation30_spill] sm:$0xff] %v8908_v22  ;;  %vm1357_vm15 = vcmp.le.s32.totalorder %v1095_v35, 14  ;;  %vm1328_vm3 = vcmp.ge.s32.totalorder %v1116_v7, 1 }
 0x1c9   : > { %880 = vst [vmem:[#allocation2 + $0x100] sm:$0xff] %v842_v60  ;;  %v5015_v46 = vadd.f32 %v5014_v42, %v5013_v40  ;;  %v5016_v50 = vpop.f32.mrb[62].mxu0  ;;  %5543 = vmatmul.mubr.msk.bf16.gmra.mrb[80].mxu0 %vm6991_vm9, %v6995_v39  ;;  %v7017_v45 = vpack.c.bf16 %v1393_v4, %v1392_v61  ;;  %v7019_v8 = vpack.c.bf16 %v842_v60, %v841_v30  ;;  %v911_v40 = vadd.s32 216, %v6582_v24  ;;  %v1482_v61 = vld [vmem:[#allocation2 + $0xb9] sm:$0xff]  ;;  %v1483_v42 = vld [vmem:[#allocation2 + $0xc1] sm:$0xff]  ;;  %v1484_v60 = vld [vmem:[#allocation2 + $0xc9] sm:$0xff] }
 0x1ca   : > { %v5017_v31 = vpop.f32.mrb[63].mxu0  ;;  %5546 = vmatprep.mubr.msk.bf16.mxu0 %vm7000_vm5, %v7005_v62  ;;  %v913_v30 = vadd.s32 232, %v6582_v24  ;;  %v1485_v4 = vld [vmem:[#allocation2 + $0xd1] sm:$0xff]  ;;  %vm7043_vm11 = vmpackc.low %vm1357_vm15, %vm8888_vm12 }
 0x1cb   : > { %8910 = vst [vmem:[#allocation31_spill] sm:$0xff] %v7017_v45  ;;  %8911 = vst [vmem:[#allocation32_spill] sm:$0xff] %v7019_v8  ;;  %v807_v21 = vadd.f32 %v5015_v46, %v6579_v16  ;;  %v5018_v58 = vadd.f32 %v5017_v31, %v5016_v50  ;;  %4585 = vmatmul.mubr.msk.bf16.gmra.mrb[52].mxu1 %vm7010_vm1, %v7017_v45  ;;  %v6004_v16 = vld [vmem:[%s8704_s2] ss:$0 sm:$0xff]  ;;  %v7040_v50 = vpack.c.bf16 %v1483_v42, %v1482_v61  ;;  %v5989_v46 = vld [vmem:[%s8707_s5 + $0x54] ss:$8 sps:$4 sm:$0xff]  }
 0x1cc   : > { %2060 = vmatprep.mubr.bf16.mxu1 %v7019_v8  ;;  %vm7036_vm1 = vmpackc.low %vm1355_vm4, %vm8888_vm12  ;;  %v8917_v8 = vmov 0  ;;  %v1123_v45 = vand.u32 15, %v913_v30  ;;  %v915_v30 = vadd.s32 248, %v6582_v24 }
 0x1cd   : > { %v843_v33 = vmax.f32 %v807_v21, 0.0  ;;  %v810_v31 = vadd.f32 %v6004_v16, %v5018_v58  ;;  %v8914_v21 = vmov 0  ;;  %v1109_v58 = vand.u32 15, %v911_v40  ;;  %vm7050_vm13 = vmpackc.low %vm8888_vm12, %vm1328_vm3 }
 0x1ce   : > { %v8915_v21 = vsel %vm7043_vm11, 4294967295, %v8914_v21  ;;  %v7047_v16 = vpack.c.bf16 %v1485_v4, %v1484_v60  ;;  %v1394_v7 = vld [vmem:[#allocation2 + $0xf7] sm:$0xff]  ;;  %v8918_v8 = vsel %vm7050_vm13, 4294967295, %v8917_v8  ;;  %v1130_v40 = vand.u32 15, %v914_v26  ;;  %v1487_v60 = vld [vmem:[#allocation2 + $0xe1] sm:$0xff] }
 0x1cf   : > { %881 = vst [vmem:[#allocation2 + $0x108] sm:$0xff] %v843_v33  ;;  %v844_v35 = vmax.f32 %v810_v31, 0.0  ;;  %8916 = vst [vmem:[#allocation33_spill] sm:$0xff] %v8915_v21  ;;  %vm1359_vm3 = vcmp.le.s32.totalorder %v1109_v58, 14  ;;  %v1486_v31 = vld [vmem:[#allocation2 + $0xd9] sm:$0xff]  ;;  %vm1361_vm4 = vcmp.le.s32.totalorder %v1123_v45, 14 }
 0x1d0   : > { %v1395_v22 = vld [vmem:[#allocation2 + $0xff] sm:$0xff]  ;;  %8919 = vst [vmem:[#allocation34_spill] sm:$0xff] %v8918_v8  ;;  %vm1330_vm15 = vcmp.ge.s32.totalorder %v1130_v40, 1  ;;  %vm7070_vm0 = vmpackc.low %vm1359_vm3, %vm8888_vm12  ;;  %v8922_v4 = vmov 0  ;;  %v7074_v26 = vpack.c.bf16 %v1487_v60, %v1486_v31  ;;  %v1137_v58 = vand.u32 15, %v915_v30 }
 0x1d1   : > { %882 = vst [vmem:[#allocation2 + $0x110] sm:$0xff] %v844_v35  ;;  %5547 = vmatmul.mubr.msk.bf16.gmra.mrb[84].mxu0 %vm7036_vm1, %v7040_v50  ;;  %v7057_v61 = vpack.c.bf16 %v1395_v22, %v1394_v7  ;;  %v7059_v42 = vpack.c.bf16 %v844_v35, %v843_v33  ;;  %v1488_v22 = vld [vmem:[#allocation2 + $0xe9] sm:$0xff]  ;;  %v1489_v33 = vld [vmem:[#allocation2 + $0xf1] sm:$0xff]  ;;  %v8923_v4 = vsel %vm7070_vm0, 4294967295, %v8922_v4  ;;  %v8925_v35 = vmov 0  ;;  %vm7084_vm8 = vmpackc.low %vm8888_vm12, %vm1330_vm15 }
 0x1d2   : > { %5550 = vmatprep.mubr.msk.bf16.mxu0 %vm7043_vm11, %v7047_v16  ;;  %8924 = vst [vmem:[#allocation37_spill] sm:$0xff] %v8923_v4  ;;  %v7081_v7 = vpack.c.bf16 %v1489_v33, %v1488_v22  ;;  %v8929_v40 = vmov 0  ;;  %vm1363_vm3 = vcmp.le.s32.totalorder %v1137_v58, 14  ;;  %v1490_v30 = vld [vmem:[#allocation2 + $0xf9] sm:$0xff]  ;;  %v2769_v22 = vld [vmem:[#allocation2 + $0x30] sm:$0xff]  ;;  %vm8940_vm15 = vnez %v8882_v43 }
 0x1d3   : > { %8920 = vst [vmem:[#allocation35_spill] sm:$0xff] %v7057_v61  ;;  %8921 = vst [vmem:[#allocation36_spill] sm:$0xff] %v7059_v42  ;;  %4588 = vmatmul.mubr.msk.bf16.gmra.mrb[56].mxu1 %vm7050_vm13, %v7057_v61  ;;  %v8930_v40 = vsel %vm7084_vm8, 4294967295, %v8929_v40  ;;  %v5950_v58 = vld [vmem:[#allocation6 + $0x48] sm:$0xff]   ;;  %v5954_v61 = vld [vmem:[#allocation6 + $0x10] sm:$0xff]  }
 0x1d4   : > { %2068 = vmatprep.mubr.bf16.mxu1 %v7059_v42  ;;  %vm7077_vm13 = vmpackc.low %vm1361_vm4, %vm8888_vm12  ;;  %8928 = vst [vmem:[#allocation39_spill] sm:$0xff] %v7081_v7  ;;  %v5949_v42 = vld [vmem:[#allocation6] sm:$0xff]   ;;  %v5959_v21 = vld [vmem:[#allocation6 + $0x68] sm:$0xff]  }
 0x1d5   : > { %v8926_v35 = vsel %vm7077_vm13, 4294967295, %v8925_v35  ;;  %8931 = vst [vmem:[#allocation40_spill] sm:$0xff] %v8930_v40  ;;  %vm7103_vm4 = vmpackc.low %vm1363_vm3, %vm8888_vm12  ;;  %v2770_v40 = vld [vmem:[#allocation2 + $0x38] sm:$0xff]  ;;  %v5963_v4 = vld [vmem:[#allocation6 + $0x30] sm:$0xff]   ;;  %vm8935_vm12 = vnez %v8855_v51  ;;  %vm8941_vm3 = vnez %v8885_v27 }
 0x1d6   : > { %8927 = vst [vmem:[#allocation38_spill] sm:$0xff] %v8926_v35  ;;  %v1620_v45 = vld [vmem:[#allocation2 + $0x107] sm:$0xff] }
 0x1d7   : > { %v1491_v60 = vld [vmem:[#allocation2 + $0x101] sm:$0xff] }
 0x1d8   : > { %v1621_v24 = vld [vmem:[#allocation2 + $0x10f] sm:$0xff]  ;;  %v7107_v33 = vpack.c.bf16 %v1491_v60, %v1490_v30  ;;  %v5952_v30 = vld [vmem:[#allocation6 + $0x8] sm:$0xff]  }
 0x1d9   : > { %5551 = vmatmul.mubr.msk.bf16.gmra.mrb[88].mxu0 %vm7070_vm0, %v7074_v26  ;;  %v7091_v31 = vpack.c.bf16 %v1621_v24, %v1620_v45  ;;  %v2768_v45 = vld [vmem:[#allocation2 + $0x28] sm:$0xff] }
 0x1da   : > { %5554 = vmatprep.mubr.msk.bf16.mxu0 %vm7077_vm13, %v7081_v7  ;;  %v2865_v8 = vpack.c.bf16 %v2769_v22, %v2768_v45  ;;  %v2705_v60 = vld [vmem:[#allocation2 + $0x2f] sm:$0xff]  ;;  %v2771_v22 = vld [vmem:[#allocation2 + $0x40] sm:$0xff] }
 0x1db   : > { %8932 = vst [vmem:[#allocation41_spill] sm:$0xff] %v7091_v31  ;;  %4591 = vmatmul.mubr.msk.bf16.gmra.mrb[60].mxu1 %vm7084_vm8, %v7091_v31  ;;  %v5953_v45 = vld [vmem:[#allocation6 + $0x50] sm:$0xff]   ;;  %v5960_v31 = vld [vmem:[#allocation6 + $0x208] sm:$0xff]  }
 0x1dc   : > { %5494 = vmatprep.mubr.msk.bf16.mxu1 %vm6946_vm7, %v6995_v39  ;;  %v4785_v39 = vpack.c.bf16 %v2705_v60, %v2704_v3  ;;  %v5956_v3 = vld [vmem:[#allocation6 + $0x18] sm:$0xff]  }
 0x1dd   : > { %v2772_v60 = vld [vmem:[#allocation2 + $0x48] sm:$0xff] }
 0x1e1   : > { %5555 = vmatmul.mubr.msk.bf16.gmra.mrb[92].mxu0 %vm7103_vm4, %v7107_v33 }
 0x1e2   : > { %3137 = vmatprep.mubr.bf16.mxu0 %v2865_v8  ;;  %v2868_v8 = vpack.c.bf16 %v2771_v22, %v2770_v40  ;;  %v2707_v40 = vld [vmem:[#allocation2 + $0x3f] sm:$0xff]  ;;  %v5967_v22 = vld [vmem:[#allocation6 + $0x218] sm:$0xff]  }
 0x1e3   : > { %5495 = vmatmul.mubr.msk.bf16.vlgmr.msra.gmra.mrb[64].mxu1 %vm6991_vm9, %v7005_v62 }
 0x1e4   : > { %5498 = vmatprep.mubr.msk.bf16.mxu1 %vm7000_vm5, %v7040_v50  ;;  %5156 = vmatpush3.bf16.msra.mxu1 %v5949_v42  ;;  %v5966_v42 = vld [vmem:[#allocation6 + $0x210] sm:$0xff]  }
 0x1e5   : > { %5157 = vmatprep.subr.bf16.mxu1 %v5950_v58  ;;  %v5957_v58 = vld [vmem:[#allocation6 + $0x60] sm:$0xff]  }
 0x1e8   : > { %5158 = vmatpush3.bf16.msra.mxu1 %v5952_v30  ;;  %v2706_v30 = vld [vmem:[#allocation2 + $0x37] sm:$0xff] }
 0x1e9   : > { %4786 = vmatmul.mubr.msk.bf16.vlgmr.msra.gmra.mrb[96].mxu0 %vm6594_vm2, %v4785_v39  ;;  %5159 = vmatprep.subr.bf16.mxu1 %v5953_v45  ;;  %v2773_v39 = vld [vmem:[#allocation2 + $0x50] sm:$0xff] }
 0x1ea   : > { %5559 = vmatpush3.bf16.msra.mxu0 %v6974_v37  ;;  %3145 = vmatprep.mubr.bf16.mxu0 %v2868_v8  ;;  %v4788_v37 = vpack.c.bf16 %v2707_v40, %v2706_v30  ;;  %v2871_v45 = vpack.c.bf16 %v2773_v39, %v2772_v60  ;;  %v5958_v8 = vld [vmem:[#allocation6 + $0x20] sm:$0xff]   ;;  %v5962_v40 = vld [vmem:[#allocation6 + $0x70] sm:$0xff]   ;;  %v5969_v60 = vld [vmem:[#allocation6 + $0x228] sm:$0xff]  }
 0x1eb   : > { %5499 = vmatmul.mubr.msk.bf16.gmra.mrb[68].mxu1 %vm7036_vm1, %v7047_v16  ;;  %5560 = vmatprep.subr.bf16.mxu0 %v5960_v31  ;;  %v2708_v39 = vld [vmem:[#allocation2 + $0x47] sm:$0xff]  ;;  %v1657_v30 = vld [vmem:[#allocation2 + $0x111] sm:$0xff] }
 0x1ec   : > { %5502 = vmatprep.mubr.msk.bf16.mxu1 %vm7043_vm11, %v7074_v26  ;;  %5160 = vmatpush3.bf16.msra.mxu1 %v5954_v61  ;;  %v5961_v61 = vld [vmem:[#allocation6 + $0x28] sm:$0xff]  }
 0x1ed   : > { %5161 = vmatprep.subr.bf16.mxu1 %v5955_v38  ;;  %v5968_v38 = vld [vmem:[#allocation6 + $0x220] sm:$0xff]  }
 0x1ee   : > { %5561 = vmatpush3.bf16.msra.mxu0 %v5960_v31  ;;  %v2709_v31 = vld [vmem:[#allocation2 + $0x4f] sm:$0xff] }
 0x1ef   : > { %5562 = vmatprep.subr.bf16.mxu0 %v5966_v42 }
 0x1f0   : > { %5162 = vmatpush3.bf16.msra.mxu1 %v5956_v3  ;;  %v2775_v3 = vld [vmem:[#allocation2 + $0x60] sm:$0xff] }
 0x1f1   : > { %4789 = vmatmul.mubr.msk.bf16.gmra.mrb[100].mxu0 %vm6620_vm6, %v4788_v37  ;;  %5163 = vmatprep.subr.bf16.mxu1 %v5957_v58  ;;  %v1656_v58 = vld [vmem:[#allocation2 + $0x109] sm:$0xff]  ;;  %v2774_v37 = vld [vmem:[#allocation2 + $0x58] sm:$0xff] }
 0x1f2   : > { %3153 = vmatprep.mubr.bf16.mxu0 %v2871_v45  ;;  %5563 = vmatpush3.bf16.msra.mxu0 %v5966_v42  ;;  %v4791_v42 = vpack.c.bf16 %v2709_v31, %v2708_v39  ;;  %v2874_v45 = vpack.c.bf16 %v2775_v3, %v2774_v37  ;;  %v2711_v31 = vld [vmem:[#allocation2 + $0x5f] sm:$0xff]  ;;  %v1365_v3 = vld [vmem:[#allocation2 + $0xf] sm:$0xff] }
 0x1f3   : > { %5503 = vmatmul.mubr.msk.bf16.gmra.mrb[72].mxu1 %vm7070_vm0, %v7081_v7  ;;  %5564 = vmatprep.subr.bf16.mxu0 %v5967_v22  ;;  %v6005_v7 = vld [vmem:[#allocation2 + $0x10] sm:$0xff] }
 0x1f4   : > { %5506 = vmatprep.mubr.msk.bf16.mxu1 %vm7077_vm13, %v7107_v33  ;;  %5164 = vmatpush3.bf16.msra.mxu1 %v5958_v8  ;;  %v7135_v35 = vpack.c.bf16 %v6005_v7, %v6005_v7  ;;  %v5964_v8 = vld [vmem:[#allocation6 + $0x78] sm:$0xff]   ;;  %v2777_v39 = vld [vmem:[#allocation2 + $0x70] sm:$0xff] }
 0x1f5   : > { %5165 = vmatprep.subr.bf16.mxu1 %v5959_v21  ;;  %v7139_v21 = vpack.c.bf16 %v1657_v30, %v1656_v58  ;;  %v1364_v7 = vld [vmem:[#allocation2 + $0x7] sm:$0xff]  ;;  %v2710_v58 = vld [vmem:[#allocation2 + $0x57] sm:$0xff] }
 0x1f6   : > { %5565 = vmatpush3.bf16.msra.mxu0 %v5967_v22  ;;  %v5965_v22 = vld [vmem:[#allocation6 + $0x38] sm:$0xff]  }
 0x1f7   : > { %5566 = vmatprep.subr.bf16.mxu0 %v5968_v38  ;;  %v2776_v30 = vld [vmem:[#allocation2 + $0x68] sm:$0xff] }
 0x1f8   : > { %5166 = vmatpush3.bf16.msra.mxu1 %v5961_v61  ;;  %v5970_v61 = vld [vmem:[#allocation6 + $0x230] sm:$0xff]   ;;  %v2877_v37 = vpack.c.bf16 %v2777_v39, %v2776_v30 }
 0x1f9   : > { %4792 = vmatmul.mubr.msk.bf16.gmra.mrb[104].mxu0 %vm6657_vm10, %v4791_v42  ;;  %5167 = vmatprep.subr.bf16.mxu1 %v5962_v40  ;;  %v4794_v40 = vpack.c.bf16 %v2711_v31, %v2710_v58  ;;  %v5971_v42 = vld [vmem:[#allocation6 + $0x238] sm:$0xff]   ;;  %v2778_v31 = vld [vmem:[#allocation2 + $0x78] sm:$0xff] }
 0x1fa   : > { %3161 = vmatprep.mubr.bf16.mxu0 %v2874_v45  ;;  %5567 = vmatpush3.bf16.msra.mxu0 %v5968_v38  ;;  %v4665_v38 = vpack.c.bf16 %v1365_v3, %v1364_v7  ;;  %v2712_v45 = vld [vmem:[#allocation2 + $0x67] sm:$0xff] }
 0x1fb   : > { %5507 = vmatmul.mubr.msk.bf16.gmra.mrb[76].mxu1 %vm7103_vm4, %v7139_v21  ;;  %5568 = vmatprep.subr.bf16.mxu0 %v5969_v60  ;;  %v2780_v3 = vld [vmem:[#allocation2 + $0x88] sm:$0xff] }
 0x1fc   : > { %5168 = vmatpush3.bf16.msra.mxu1 %v5963_v4  ;;  %2414 = vmatprep.mubr.bf16.mxu1 %v7135_v35  ;;  %v2713_v4 = vld [vmem:[#allocation2 + $0x6f] sm:$0xff]  ;;  %v5972_v30 = vld [vmem:[%s8707_s5] ss:$8 sps:$4 sm:$0xff]  }
 0x1fd   : > { %5169 = vmatprep.subr.bf16.mxu1 %v5964_v8  ;;  %v4797_v8 = vpack.c.bf16 %v2713_v4, %v2712_v45  ;;  %v8947_v4 = vld [vmem:[#allocation24_spill] sm:$0xff] }
 0x1fe   : > { %5569 = vmatpush3.bf16.msra.mxu0 %v5969_v60  ;;  %v2779_v60 = vld [vmem:[#allocation2 + $0x80] sm:$0xff] }
 0x1ff   : > { %5570 = vmatprep.subr.bf16.mxu0 %v5970_v61  ;;  %v2880_v7 = vpack.c.bf16 %v2779_v60, %v2778_v31 }
 0x200   : > { %5170 = vmatpush3.bf16.msra.mxu1 %v5965_v22  ;;  %v2781_v22 = vld [vmem:[#allocation2 + $0x90] sm:$0xff] }
 0x201   : > { %4795 = vmatmul.mubr.msk.bf16.gmra.mrb[108].mxu0 %vm6695_vm14, %v4794_v40  ;;  %v2883_v39 = vpack.c.bf16 %v2781_v22, %v2780_v3  ;;  %v2785_v40 = vld [vmem:[#allocation2 + $0xb0] sm:$0xff] }
 0x202   : > { %3169 = vmatprep.mubr.bf16.mxu0 %v2877_v37  ;;  %5571 = vmatpush3.bf16.msra.mxu0 %v5970_v61  ;;  %v8944_v37 = vld [vmem:[#allocation27_spill] sm:$0xff] }
 0x203   : > { %4666 = vmatmul.mubr.msk.bf16.vlgmr.msra.gmra.mrb[80].mxu1 %vm6594_vm2, %v4665_v38  ;;  %5572 = vmatprep.subr.bf16.mxu0 %v5971_v42  ;;  %vm8936_vm2 = vnez %v8862_v25  ;;  %v5974_v38 = vld [vmem:[%s8707_s5 + $0x4] ss:$8 sps:$4 sm:$0xff]  }
 0x204   : > { %2422 = vmatprep.mubr.bf16.mxu1 %v6586_v36  ;;  %v2714_v36 = vld [vmem:[#allocation2 + $0x77] sm:$0xff]  ;;  %3654 = vmatprep.subr.bf16.mxu1 %v5974_v38 }
 0x205   : > { %v4800_v61 = vpack.c.bf16 %v2715_v52, %v2714_v36  ;;  %3655 = vmatpush1.bf16.msra.mxu1 %v5972_v30  ;;  %v8949_v52 = vld [vmem:[#allocation30_spill] sm:$0xff] }
 0x206   : > { %5573 = vmatpush3.bf16.msra.mxu0 %v5971_v42  ;;  %v8943_v42 = vld [vmem:[#allocation31_spill] sm:$0xff] }
 0x209   : > { %4798 = vmatmul.mubr.msk.bf16.gmra.mrb[112].mxu0 %vm8935_vm12, %v4797_v8 }
 0x20a   : > { %3177 = vmatprep.mubr.bf16.mxu0 %v2880_v7  ;;  %v8948_v7 = vld [vmem:[#allocation35_spill] sm:$0xff] }
 0x20b   : > { %4669 = vmatmul.mubr.msk.bf16.gmra.mrb[84].mxu1 %vm6620_vm6, %v6598_v55  ;;  %v2782_v55 = vld [vmem:[#allocation2 + $0x98] sm:$0xff]  ;;  %vm8937_vm6 = vnez %v8869_v1 }
 0x20c   : > { %2430 = vmatprep.mubr.bf16.mxu1 %v6600_v56  ;;  %v2886_v58 = vpack.c.bf16 %v2783_v13, %v2782_v55  ;;  %v2784_v56 = vld [vmem:[#allocation2 + $0xa8] sm:$0xff]  ;;  %v5975_v55 = vld [vmem:[%s8707_s5 + $0x10] ss:$8 sps:$4 sm:$0xff]  }
 0x20d   : > { %v2889_v44 = vpack.c.bf16 %v2785_v40, %v2784_v56  ;;  %v8953_v56 = vld [vmem:[#allocation41_spill] sm:$0xff]  ;;  %v8954_v40 = vld [vmem:[#allocation34_spill] sm:$0xff] }
 0x211   : > { %4801 = vmatmul.mubr.msk.bf16.gmra.mrb[116].mxu0 %vm8936_vm2, %v4800_v61  ;;  %v8951_v61 = vld [vmem:[#allocation36_spill] sm:$0xff] }
 0x212   : > { %3185 = vmatprep.mubr.bf16.mxu0 %v2883_v39 }
 0x213   : > { %4672 = vmatmul.mubr.msk.bf16.gmra.mrb[88].mxu1 %vm6657_vm10, %v6628_v18  ;;  %vm8938_vm10 = vnez %v8874_v53  ;;  %v2786_v18 = vld [vmem:[#allocation2 + $0xb8] sm:$0xff] }
 0x214   : > { %2438 = vmatprep.mubr.bf16.mxu1 %v6630_v19  ;;  %v2892_v19 = vpack.c.bf16 %v6872_v32, %v2786_v18  ;;  %v2735_v18 = vld [vmem:[#allocation2 + $0x11f] sm:$0xff] }
 0x219   : > { %4804 = vmatmul.mubr.msk.bf16.gmra.mrb[120].mxu0 %vm8937_vm6, %v6833_v14 }
 0x21a   : > { %3193 = vmatprep.mubr.bf16.mxu0 %v2886_v58  ;;  %v5977_v58 = vld [vmem:[%s8707_s5 + $0x14] ss:$8 sps:$4 sm:$0xff]  }
 0x21b   : > { %4675 = vmatmul.mubr.msk.bf16.gmra.mrb[92].mxu1 %vm6695_vm14, %v6665_v48  ;;  %vm8939_vm14 = vnez %v8879_v47  ;;  %3656 = vmatprep.subr.bf16.mxu1 %v5977_v58 }
 0x21c   : > { %2446 = vmatprep.mubr.bf16.mxu1 %v6667_v49  ;;  %3657 = vmatpush1.bf16.msra.mxu1 %v5975_v55 }
 0x221   : > { %4807 = vmatmul.mubr.msk.bf16.gmra.mrb[124].mxu0 %vm8938_vm10, %v6859_v59 }
 0x222   : > { %3201 = vmatprep.mubr.bf16.mxu0 %v2889_v44  ;;  %v2734_v44 = vld [vmem:[#allocation2 + $0x117] sm:$0xff] }
 0x223   : > { %4678 = vmatmul.mubr.msk.bf16.gmra.mrb[96].mxu1 %vm8935_vm12, %v6703_v17  ;;  %vm8942_vm12 = vnez %v8887_v5 }
 0x224   : > { %2454 = vmatprep.mubr.bf16.mxu1 %v6705_v20 }
 0x229   : > { %4810 = vmatmul.mubr.msk.bf16.gmra.mrb[128].mxu0 %vm8939_vm14, %v6883_v41 }
 0x22a   : > { %3209 = vmatprep.mubr.bf16.mxu0 %v2892_v19  ;;  %v2801_v19 = vld [vmem:[#allocation2 + $0x31] sm:$0xff] }
 0x22b   : > { %4681 = vmatmul.mubr.msk.bf16.gmra.mrb[100].mxu1 %vm8936_vm2, %v6740_v54  ;;  %vm8945_vm2 = vnez %v8944_v37 }
 0x22c   : > { %2462 = vmatprep.mubr.bf16.mxu1 %v6742_v57 }
 0x231   : > { %4813 = vmatmul.mubr.msk.bf16.gmra.mrb[132].mxu0 %vm8940_vm15, %v6906_v12 }
 0x232   : > { %3217 = vmatprep.mubr.bf16.mxu0 %v6908_v0 }
 0x233   : > { %4684 = vmatmul.mubr.msk.bf16.gmra.mrb[104].mxu1 %vm8937_vm6, %v6773_v28  ;;  %vm8950_vm6 = vnez %v8949_v52 }
 0x234   : > { %2470 = vmatprep.mubr.bf16.mxu1 %v6775_v29 }
 0x236   : > { %v5035_v48 = vpop.f32.mrb[0].mxu1 }
 0x237   : > { %v5036_v49 = vpop.f32.mrb[1].mxu1 }
 0x238   : > { %v7192_v11 = vadd.f32 %v5036_v49, %v5035_v48  ;;  %v5038_v17 = vpop.f32.mrb[2].mxu1 }
 0x239   : > { %4816 = vmatmul.mubr.msk.bf16.gmra.mrb[136].mxu0 %vm8941_vm3, %v6929_v63  ;;  %v5039_v20 = vpop.f32.mrb[3].mxu1 }
 0x23a   : > { %v7197_v51 = vadd.f32 %v5039_v20, %v5038_v17  ;;  %3225 = vmatprep.mubr.bf16.mxu0 %v6931_v2  ;;  %v4830_v17 = vpack.c.bf16 %v2735_v18, %v2734_v44  ;;  %v2800_v20 = vld [vmem:[#allocation2 + $0x29] sm:$0xff] }
 0x23b   : > { %4687 = vmatmul.mubr.msk.bf16.gmra.mrb[108].mxu1 %vm8938_vm10, %v6806_v6  ;;  %vm8955_vm10 = vnez %v8954_v40 }
 0x23c   : > { %2478 = vmatprep.mubr.bf16.mxu1 %v6808_v9 }
 0x23e   : > { %v5041_v54 = vpop.f32.mrb[4].mxu1 }
 0x23f   : > { %v5042_v57 = vpop.f32.mrb[5].mxu1 }
 0x240   : > { %v7204_v25 = vadd.f32 %v5042_v57, %v5041_v54  ;;  %v5044_v28 = vpop.f32.mrb[6].mxu1 }
 0x241   : > { %4819 = vmatmul.mubr.msk.bf16.gmra.mrb[140].mxu0 %vm8942_vm12, %v6958_v34  ;;  %v5045_v29 = vpop.f32.mrb[7].mxu1 }
 0x242   : > { %v7209_v1 = vadd.f32 %v5045_v29, %v5044_v28  ;;  %3233 = vmatprep.mubr.bf16.mxu0 %v6960_v15  ;;  %v4833_v28 = vpack.c.bf16 %v2801_v19, %v2800_v20  ;;  %v8963_v19 = vld [vmem:[#allocation19_spill] sm:$0xff]  ;;  %v2810_v20 = vld [vmem:[#allocation2 + $0x79] sm:$0xff] }
 0x243   : > { %4690 = vmatmul.mubr.msk.bf16.gmra.mrb[112].mxu1 %vm8939_vm14, %v6833_v14 }
 0x244   : > { %2486 = vmatprep.mubr.bf16.mxu1 %v6835_v10  ;;  %v8946_v10 = vld [vmem:[#allocation32_spill] sm:$0xff] }
 0x246   : > { %v5047_v6 = vpop.f32.mrb[8].mxu1 }
 0x247   : > { %v5048_v9 = vpop.f32.mrb[9].mxu1 }
 0x248   : > { %v7216_v53 = vadd.f32 %v5048_v9, %v5047_v6  ;;  %v5050_v32 = vpop.f32.mrb[10].mxu1  ;;  %v2805_v6 = vld [vmem:[#allocation2 + $0x51] sm:$0xff] }
 0x249   : > { %4822 = vmatmul.mubr.msk.bf16.gmra.mrb[144].mxu0 %vm8945_vm2, %v8943_v42  ;;  %v5051_v14 = vpop.f32.mrb[11].mxu1 }
 0x24a   : > { %v7227_v47 = vadd.f32 %v5051_v14, %v5050_v32  ;;  %3241 = vmatprep.mubr.bf16.mxu0 %v8946_v10  ;;  %v2802_v32 = vld [vmem:[#allocation2 + $0x39] sm:$0xff]  ;;  %v2804_v14 = vld [vmem:[#allocation2 + $0x49] sm:$0xff] }
 0x24b   : > { %4693 = vmatmul.mubr.msk.bf16.gmra.mrb[116].mxu1 %vm8940_vm15, %v6859_v59  ;;  %v8952_v59 = vld [vmem:[#allocation25_spill] sm:$0xff] }
 0x24c   : > { %2494 = vmatprep.mubr.bf16.mxu1 %v8947_v4 }
 0x24e   : > { %v5053_v60 = vpop.f32.mrb[12].mxu1 }
 0x24f   : > { %v5054_v45 = vpop.f32.mrb[13].mxu1 }
 0x250   : > { %v7234_v8 = vadd.f32 %v5054_v45, %v5053_v60  ;;  %v5056_v31 = vpop.f32.mrb[14].mxu1  ;;  %v4839_v45 = vpack.c.bf16 %v2805_v6, %v2804_v14 }
 0x251   : > { %4825 = vmatmul.mubr.msk.bf16.gmra.mrb[148].mxu0 %vm8950_vm6, %v8948_v7  ;;  %v5057_v22 = vpop.f32.mrb[15].mxu1 }
 0x252   : > { %v7239_v36 = vadd.f32 %v5057_v22, %v5056_v31  ;;  %3249 = vmatprep.mubr.bf16.mxu0 %v8951_v61  ;;  %v5978_v31 = vld [vmem:[%s8707_s5 + $0x20] ss:$8 sps:$4 sm:$0xff]  }
 0x253   : > { %4696 = vmatmul.mubr.msk.bf16.gmra.mrb[120].mxu1 %vm8941_vm3, %v6883_v41  ;;  %v8961_v61 = vld [vmem:[#allocation18_spill] sm:$0xff] }
 0x254   : > { %2502 = vmatprep.mubr.bf16.mxu1 %v8952_v59  ;;  %vm8962_vm3 = vnez %v8961_v61  ;;  %v2807_v59 = vld [vmem:[#allocation2 + $0x61] sm:$0xff] }
 0x256   : > { %v5059_v43 = vpop.f32.mrb[16].mxu1 }
 0x257   : > { %v5060_v3 = vpop.f32.mrb[17].mxu1 }
 0x258   : > { %v7246_v39 = vadd.f32 %v5060_v3, %v5059_v43  ;;  %v5062_v13 = vpop.f32.mrb[18].mxu1  ;;  %v2809_v43 = vld [vmem:[#allocation2 + $0x71] sm:$0xff] }
 0x259   : > { %4828 = vmatmul.mubr.msk.bf16.gmra.mrb[152].mxu0 %vm8955_vm10, %v8953_v56  ;;  %v5063_v41 = vpop.f32.mrb[19].mxu1  ;;  %v2808_v56 = vld [vmem:[#allocation2 + $0x69] sm:$0xff] }
 0x25a   : > { %v7257_v27 = vadd.f32 %v5063_v41, %v5062_v13  ;;  %3257 = vmatprep.mubr.bf16.mxu0 %v7135_v35  ;;  %v2806_v13 = vld [vmem:[#allocation2 + $0x59] sm:$0xff]  ;;  %v4845_v18 = vpack.c.bf16 %v2809_v43, %v2808_v56 }
 0x25b   : > { %4699 = vmatmul.mubr.msk.bf16.gmra.mrb[124].mxu1 %vm8942_vm12, %v6906_v12  ;;  %v8957_v12 = vld [vmem:[#allocation16_spill] sm:$0xff]  ;;  %v4842_v58 = vpack.c.bf16 %v2807_v59, %v2806_v13  ;;  %vm8964_vm12 = vnez %v8963_v19  ;;  %v5986_v13 = vld [vmem:[%s8707_s5 + $0x44] ss:$8 sps:$4 sm:$0xff]  }
 0x25c   : > { %2510 = vmatprep.mubr.bf16.mxu1 %v6908_v0  ;;  %vm8958_vm14 = vnez %v8957_v12  ;;  %v2803_v0 = vld [vmem:[#allocation2 + $0x41] sm:$0xff] }
 0x25d   : > { %v4836_v38 = vpack.c.bf16 %v2803_v0, %v2802_v32 }
 0x25e   : > { %v5065_v48 = vpop.f32.mrb[20].mxu1 }
 0x25f   : > { %v5066_v49 = vpop.f32.mrb[21].mxu1 }
 0x260   : > { %v7264_v54 = vadd.f32 %v5066_v49, %v5065_v48  ;;  %v5068_v57 = vpop.f32.mrb[22].mxu1  ;;  %v2813_v49 = vld [vmem:[#allocation2 + $0x91] sm:$0xff] }
 0x261   : > { %4831 = vmatmul.mubr.msk.bf16.gmra.mrb[156].mxu0 %vm7084_vm8, %v4830_v17  ;;  %v5069_v29 = vpop.f32.mrb[23].mxu1 }
 0x262   : > { %v7268_v5 = vadd.f32 %v5069_v29, %v5068_v57  ;;  %5574 = vmatprep.mubr.msk.bf16.mxu0 %vm8958_vm14, %v4833_v28  ;;  %v2812_v29 = vld [vmem:[#allocation2 + $0x89] sm:$0xff] }
 0x263   : > { %4702 = vmatmul.mubr.msk.bf16.gmra.mrb[128].mxu1 %vm8945_vm2, %v6929_v63  ;;  %v5980_v63 = vld [vmem:[%s8707_s5 + $0x24] ss:$8 sps:$4 sm:$0xff]   ;;  %v4851_v6 = vpack.c.bf16 %v2813_v49, %v2812_v29 }
 0x264   : > { %2518 = vmatprep.mubr.bf16.mxu1 %v6931_v2  ;;  %v8959_v2 = vld [vmem:[#allocation17_spill] sm:$0xff]  ;;  %3658 = vmatprep.subr.bf16.mxu1 %v5980_v63  ;;  %v8972_v63 = vld [vmem:[#allocation23_spill] sm:$0xff] }
 0x265   : > { %vm8960_vm15 = vnez %v8959_v2  ;;  %3659 = vmatpush1.bf16.msra.mxu1 %v5978_v31  ;;  %v8971_v31 = vld [vmem:[#allocation29_spill] sm:$0xff]  ;;  %vm8973_vm14 = vnez %v8972_v63 }
 0x266   : > { %v5071_v9 = vpop.f32.mrb[24].mxu1 }
 0x267   : > { %v5072_v30 = vpop.f32.mrb[25].mxu1 }
 0x268   : > { %v7276_v4 = vadd.f32 %v5072_v30, %v5071_v9  ;;  %v5074_v60 = vpop.f32.mrb[26].mxu1  ;;  %v5981_v9 = vld [vmem:[%s8707_s5 + $0x30] ss:$8 sps:$4 sm:$0xff]   ;;  %v8969_v30 = vld [vmem:[#allocation22_spill] sm:$0xff] }
 0x269   : > { %5575 = vmatmul.mubr.msk.bf16.vlgmr.msra.gmra.mrb[64].mxu0 %vm8960_vm15, %v4836_v38  ;;  %v5075_v37 = vpop.f32.mrb[27].mxu1 }
 0x26a   : > { %v7286_v22 = vadd.f32 %v5075_v37, %v5074_v60  ;;  %5578 = vmatprep.mubr.msk.bf16.mxu0 %vm8962_vm3, %v4839_v45 }
 0x26b   : > { %4705 = vmatmul.mubr.msk.bf16.gmra.mrb[132].mxu1 %vm8950_vm6, %v6958_v34  ;;  %v8965_v34 = vld [vmem:[#allocation20_spill] sm:$0xff] }
 0x26c   : > { %2526 = vmatprep.mubr.bf16.mxu1 %v6960_v15  ;;  %vm8966_vm2 = vnez %v8965_v34  ;;  %v2811_v15 = vld [vmem:[#allocation2 + $0x81] sm:$0xff] }
 0x26d   : > { %v4848_v28 = vpack.c.bf16 %v2811_v15, %v2810_v20  ;;  %v5987_v20 = vld [vmem:[%s8707_s5 + $0x50] ss:$8 sps:$4 sm:$0xff]   ;;  %v5995_v15 = vld [vmem:[%s8707_s5 + $0x74] ss:$8 sps:$4 sm:$0xff]  }
 0x26e   : > { %v5077_v3 = vpop.f32.mrb[28].mxu1 }
 0x26f   : > { %v5078_v55 = vpop.f32.mrb[29].mxu1 }
 0x270   : > { %v7294_v41 = vadd.f32 %v5078_v55, %v5077_v3  ;;  %v5080_v44 = vpop.f32.mrb[30].mxu1  ;;  %v5984_v3 = vld [vmem:[%s8707_s5 + $0x40] ss:$8 sps:$4 sm:$0xff]  }
 0x271   : > { %5579 = vmatmul.mubr.msk.bf16.gmra.mrb[68].mxu0 %vm8964_vm12, %v4842_v58  ;;  %v5081_v48 = vpop.f32.mrb[31].mxu1 }
 0x272   : > { %v7298_v52 = vadd.f32 %v5081_v48, %v5080_v44  ;;  %5582 = vmatprep.mubr.msk.bf16.mxu0 %vm8966_vm2, %v4845_v18 }
 0x273   : > { %4708 = vmatmul.mubr.msk.bf16.gmra.mrb[136].mxu1 %vm8955_vm10, %v8943_v42  ;;  %v5983_v42 = vld [vmem:[%s8707_s5 + $0x34] ss:$8 sps:$4 sm:$0xff]   ;;  %vm8970_vm10 = vnez %v8969_v30 }
 0x274   : > { %2534 = vmatprep.mubr.bf16.mxu1 %v8946_v10  ;;  %v8967_v10 = vld [vmem:[#allocation21_spill] sm:$0xff]  ;;  %3660 = vmatprep.subr.bf16.mxu1 %v5983_v42 }
 0x275   : > { %vm8968_vm6 = vnez %v8967_v10  ;;  %3661 = vmatpush1.bf16.msra.mxu1 %v5981_v9 }
 0x276   : > { %v5083_v17 = vpop.f32.mrb[32].mxu1  ;;  %3662 = vmatprep.subr.bf16.mxu1 %v5986_v13 }
 0x277   : > { %v5084_v57 = vpop.f32.mrb[33].mxu1 }
 0x278   : > { %v7306_v12 = vadd.f32 %v5084_v57, %v5083_v17  ;;  %v5086_v0 = vpop.f32.mrb[34].mxu1 }
 0x279   : > { %5583 = vmatmul.mubr.msk.bf16.gmra.mrb[72].mxu0 %vm8968_vm6, %v4848_v28  ;;  %v5087_v40 = vpop.f32.mrb[35].mxu1  ;;  %3663 = vmatpush1.bf16.msra.mxu1 %v5984_v3 }
 0x27a   : > { %v7316_v32 = vadd.f32 %v5087_v40, %v5086_v0  ;;  %5586 = vmatprep.mubr.msk.bf16.mxu0 %vm8970_vm10, %v4851_v6  ;;  %v2830_v0 = vld [vmem:[#allocation2 + $0x119] sm:$0xff]  ;;  %v2831_v6 = vld [vmem:[#allocation2 + $0x121] sm:$0xff]  ;;  %3664 = vmatprep.subr.bf16.mxu1 %v5989_v46 }
 0x27b   : > { %4711 = vmatmul.mubr.msk.bf16.gmra.mrb[140].mxu1 %vm7084_vm8, %v8948_v7  ;;  %v4878_v9 = vpack.c.bf16 %v2831_v6, %v2830_v0 }
 0x27d   : > { %3665 = vmatpush1.bf16.msra.mxu1 %v5987_v20 }
 0x27e   : > { %v5089_v38 = vpop.f32.mrb[36].mxu1 }
 0x27f   : > { %v5090_v14 = vpop.f32.mrb[37].mxu1 }
 0x280   : > { %v7323_v60 = vadd.f32 %v5090_v14, %v5089_v38  ;;  %v5092_v45 = vpop.f32.mrb[38].mxu1 }
 0x281   : > { %5587 = vmatmul.mubr.msk.bf16.gmra.mrb[76].mxu0 %vm8973_vm14, %v8971_v31  ;;  %v5093_v2 = vpop.f32.mrb[39].mxu1 }
 0x282   : > { %v7328_v37 = vadd.f32 %v5093_v2, %v5092_v45  ;;  %5590 = vmatprep.mubr.msk.bf16.mxu0 %vm6946_vm7, %v7005_v62  ;;  %v5992_v2 = vld [vmem:[%s8707_s5 + $0x64] ss:$8 sps:$4 sm:$0xff]  }
 0x283   : > { %3666 = vmatprep.subr.bf16.mxu1 %v5992_v2 }
 0x286   : > { %v5095_v59 = vpop.f32.mrb[40].mxu1 }
 0x287   : > { %v5096_v35 = vpop.f32.mrb[41].mxu1 }
 0x288   : > { %v7333_v7 = vadd.f32 %v5096_v35, %v5095_v59  ;;  %v5098_v43 = vpop.f32.mrb[42].mxu1 }
 0x289   : > { %5591 = vmatmul.mubr.msk.bf16.gmra.mrb[80].mxu0 %vm6991_vm9, %v7040_v50  ;;  %v5099_v58 = vpop.f32.mrb[43].mxu1  ;;  %v8976_v50 = vld [vmem:[#allocation39_spill] sm:$0xff] }
 0x28a   : > { %v7344_v56 = vadd.f32 %v5099_v58, %v5098_v43  ;;  %5594 = vmatprep.mubr.msk.bf16.mxu0 %vm7000_vm5, %v7047_v16  ;;  %vm4044_vm5 = vcmask 130048  }
 0x28e   : > { %v5101_v62 = vpop.f32.mrb[44].mxu1 }
 0x28f   : > { %v5102_v44 = vpop.f32.mrb[45].mxu1 }
 0x290   : > { %v5103_v18 = vadd.f32 %v5102_v44, %v5101_v62  ;;  %v5104_v19 = vpop.f32.mrb[46].mxu1 }
 0x291   : > { %5595 = vmatmul.mubr.msk.bf16.gmra.mrb[84].mxu0 %vm7036_vm1, %v7074_v26  ;;  %v5105_v48 = vpop.f32.mrb[47].mxu1 }
 0x292   : > { %v7352_v34 = vadd.f32 %v5105_v48, %v5104_v19  ;;  %5598 = vmatprep.mubr.msk.bf16.mxu0 %vm7043_vm11, %v8976_v50  ;;  %v5993_v50 = vld [vmem:[%s8707_s5 + $0x70] ss:$8 sps:$4 sm:$0xff]  }
 0x296   : > { %v5107_v49 = vpop.f32.mrb[48].mxu1 }
 0x297   : > { %v5108_v23 = vpop.f32.mrb[49].mxu1 }
 0x298   : > { %v7357_v16 = vadd.f32 %v5108_v23, %v5107_v49  ;;  %v5110_v17 = vpop.f32.mrb[50].mxu1 }
 0x299   : > { %5599 = vmatmul.mubr.msk.bf16.gmra.mrb[88].mxu0 %vm7070_vm0, %v7107_v33  ;;  %v5111_v57 = vpop.f32.mrb[51].mxu1 }
 0x29a   : > { %v7368_v28 = vadd.f32 %v5111_v57, %v5110_v17  ;;  %5602 = vmatprep.mubr.msk.bf16.mxu0 %vm7077_vm13, %v7139_v21  ;;  %v5990_v21 = vld [vmem:[%s8707_s5 + $0x60] ss:$8 sps:$4 sm:$0xff]  }
 0x29b   : > { %3667 = vmatpush1.bf16.msra.mxu1 %v5990_v21 }
 0x29c   : > { %3668 = vmatprep.subr.bf16.mxu1 %v5995_v15 }
 0x29e   : > { %v5113_v42 = vpop.f32.mrb[52].mxu1 }
 0x29f   : > { %v5114_v10 = vpop.f32.mrb[53].mxu1  ;;  %3669 = vmatpush1.bf16.msra.mxu1 %v5993_v50 }
 0x2a0   : > { %v5115_v40 = vadd.f32 %v5114_v10, %v5113_v42  ;;  %v5116_v30 = vpop.f32.mrb[54].mxu1 }
 0x2a1   : > { %5603 = vmatmul.mubr.msk.bf16.gmra.mrb[92].mxu0 %vm7103_vm4, %v4878_v9  ;;  %v5117_v33 = vpop.f32.mrb[55].mxu1 }
 0x2a2   : > { %v5118_v38 = vadd.f32 %v5117_v33, %v5116_v30 }
 0x2a6   : > { %v5119_v14 = vpop.f32.mrb[56].mxu1 }
 0x2a7   : > { %v5120_v45 = vpop.f32.mrb[57].mxu1 }
 0x2a8   : > { %v7375_v31 = vadd.f32 %v5120_v45, %v5119_v14  ;;  %v5122_v63 = vpop.f32.mrb[58].mxu1 }
 0x2a9   : > { %v5123_v61 = vpop.f32.mrb[59].mxu1 }
 0x2aa   : > { %v7383_v59 = vadd.f32 %v5123_v61, %v5122_v63 }
 0x2ae   : > { %v5125_v24 = vpop.f32.mrb[60].mxu1 }
 0x2af   : > { %v5126_v35 = vpop.f32.mrb[61].mxu1 }
 0x2b0   : > { %v5127_v43 = vadd.f32 %v5126_v35, %v5125_v24  ;;  %v5128_v3 = vpop.f32.mrb[62].mxu1 }
 0x2b1   : > { %v5129_v13 = vpop.f32.mrb[63].mxu1 }
 0x2b2   : > { %v5130_v55 = vadd.f32 %v5129_v13, %v5128_v3  ;;  %v6209_v3 = vmov 0  }
 0x2b3   : > { %3686 = vmatprep.mubr.bf16.mxu1 %v6209_v3 }
 0x2b6   : > { %v5496_v58 = vpop.f32.mrb[64].mxu1 }
 0x2b7   : > { %v7386_v62 = vadd.f32 %v5496_v58, %v7323_v60  ;;  %v2175_v44 = vpop.f32.mrb[65].mxu1 }
 0x2b8   : > { %v7389_v19 = vadd.f32 %v7306_v12, %v2175_v44  ;;  %v5497_v48 = vpop.f32.mrb[66].mxu1 }
 0x2b9   : > { %v7398_v49 = vadd.f32 %v5497_v48, %v7328_v37  ;;  %v2178_v23 = vpop.f32.mrb[67].mxu1 }
 0x2ba   : > { %v7401_v60 = vadd.f32 %v7316_v32, %v2178_v23 }
 0x2bc   : > { %v5307_v12 = vpop.f32.mrb[96].mxu0 }
 0x2bd   : > { %v5308_v17 = vpop.f32.mrb[97].mxu0 }
 0x2be   : > { %v5309_v20 = vadd.f32 %v5308_v17, %v5307_v12  ;;  %v5310_v46 = vpop.f32.mrb[98].mxu0  ;;  %v5500_v26 = vpop.f32.mrb[68].mxu1 }
 0x2bf   : > { %v7403_v57 = vadd.f32 %v5500_v26, %v5103_v18  ;;  %v5311_v29 = vpop.f32.mrb[99].mxu0  ;;  %v2191_v0 = vpop.f32.mrb[69].mxu1 }
 0x2c0   : > { %v5312_v6 = vadd.f32 %v5311_v29, %v5310_v46  ;;  %v7406_v9 = vadd.f32 %v7333_v7, %v2191_v0  ;;  %v5501_v37 = vpop.f32.mrb[70].mxu1 }
 0x2c1   : > { %v7409_v42 = vadd.f32 %v5501_v37, %v7352_v34  ;;  %v2194_v32 = vpop.f32.mrb[71].mxu1 }
 0x2c2   : > { %v7412_v10 = vadd.f32 %v7344_v56, %v2194_v32 }
 0x2c4   : > { %v5313_v30 = vpop.f32.mrb[100].mxu0 }
 0x2c5   : > { %v5314_v33 = vpop.f32.mrb[101].mxu0 }
 0x2c6   : > { %v5315_v14 = vadd.f32 %v5314_v33, %v5313_v30  ;;  %v5316_v45 = vpop.f32.mrb[102].mxu0  ;;  %v5504_v18 = vpop.f32.mrb[72].mxu1 }
 0x2c7   : > { %v7414_v63 = vadd.f32 %v5504_v18, %v5115_v40  ;;  %v5317_v21 = vpop.f32.mrb[103].mxu0  ;;  %v2207_v2 = vpop.f32.mrb[73].mxu1 }
 0x2c8   : > { %v5318_v61 = vadd.f32 %v5317_v21, %v5316_v45  ;;  %v7417_v7 = vadd.f32 %v7357_v16, %v2207_v2  ;;  %v5505_v24 = vpop.f32.mrb[74].mxu1 }
 0x2c9   : > { %v7419_v34 = vadd.f32 %v5505_v24, %v5118_v38  ;;  %v2210_v35 = vpop.f32.mrb[75].mxu1 }
 0x2ca   : > { %v7423_v56 = vadd.f32 %v7368_v28, %v2210_v35 }
 0x2cc   : > { %v5319_v13 = vpop.f32.mrb[104].mxu0 }
 0x2cd   : > { %v5320_v58 = vpop.f32.mrb[105].mxu0 }
 0x2ce   : > { %v5321_v40 = vadd.f32 %v5320_v58, %v5319_v13  ;;  %v5322_v44 = vpop.f32.mrb[106].mxu0  ;;  %v5508_v48 = vpop.f32.mrb[76].mxu1 }
 0x2cf   : > { %v7425_v50 = vadd.f32 %v5508_v48, %v5127_v43  ;;  %v5323_v15 = vpop.f32.mrb[107].mxu0  ;;  %v2223_v16 = vpop.f32.mrb[77].mxu1 }
 0x2d0   : > { %v5324_v23 = vadd.f32 %v5323_v15, %v5322_v44  ;;  %v7428_v38 = vadd.f32 %v7375_v31, %v2223_v16  ;;  %v5509_v12 = vpop.f32.mrb[78].mxu1 }
 0x2d1   : > { %v7430_v17 = vadd.f32 %v5509_v12, %v5130_v55  ;;  %v2226_v46 = vpop.f32.mrb[79].mxu1 }
 0x2d2   : > { %v7433_v28 = vadd.f32 %v7383_v59, %v2226_v46 }
 0x2d4   : > { %v5325_v26 = vpop.f32.mrb[108].mxu0 }
 0x2d5   : > { %v5326_v29 = vpop.f32.mrb[109].mxu0 }
 0x2d6   : > { %v5327_v0 = vadd.f32 %v5326_v29, %v5325_v26  ;;  %v5328_v37 = vpop.f32.mrb[110].mxu0  ;;  %v5171_v32 = vpop.f32.mrb[80].mxu1 }
 0x2d7   : > { %v5329_v43 = vpop.f32.mrb[111].mxu0  ;;  %v5172_v30 = vpop.f32.mrb[81].mxu1 }
 0x2d8   : > { %v5330_v33 = vadd.f32 %v5329_v43, %v5328_v37  ;;  %v5173_v45 = vadd.f32 %v5172_v30, %v5171_v32  ;;  %v5174_v18 = vpop.f32.mrb[82].mxu1 }
 0x2d9   : > { %v5175_v21 = vpop.f32.mrb[83].mxu1 }
 0x2da   : > { %v5661_v31 = vadd.f32 %v5173_v45, %v7192_v11  ;;  %v5176_v2 = vadd.f32 %v5175_v21, %v5174_v18 }
 0x2dc   : > { %v5667_v55 = vadd.f32 %v5176_v2, %v7197_v51  ;;  %v5331_v24 = vpop.f32.mrb[112].mxu0  ;;  %v7437_v35 = vadd.f32 %v5661_v31, %v5309_v20 }
 0x2dd   : > { %v5332_v59 = vpop.f32.mrb[113].mxu0 }
 0x2de   : > { %v5333_v13 = vadd.f32 %v5332_v59, %v5331_v24  ;;  %v5334_v58 = vpop.f32.mrb[114].mxu0  ;;  %v5177_v44 = vpop.f32.mrb[84].mxu1  ;;  %v7439_v48 = vadd.f32 %v5667_v55, %v5312_v6 }
 0x2df   : > { %v5335_v15 = vpop.f32.mrb[115].mxu0  ;;  %v5178_v16 = vpop.f32.mrb[85].mxu1 }
 0x2e0   : > { %v5336_v12 = vadd.f32 %v5335_v15, %v5334_v58  ;;  %v5179_v46 = vadd.f32 %v5178_v16, %v5177_v44  ;;  %v5180_v26 = vpop.f32.mrb[86].mxu1 }
 0x2e1   : > { %v5181_v29 = vpop.f32.mrb[87].mxu1 }
 0x2e2   : > { %v5658_v11 = vadd.f32 %v5179_v46, %v7204_v25  ;;  %v5182_v37 = vadd.f32 %v5181_v29, %v5180_v26 }
 0x2e4   : > { %v5664_v51 = vadd.f32 %v5182_v37, %v7209_v1  ;;  %v5337_v32 = vpop.f32.mrb[116].mxu0  ;;  %v7443_v20 = vadd.f32 %v5658_v11, %v5315_v14 }
 0x2e5   : > { %v5338_v43 = vpop.f32.mrb[117].mxu0 }
 0x2e6   : > { %v5339_v30 = vadd.f32 %v5338_v43, %v5337_v32  ;;  %v5340_v45 = vpop.f32.mrb[118].mxu0  ;;  %v5183_v18 = vpop.f32.mrb[88].mxu1  ;;  %v7445_v6 = vadd.f32 %v5664_v51, %v5318_v61 }
 0x2e7   : > { %v5341_v21 = vpop.f32.mrb[119].mxu0  ;;  %v5184_v31 = vpop.f32.mrb[89].mxu1 }
 0x2e8   : > { %v5342_v2 = vadd.f32 %v5341_v21, %v5340_v45  ;;  %v5185_v55 = vadd.f32 %v5184_v31, %v5183_v18  ;;  %v5186_v24 = vpop.f32.mrb[90].mxu1 }
 0x2e9   : > { %v5187_v59 = vpop.f32.mrb[91].mxu1 }
 0x2ea   : > { %v5673_v25 = vadd.f32 %v5185_v55, %v7216_v53  ;;  %v5188_v58 = vadd.f32 %v5187_v59, %v5186_v24 }
 0x2ec   : > { %v5679_v1 = vadd.f32 %v5188_v58, %v7227_v47  ;;  %v5343_v44 = vpop.f32.mrb[120].mxu0  ;;  %v7449_v14 = vadd.f32 %v5673_v25, %v5321_v40 }
 0x2ed   : > { %v5344_v15 = vpop.f32.mrb[121].mxu0 }
 0x2ee   : > { %v5345_v16 = vadd.f32 %v5344_v15, %v5343_v44  ;;  %v5346_v46 = vpop.f32.mrb[122].mxu0  ;;  %v5189_v26 = vpop.f32.mrb[92].mxu1  ;;  %v7451_v61 = vadd.f32 %v5679_v1, %v5324_v23 }
 0x2ef   : > { %v5347_v29 = vpop.f32.mrb[123].mxu0  ;;  %v5190_v11 = vpop.f32.mrb[93].mxu1 }
 0x2f0   : > { %v5348_v37 = vadd.f32 %v5347_v29, %v5346_v46  ;;  %v5191_v51 = vadd.f32 %v5190_v11, %v5189_v26  ;;  %v5192_v32 = vpop.f32.mrb[94].mxu1 }
 0x2f1   : > { %v5193_v43 = vpop.f32.mrb[95].mxu1 }
 0x2f2   : > { %v5670_v53 = vadd.f32 %v5191_v51, %v7234_v8  ;;  %v5194_v45 = vadd.f32 %v5193_v43, %v5192_v32 }
 0x2f4   : > { %v5676_v47 = vadd.f32 %v5194_v45, %v7239_v36  ;;  %v5349_v18 = vpop.f32.mrb[124].mxu0  ;;  %v7455_v40 = vadd.f32 %v5670_v53, %v5327_v0 }
 0x2f5   : > { %v5350_v21 = vpop.f32.mrb[125].mxu0 }
 0x2f6   : > { %v5351_v31 = vadd.f32 %v5350_v21, %v5349_v18  ;;  %v5352_v55 = vpop.f32.mrb[126].mxu0  ;;  %v5195_v24 = vpop.f32.mrb[96].mxu1  ;;  %v7457_v23 = vadd.f32 %v5676_v47, %v5330_v33 }
 0x2f7   : > { %v5353_v59 = vpop.f32.mrb[127].mxu0  ;;  %v5196_v25 = vpop.f32.mrb[97].mxu1 }
 0x2f8   : > { %v5354_v58 = vadd.f32 %v5353_v59, %v5352_v55  ;;  %v5197_v1 = vadd.f32 %v5196_v25, %v5195_v24  ;;  %v5198_v44 = vpop.f32.mrb[98].mxu1 }
 0x2f9   : > { %v5199_v15 = vpop.f32.mrb[99].mxu1 }
 0x2fa   : > { %v5685_v8 = vadd.f32 %v5197_v1, %v7246_v39  ;;  %v5200_v46 = vadd.f32 %v5199_v15, %v5198_v44 }
 0x2fc   : > { %v5691_v36 = vadd.f32 %v5200_v46, %v7257_v27  ;;  %v5355_v26 = vpop.f32.mrb[128].mxu0  ;;  %v7461_v0 = vadd.f32 %v5685_v8, %v5333_v13 }
 0x2fd   : > { %v5356_v29 = vpop.f32.mrb[129].mxu0 }
 0x2fe   : > { %v5357_v11 = vadd.f32 %v5356_v29, %v5355_v26  ;;  %v5358_v51 = vpop.f32.mrb[130].mxu0  ;;  %v5201_v32 = vpop.f32.mrb[100].mxu1  ;;  %v7463_v33 = vadd.f32 %v5691_v36, %v5336_v12 }
 0x2ff   : > { %v5359_v43 = vpop.f32.mrb[131].mxu0  ;;  %v5202_v53 = vpop.f32.mrb[101].mxu1 }
 0x300   : > { %v5360_v45 = vadd.f32 %v5359_v43, %v5358_v51  ;;  %v5203_v47 = vadd.f32 %v5202_v53, %v5201_v32  ;;  %v5204_v18 = vpop.f32.mrb[102].mxu1 }
 0x301   : > { %v5205_v21 = vpop.f32.mrb[103].mxu1 }
 0x302   : > { %v5682_v39 = vadd.f32 %v5203_v47, %v7264_v54  ;;  %v5206_v55 = vadd.f32 %v5205_v21, %v5204_v18 }
 0x304   : > { %v5688_v27 = vadd.f32 %v5206_v55, %v7268_v5  ;;  %v5361_v24 = vpop.f32.mrb[132].mxu0  ;;  %v7467_v13 = vadd.f32 %v5682_v39, %v5339_v30 }
 0x305   : > { %v5362_v59 = vpop.f32.mrb[133].mxu0 }
 0x306   : > { %v5363_v25 = vadd.f32 %v5362_v59, %v5361_v24  ;;  %v5364_v1 = vpop.f32.mrb[134].mxu0  ;;  %v5207_v44 = vpop.f32.mrb[104].mxu1  ;;  %v7469_v12 = vadd.f32 %v5688_v27, %v5342_v2 }
 0x307   : > { %v5365_v15 = vpop.f32.mrb[135].mxu0  ;;  %v5208_v8 = vpop.f32.mrb[105].mxu1 }
 0x308   : > { %v5366_v46 = vadd.f32 %v5365_v15, %v5364_v1  ;;  %v5209_v36 = vadd.f32 %v5208_v8, %v5207_v44  ;;  %v5210_v26 = vpop.f32.mrb[106].mxu1 }
 0x309   : > { %v5211_v29 = vpop.f32.mrb[107].mxu1 }
 0x30a   : > { %v5697_v54 = vadd.f32 %v5209_v36, %v7276_v4  ;;  %v5212_v51 = vadd.f32 %v5211_v29, %v5210_v26 }
 0x30c   : > { %v5703_v5 = vadd.f32 %v5212_v51, %v7286_v22  ;;  %v5367_v32 = vpop.f32.mrb[136].mxu0  ;;  %v7473_v30 = vadd.f32 %v5697_v54, %v5345_v16 }
 0x30d   : > { %v5368_v43 = vpop.f32.mrb[137].mxu0 }
 0x30e   : > { %v5369_v53 = vadd.f32 %v5368_v43, %v5367_v32  ;;  %v5370_v47 = vpop.f32.mrb[138].mxu0  ;;  %v5213_v18 = vpop.f32.mrb[108].mxu1  ;;  %v7475_v2 = vadd.f32 %v5703_v5, %v5348_v37 }
 0x30f   : > { %v5371_v21 = vpop.f32.mrb[139].mxu0  ;;  %v5214_v39 = vpop.f32.mrb[109].mxu1 }
 0x310   : > { %v5372_v55 = vadd.f32 %v5371_v21, %v5370_v47  ;;  %v5215_v27 = vadd.f32 %v5214_v39, %v5213_v18  ;;  %v5216_v24 = vpop.f32.mrb[110].mxu1 }
 0x311   : > { %v5217_v59 = vpop.f32.mrb[111].mxu1 }
 0x312   : > { %v5694_v4 = vadd.f32 %v5215_v27, %v7294_v41  ;;  %v5218_v1 = vadd.f32 %v5217_v59, %v5216_v24 }
 0x314   : > { %v5700_v22 = vadd.f32 %v5218_v1, %v7298_v52  ;;  %v5373_v44 = vpop.f32.mrb[140].mxu0  ;;  %v7479_v16 = vadd.f32 %v5694_v4, %v5351_v31 }
 0x315   : > { %v5374_v15 = vpop.f32.mrb[141].mxu0 }
 0x316   : > { %v5375_v8 = vadd.f32 %v5374_v15, %v5373_v44  ;;  %v5376_v36 = vpop.f32.mrb[142].mxu0  ;;  %v5219_v26 = vpop.f32.mrb[112].mxu1  ;;  %v7481_v37 = vadd.f32 %v5700_v22, %v5354_v58 }
 0x317   : > { %v5377_v29 = vpop.f32.mrb[143].mxu0  ;;  %v5220_v54 = vpop.f32.mrb[113].mxu1 }
 0x318   : > { %v5378_v51 = vadd.f32 %v5377_v29, %v5376_v36  ;;  %v5221_v5 = vadd.f32 %v5220_v54, %v5219_v26  ;;  %v5222_v32 = vpop.f32.mrb[114].mxu1 }
 0x319   : > { %v5223_v43 = vpop.f32.mrb[115].mxu1 }
 0x31a   : > { %v2481_v41 = vadd.f32 %v5221_v5, %v7389_v19  ;;  %v5224_v47 = vadd.f32 %v5223_v43, %v5222_v32 }
 0x31c   : > { %v2484_v52 = vadd.f32 %v5224_v47, %v7401_v60  ;;  %v5379_v18 = vpop.f32.mrb[144].mxu0  ;;  %v7485_v31 = vadd.f32 %v5357_v11, %v2481_v41 }
 0x31d   : > { %v5380_v21 = vpop.f32.mrb[145].mxu0 }
 0x31e   : > { %v7487_v39 = vadd.f32 %v5380_v21, %v5379_v18  ;;  %v5382_v27 = vpop.f32.mrb[146].mxu0  ;;  %v5225_v58 = vpop.f32.mrb[116].mxu1  ;;  %v7489_v24 = vadd.f32 %v5360_v45, %v2484_v52 }
 0x31f   : > { %v5383_v59 = vpop.f32.mrb[147].mxu0  ;;  %v5226_v4 = vpop.f32.mrb[117].mxu1 }
 0x320   : > { %v7491_v1 = vadd.f32 %v5383_v59, %v5382_v27  ;;  %v5227_v22 = vadd.f32 %v5226_v4, %v5225_v58  ;;  %v5228_v44 = vpop.f32.mrb[118].mxu1 }
 0x321   : > { %v5229_v19 = vpop.f32.mrb[119].mxu1 }
 0x322   : > { %v2489_v15 = vadd.f32 %v5227_v22, %v7386_v62  ;;  %v5230_v60 = vadd.f32 %v5229_v19, %v5228_v44 }
 0x324   : > { %v2492_v11 = vadd.f32 %v5230_v60, %v7398_v49  ;;  %v5385_v36 = vpop.f32.mrb[148].mxu0  ;;  %v7495_v26 = vadd.f32 %v5363_v25, %v2489_v15 }
 0x325   : > { %v5386_v29 = vpop.f32.mrb[149].mxu0 }
 0x326   : > { %v7497_v54 = vadd.f32 %v5386_v29, %v5385_v36  ;;  %v5388_v45 = vpop.f32.mrb[150].mxu0  ;;  %v5231_v5 = vpop.f32.mrb[120].mxu1  ;;  %v7499_v32 = vadd.f32 %v5366_v46, %v2492_v11 }
 0x327   : > { %v5389_v43 = vpop.f32.mrb[151].mxu0  ;;  %v5232_v41 = vpop.f32.mrb[121].mxu1 }
 0x328   : > { %v7501_v47 = vadd.f32 %v5389_v43, %v5388_v45  ;;  %v5233_v52 = vadd.f32 %v5232_v41, %v5231_v5  ;;  %v5234_v18 = vpop.f32.mrb[122].mxu1 }
 0x329   : > { %v5235_v62 = vpop.f32.mrb[123].mxu1 }
 0x32a   : > { %v2497_v21 = vadd.f32 %v5233_v52, %v7406_v9  ;;  %v5236_v49 = vadd.f32 %v5235_v62, %v5234_v18 }
 0x32c   : > { %v2500_v25 = vadd.f32 %v5236_v49, %v7412_v10  ;;  %v5391_v27 = vpop.f32.mrb[152].mxu0  ;;  %v7505_v58 = vadd.f32 %v5369_v53, %v2497_v21 }
 0x32d   : > { %v5392_v59 = vpop.f32.mrb[153].mxu0 }
 0x32e   : > { %v7507_v4 = vadd.f32 %v5392_v59, %v5391_v27  ;;  %v5394_v46 = vpop.f32.mrb[154].mxu0  ;;  %v5237_v22 = vpop.f32.mrb[124].mxu1  ;;  %v7509_v44 = vadd.f32 %v5372_v55, %v2500_v25 }
 0x32f   : > { %v5395_v19 = vpop.f32.mrb[155].mxu0  ;;  %v5238_v15 = vpop.f32.mrb[125].mxu1 }
 0x330   : > { %v7511_v60 = vadd.f32 %v5395_v19, %v5394_v46  ;;  %v5239_v11 = vadd.f32 %v5238_v15, %v5237_v22  ;;  %v5240_v36 = vpop.f32.mrb[126].mxu1  ;;  %v7528_v22 = vld [vmem:[%s8706_s4] ss:$0 sm:$0xff] }
 0x331   : > { %v5241_v9 = vpop.f32.mrb[127].mxu1 }
 0x332   : > { %v2505_v29 = vadd.f32 %v5239_v11, %v7403_v57  ;;  %v5242_v10 = vadd.f32 %v5241_v9, %v5240_v36 }
 0x334   : > { %v2508_v53 = vadd.f32 %v5242_v10, %v7409_v42  ;;  %v5397_v45 = vpop.f32.mrb[156].mxu0  ;;  %v7515_v5 = vadd.f32 %v5375_v8, %v2505_v29 }
 0x335   : > { %v5398_v43 = vpop.f32.mrb[157].mxu0 }
 0x336   : > { %v7517_v41 = vadd.f32 %v5398_v43, %v5397_v45  ;;  %v5400_v55 = vpop.f32.mrb[158].mxu0  ;;  %v5243_v52 = vpop.f32.mrb[128].mxu1  ;;  %v7519_v18 = vadd.f32 %v5378_v51, %v2508_v53 }
 0x337   : > { %v5401_v62 = vpop.f32.mrb[159].mxu0  ;;  %v5244_v21 = vpop.f32.mrb[129].mxu1 }
 0x338   : > { %v7521_v49 = vadd.f32 %v5401_v62, %v5400_v55  ;;  %v5245_v25 = vadd.f32 %v5244_v21, %v5243_v52  ;;  %v5246_v27 = vpop.f32.mrb[130].mxu1 }
 0x339   : > { %v5247_v57 = vpop.f32.mrb[131].mxu1 }
 0x33a   : > { %v2513_v59 = vadd.f32 %v5245_v25, %v7417_v7  ;;  %v5248_v42 = vadd.f32 %v5247_v57, %v5246_v27 }
 0x33c   : > { %v2516_v8 = vadd.f32 %v5248_v42, %v7423_v56  ;;  %v5576_v46 = vpop.f32.mrb[64].mxu0  ;;  %v7531_v51 = vadd.f32 %v7487_v39, %v2513_v59 }
 0x33d   : > { %v5660_v19 = vadd.f32 %v7443_v20, %v5576_v46  ;;  %v3300_v15 = vpop.f32.mrb[65].mxu0 }
 0x33e   : > { %v5663_v11 = vadd.f32 %v7437_v35, %v3300_v15  ;;  %v5577_v36 = vpop.f32.mrb[66].mxu0  ;;  %v5249_v9 = vpop.f32.mrb[132].mxu1  ;;  %v7536_v7 = vadd.f32 %v7491_v1, %v2516_v8 }
 0x33f   : > { %v3468_v56 = vadd.f32 %v5660_v19, %v7528_v22  ;;  %v5666_v29 = vadd.f32 %v7445_v6, %v5577_v36  ;;  %v3303_v10 = vpop.f32.mrb[67].mxu0  ;;  %v5250_v53 = vpop.f32.mrb[133].mxu1 }
 0x340   : > { %v3466_v45 = vadd.f32 %v5663_v11, %v7528_v22  ;;  %v5669_v39 = vadd.f32 %v7439_v48, %v3303_v10  ;;  %v5251_v43 = vadd.f32 %v5250_v53, %v5249_v9  ;;  %v5252_v20 = vpop.f32.mrb[134].mxu1 }
 0x341   : > { %v3469_v55 = vadd.f32 %v5666_v29, %v7528_v22  ;;  %v5253_v35 = vpop.f32.mrb[135].mxu1  ;;  %v3500_v21 = vmax.f32 %v3468_v56, 0.0 }
 0x342   : > { %v3467_v52 = vadd.f32 %v5669_v39, %v7528_v22  ;;  %v2521_v1 = vadd.f32 %v5251_v43, %v7414_v63  ;;  %v5254_v62 = vadd.f32 %v5253_v35, %v5252_v20  ;;  %v3498_v27 = vmax.f32 %v3466_v45, 0.0 }
 0x343   : > { %v3501_v25 = vmax.f32 %v3469_v55, 0.0 }
 0x344   : > { %v3499_v6 = vmax.f32 %v3467_v52, 0.0  ;;  %v2524_v57 = vadd.f32 %v5254_v62, %v7419_v34  ;;  %v5580_v59 = vpop.f32.mrb[68].mxu0  ;;  %v7547_v42 = vadd.f32 %v7497_v54, %v2521_v1 }
 0x345   : > { %v5672_v48 = vadd.f32 %v7455_v40, %v5580_v59  ;;  %v3316_v8 = vpop.f32.mrb[69].mxu0  ;;  %v3531_v46 = vpack.c.bf16 %v3501_v25, %v3500_v21 }
 0x346   : > { %v3530_v19 = vpack.c.bf16 %v3499_v6, %v3498_v27  ;;  %v5675_v15 = vadd.f32 %v7449_v14, %v3316_v8  ;;  %v5581_v11 = vpop.f32.mrb[70].mxu0  ;;  %v5255_v63 = vpop.f32.mrb[136].mxu1  ;;  %v7552_v36 = vadd.f32 %v7501_v47, %v2524_v57 }
 0x347   : > { %v3472_v9 = vadd.f32 %v5672_v48, %v7528_v22  ;;  %v5678_v34 = vadd.f32 %v7457_v23, %v5581_v11  ;;  %v3319_v56 = vpop.f32.mrb[71].mxu0  ;;  %v5256_v29 = vpop.f32.mrb[137].mxu1 }
 0x348   : > { %v3470_v54 = vadd.f32 %v5675_v15, %v7528_v22  ;;  %v5681_v40 = vadd.f32 %v7451_v61, %v3319_v56  ;;  %v5257_v10 = vadd.f32 %v5256_v29, %v5255_v63  ;;  %3687 = vmatmul.mubr.bf16.vlgmr.msra.gmra.mrb[144].mxu1 %v3530_v19  ;;  %v5258_v53 = vpop.f32.mrb[138].mxu1 }
 0x349   : > { %v3473_v14 = vadd.f32 %v5678_v34, %v7528_v22  ;;  %v5259_v45 = vpop.f32.mrb[139].mxu1  ;;  %3696 = vmatprep.mubr.bf16.mxu1 %v6209_v3  ;;  %v3504_v23 = vmax.f32 %v3472_v9, 0.0 }
 0x34a   : > { %v3471_v47 = vadd.f32 %v5681_v40, %v7528_v22  ;;  %v2529_v39 = vadd.f32 %v5257_v10, %v7428_v38  ;;  %v5260_v43 = vadd.f32 %v5259_v45, %v5258_v53  ;;  %v3502_v55 = vmax.f32 %v3470_v54, 0.0 }
 0x34b   : > { %v3505_v20 = vmax.f32 %v3473_v14, 0.0 }
 0x34c   : > { %v3503_v35 = vmax.f32 %v3471_v47, 0.0  ;;  %v2532_v52 = vadd.f32 %v5260_v43, %v7433_v28  ;;  %v5584_v61 = vpop.f32.mrb[72].mxu0  ;;  %v7564_v1 = vadd.f32 %v7507_v4, %v2529_v39 }
 0x34d   : > { %v5684_v62 = vadd.f32 %v7467_v13, %v5584_v61  ;;  %v3332_v21 = vpop.f32.mrb[73].mxu0  ;;  %v3533_v25 = vpack.c.bf16 %v3505_v20, %v3504_v23 }
 0x34e   : > { %v5687_v27 = vadd.f32 %v7461_v0, %v3332_v21  ;;  %v5585_v6 = vpop.f32.mrb[74].mxu0  ;;  %v5261_v57 = vpop.f32.mrb[140].mxu1  ;;  %v3532_v38 = vpack.c.bf16 %v3503_v35, %v3502_v55  ;;  %v7569_v59 = vadd.f32 %v7511_v60, %v2532_v52 }
 0x34f   : > { %v3476_v48 = vadd.f32 %v5684_v62, %v7528_v22  ;;  %v5690_v28 = vadd.f32 %v7469_v12, %v5585_v6  ;;  %v3335_v8 = vpop.f32.mrb[75].mxu0  ;;  %v5262_v19 = vpop.f32.mrb[141].mxu1 }
 0x350   : > { %v3474_v4 = vadd.f32 %v5687_v27, %v7528_v22  ;;  %v5693_v13 = vadd.f32 %v7463_v33, %v3335_v8  ;;  %v5263_v15 = vadd.f32 %v5262_v19, %v5261_v57  ;;  %3697 = vmatmul.mubr.bf16.gmra.mrb[148].mxu1 %v3531_v46  ;;  %v5264_v11 = vpop.f32.mrb[142].mxu1 }
 0x351   : > { %v3477_v0 = vadd.f32 %v5690_v28, %v7528_v22  ;;  %v5265_v63 = vpop.f32.mrb[143].mxu1  ;;  %3706 = vmatprep.mubr.bf16.mxu1 %v6209_v3  ;;  %v3508_v12 = vmax.f32 %v3476_v48, 0.0 }
 0x352   : > { %v3475_v60 = vadd.f32 %v5693_v13, %v7528_v22  ;;  %v2537_v9 = vadd.f32 %v5263_v15, %v7425_v50  ;;  %v5266_v34 = vadd.f32 %v5265_v63, %v5264_v11  ;;  %v3506_v29 = vmax.f32 %v3474_v4, 0.0 }
 0x353   : > { %v3509_v56 = vmax.f32 %v3477_v0, 0.0 }
 0x354   : > { %v3507_v54 = vmax.f32 %v3475_v60, 0.0  ;;  %v2540_v40 = vadd.f32 %v5266_v34, %v7430_v17  ;;  %v5588_v33 = vpop.f32.mrb[76].mxu0  ;;  %v7581_v46 = vadd.f32 %v7517_v41, %v2537_v9 }
 0x355   : > { %v5696_v10 = vadd.f32 %v7479_v16, %v5588_v33  ;;  %v3348_v53 = vpop.f32.mrb[77].mxu0  ;;  %v7584_v14 = vpack.c.bf16 %v3509_v56, %v3508_v12 }
 0x356   : > { %v5699_v45 = vadd.f32 %v7473_v30, %v3348_v53  ;;  %v5589_v47 = vpop.f32.mrb[78].mxu0  ;;  %v3534_v50 = vpack.c.bf16 %v3507_v54, %v3506_v29  ;;  %v7588_v39 = vadd.f32 %v7521_v49, %v2540_v40 }
 0x357   : > { %v3480_v43 = vadd.f32 %v5696_v10, %v7528_v22  ;;  %v5702_v17 = vadd.f32 %v7481_v37, %v5589_v47  ;;  %v3351_v23 = vpop.f32.mrb[79].mxu0 }
 0x358   : > { %v3478_v41 = vadd.f32 %v5699_v45, %v7528_v22  ;;  %v5705_v20 = vadd.f32 %v7475_v2, %v3351_v23  ;;  %3707 = vmatmul.mubr.bf16.gmra.mrb[152].mxu1 %v3532_v38 }
 0x359   : > { %v3481_v16 = vadd.f32 %v5702_v17, %v7528_v22  ;;  %3716 = vmatprep.mubr.bf16.mxu1 %v6209_v3  ;;  %v3512_v55 = vmax.f32 %v3480_v43, 0.0 }
 0x35a   : > { %v3479_v30 = vadd.f32 %v5705_v20, %v7528_v22  ;;  %v3510_v49 = vmax.f32 %v3478_v41, 0.0 }
 0x35b   : > { %v3513_v35 = vmax.f32 %v3481_v16, 0.0 }
 0x35c   : > { %v3511_v52 = vmax.f32 %v3479_v30, 0.0  ;;  %v5592_v61 = vpop.f32.mrb[80].mxu0 }
 0x35d   : > { %v5709_v62 = vadd.f32 %v7495_v26, %v5592_v61  ;;  %v3364_v37 = vpop.f32.mrb[81].mxu0  ;;  %v7598_v21 = vpack.c.bf16 %v3513_v35, %v3512_v55 }
 0x35e   : > { %v5713_v27 = vadd.f32 %v7485_v31, %v3364_v37  ;;  %v5593_v2 = vpop.f32.mrb[82].mxu0  ;;  %v7601_v6 = vpack.c.bf16 %v3511_v52, %v3510_v49 }
 0x35f   : > { %v3484_v57 = vadd.f32 %v5709_v62, %v7528_v22  ;;  %v5717_v38 = vadd.f32 %v7499_v32, %v5593_v2  ;;  %v3367_v48 = vpop.f32.mrb[83].mxu0 }
 0x360   : > { %v3482_v28 = vadd.f32 %v5713_v27, %v7528_v22  ;;  %v5721_v8 = vadd.f32 %v7489_v24, %v3367_v48  ;;  %3717 = vmatmul.mubr.bf16.gmra.mrb[156].mxu1 %v3533_v25 }
 0x361   : > { %v3485_v26 = vadd.f32 %v5717_v38, %v7528_v22  ;;  %3726 = vmatprep.mubr.bf16.mxu1 %v6209_v3  ;;  %v3516_v31 = vmax.f32 %v3484_v57, 0.0 }
 0x362   : > { %v3483_v19 = vadd.f32 %v5721_v8, %v7528_v22  ;;  %v3514_v13 = vmax.f32 %v3482_v28, 0.0 }
 0x363   : > { %v3517_v4 = vmax.f32 %v3485_v26, 0.0 }
 0x364   : > { %v3515_v15 = vmax.f32 %v3483_v19, 0.0  ;;  %v5596_v11 = vpop.f32.mrb[84].mxu0 }
 0x365   : > { %v5725_v0 = vadd.f32 %v7515_v5, %v5596_v11  ;;  %v3380_v32 = vpop.f32.mrb[85].mxu0  ;;  %v3539_v63 = vpack.c.bf16 %v3517_v4, %v3516_v31  ;;  %v3943_v11 = vld [vmem:[%s8709_s7 + $0x98] sm:$0xff] }
 0x366   : > { %v5729_v60 = vadd.f32 %v7505_v58, %v3380_v32  ;;  %v5597_v9 = vpop.f32.mrb[86].mxu0  ;;  %v3538_v24 = vpack.c.bf16 %v3515_v15, %v3514_v13  ;;  %v3942_v15 = vld [vmem:[%s8709_s7 + $0x90] sm:$0xff] }
 0x367   : > { %v3488_v25 = vadd.f32 %v5725_v0, %v7528_v22  ;;  %v5733_v34 = vadd.f32 %v7519_v18, %v5597_v9  ;;  %v3383_v12 = vpop.f32.mrb[87].mxu0  ;;  %v3926_v0 = vld [vmem:[%s8709_s7 + $0x10] sm:$0xff]  ;;  %v5610_v32 = vpack.c.bf16 %v3943_v11, %v3942_v15  ;;  %v3944_v9 = vld [vmem:[%s8709_s7 + $0xa0] sm:$0xff] }
 0x368   : > { %v3486_v56 = vadd.f32 %v5729_v60, %v7528_v22  ;;  %v5737_v29 = vadd.f32 %v7509_v44, %v3383_v12  ;;  %3727 = vmatmul.mubr.bf16.gmra.mrb[160].mxu1 %v3534_v50  ;;  %v3929_v12 = vld [vmem:[%s8709_s7 + $0x28] sm:$0xff] }
 0x369   : > { %v3489_v54 = vadd.f32 %v5733_v34, %v7528_v22  ;;  %3736 = vmatprep.mubr.bf16.mxu1 %v6209_v3  ;;  %v3520_v40 = vmax.f32 %v3488_v25, 0.0  ;;  %v3928_v25 = vld [vmem:[%s8709_s7 + $0x20] sm:$0xff] }
 0x36a   : > { %v3487_v5 = vadd.f32 %v5737_v29, %v7528_v22  ;;  %v3518_v33 = vmax.f32 %v3486_v56, 0.0  ;;  %v5616_v56 = vpack.c.bf16 %v3929_v12, %v3928_v25  ;;  %v3946_v29 = vld [vmem:[%s8709_s7 + $0xb0] sm:$0xff] }
 0x36b   : > { %v3521_v58 = vmax.f32 %v3489_v54, 0.0  ;;  %v3947_v54 = vld [vmem:[%s8709_s7 + $0xb8] sm:$0xff] }
 0x36c   : > { %v3519_v10 = vmax.f32 %v3487_v5, 0.0  ;;  %v5600_v53 = vpop.f32.mrb[88].mxu0  ;;  %v3930_v5 = vld [vmem:[%s8709_s7 + $0x30] sm:$0xff] }
 0x36d   : > { %v5741_v45 = vadd.f32 %v7547_v42, %v5600_v53  ;;  %v3396_v18 = vpop.f32.mrb[89].mxu0  ;;  %v3541_v47 = vpack.c.bf16 %v3521_v58, %v3520_v40  ;;  %v5618_v40 = vpack.c.bf16 %v3947_v54, %v3946_v29  ;;  %v3931_v58 = vld [vmem:[%s8709_s7 + $0x38] sm:$0xff]  ;;  %v3949_v53 = vld [vmem:[%s8709_s7 + $0xc8] sm:$0xff] }
 0x36e   : > { %v5745_v43 = vadd.f32 %v7531_v51, %v3396_v18  ;;  %v5601_v17 = vpop.f32.mrb[90].mxu0  ;;  %v3540_v44 = vpack.c.bf16 %v3519_v10, %v3518_v33  ;;  %v5620_v33 = vpack.c.bf16 %v3931_v58, %v3930_v5  ;;  %v3948_v10 = vld [vmem:[%s8709_s7 + $0xc0] sm:$0xff] }
 0x36f   : > { %v3492_v50 = vadd.f32 %v5741_v45, %v7528_v22  ;;  %v5749_v23 = vadd.f32 %v7552_v36, %v5601_v17  ;;  %v3399_v41 = vpop.f32.mrb[91].mxu0  ;;  %v3932_v45 = vld [vmem:[%s8709_s7 + $0x40] sm:$0xff]  ;;  %v5622_v18 = vpack.c.bf16 %v3949_v53, %v3948_v10  ;;  %v3950_v17 = vld [vmem:[%s8709_s7 + $0xd0] sm:$0xff] }
 0x370   : > { %v3490_v20 = vadd.f32 %v5745_v43, %v7528_v22  ;;  %v5753_v16 = vadd.f32 %v7536_v7, %v3399_v41  ;;  %3737 = vmatmul.mubr.bf16.gmra.mrb[164].mxu1 %v7584_v14  ;;  %v3935_v41 = vld [vmem:[%s8709_s7 + $0x58] sm:$0xff] }
 0x371   : > { %v3493_v30 = vadd.f32 %v5749_v23, %v7528_v22  ;;  %3746 = vmatprep.mubr.bf16.mxu1 %v6209_v3  ;;  %v3524_v51 = vmax.f32 %v3492_v50, 0.0  ;;  %v3934_v50 = vld [vmem:[%s8709_s7 + $0x50] sm:$0xff] }
 0x372   : > { %v3491_v42 = vadd.f32 %v5753_v16, %v7528_v22  ;;  %v3522_v35 = vmax.f32 %v3490_v20, 0.0  ;;  %v5628_v20 = vpack.c.bf16 %v3935_v41, %v3934_v50 }
 0x373   : > { %v3525_v55 = vmax.f32 %v3493_v30, 0.0 }
 0x374   : > { %v3523_v49 = vmax.f32 %v3491_v42, 0.0  ;;  %v5604_v52 = vpop.f32.mrb[92].mxu0 }
 0x375   : > { %v5757_v36 = vadd.f32 %v7581_v46, %v5604_v52  ;;  %v3412_v61 = vpop.f32.mrb[93].mxu0  ;;  %v3543_v62 = vpack.c.bf16 %v3525_v55, %v3524_v51  ;;  %v3952_v55 = vld [vmem:[%s8709_s7 + $0xe0] sm:$0xff] }
 0x376   : > { %v5761_v37 = vadd.f32 %v7564_v1, %v3412_v61  ;;  %v5605_v7 = vpop.f32.mrb[94].mxu0  ;;  %v3542_v27 = vpack.c.bf16 %v3523_v49, %v3522_v35  ;;  %v3953_v35 = vld [vmem:[%s8709_s7 + $0xe8] sm:$0xff]  ;;  %v3936_v52 = vld [vmem:[%s8709_s7 + $0x60] sm:$0xff] }
 0x377   : > { %v3496_v14 = vadd.f32 %v5757_v36, %v7528_v22  ;;  %v5765_v2 = vadd.f32 %v7588_v39, %v5605_v7  ;;  %v3415_v57 = vpop.f32.mrb[95].mxu0  ;;  %v3941_v39 = vld [vmem:[%s8709_s7 + $0x88] sm:$0xff]  ;;  %v5630_v49 = vpack.c.bf16 %v3953_v35, %v3952_v55 }
 0x378   : > { %v3494_v38 = vadd.f32 %v5761_v37, %v7528_v22  ;;  %v5769_v48 = vadd.f32 %v7569_v59, %v3415_v57  ;;  %3747 = vmatmul.mubr.bf16.gmra.mrb[168].mxu1 %v7601_v6  ;;  %v3940_v59 = vld [vmem:[%s8709_s7 + $0x80] sm:$0xff]  ;;  %v3937_v36 = vld [vmem:[%s8709_s7 + $0x68] sm:$0xff] }
 0x379   : > { %v3497_v28 = vadd.f32 %v5765_v2, %v7528_v22  ;;  %3756 = vmatprep.mubr.bf16.mxu1 %v6209_v3  ;;  %v3528_v1 = vmax.f32 %v3496_v14, 0.0  ;;  %v5606_v6 = vpack.c.bf16 %v3941_v39, %v3940_v59  ;;  %v3955_v14 = vld [vmem:[%s8709_s7 + $0xf8] sm:$0xff] }
 0x37a   : > { %v3495_v46 = vadd.f32 %v5769_v48, %v7528_v22  ;;  %v3526_v26 = vmax.f32 %v3494_v38, 0.0  ;;  %v6006_v22 = vld [vmem:[#allocation2 + $0x10] sm:$0xff]  ;;  %v3939_v48 = vld [vmem:[%s8709_s7 + $0x78] sm:$0xff] }
 0x37b   : > { %v3529_v8 = vmax.f32 %v3497_v28, 0.0  ;;  %5607 = vmatprep.subr.bf16.mxu0 %v5606_v6  ;;  %v3938_v38 = vld [vmem:[%s8709_s7 + $0x70] sm:$0xff] }
 0x37c   : > { %v3527_v19 = vmax.f32 %v3495_v46, 0.0  ;;  %v5636_v28 = vpack.c.bf16 %v3939_v48, %v3938_v38  ;;  %v4029_v46 = vld [vmem:[%s8711_s9 + $0x8] sm:$0xff] }
 0x37d   : > { %v3545_v31 = vpack.c.bf16 %v3529_v8, %v3528_v1  ;;  %v4031_v1 = vld [vmem:[%s8711_s9 + $0x18] sm:$0xff]  ;;  %v4028_v8 = vld [vmem:[%s8711_s9] sm:$0xff] }
 0x37e   : > { %v3544_v4 = vpack.c.bf16 %v3527_v19, %v3526_v26  ;;  %v5638_v19 = vpack.c.bf16 %v4031_v1, %v4029_v46 }
 0x380   : > { %3757 = vmatmul.mubr.bf16.gmra.mrb[172].mxu1 %v7598_v21  ;;  %v3924_v21 = vld [vmem:[%s8709_s7] sm:$0xff]  ;;  %5639 = vmatprep.subr.bf16.mxu1 %v5638_v19 }
 0x381   : > { %3766 = vmatprep.mubr.bf16.mxu1 %v6209_v3 }
 0x388   : > { %3767 = vmatmul.mubr.bf16.gmra.mrb[176].mxu1 %v3538_v24  ;;  %v3945_v24 = vld [vmem:[%s8709_s7 + $0xa8] sm:$0xff] }
 0x389   : > { %3776 = vmatprep.mubr.bf16.mxu1 %v6209_v3  ;;  %v5614_v34 = vpack.c.bf16 %v3945_v24, %v3944_v9 }
 0x390   : > { %3777 = vmatmul.mubr.bf16.gmra.mrb[180].mxu1 %v3539_v63  ;;  %v3927_v63 = vld [vmem:[%s8709_s7 + $0x18] sm:$0xff] }
 0x391   : > { %3786 = vmatprep.mubr.bf16.mxu1 %v6209_v3  ;;  %v5612_v60 = vpack.c.bf16 %v3927_v63, %v3926_v0  ;;  %v3562_v0 = vld [vmem:[%s8708_s6] sm:$0x3] }
 0x398   : > { %3787 = vmatmul.mubr.bf16.gmra.mrb[184].mxu1 %v3540_v44  ;;  %v3951_v44 = vld [vmem:[%s8709_s7 + $0xd8] sm:$0xff] }
 0x399   : > { %3796 = vmatprep.mubr.bf16.mxu1 %v6209_v3  ;;  %v5626_v23 = vpack.c.bf16 %v3951_v44, %v3950_v17 }
 0x3a0   : > { %3797 = vmatmul.mubr.bf16.gmra.mrb[188].mxu1 %v3541_v47  ;;  %v3933_v47 = vld [vmem:[%s8709_s7 + $0x48] sm:$0xff] }
 0x3a1   : > { %3806 = vmatprep.mubr.bf16.mxu1 %v6209_v3  ;;  %v5624_v43 = vpack.c.bf16 %v3933_v47, %v3932_v45 }
 0x3a8   : > { %3807 = vmatmul.mubr.bf16.gmra.mrb[192].mxu1 %v3542_v27  ;;  %v3954_v27 = vld [vmem:[%s8709_s7 + $0xf0] sm:$0xff] }
 0x3a9   : > { %3816 = vmatprep.mubr.bf16.mxu1 %v6209_v3  ;;  %v5634_v57 = vpack.c.bf16 %v3955_v14, %v3954_v27 }
 0x3b0   : > { %3817 = vmatmul.mubr.bf16.gmra.mrb[196].mxu1 %v3543_v62  ;;  %v5632_v62 = vpack.c.bf16 %v3937_v36, %v3936_v52 }
 0x3b1   : > { %3826 = vmatprep.mubr.bf16.mxu1 %v6209_v3 }
 0x3b8   : > { %3827 = vmatmul.mubr.bf16.gmra.mrb[200].mxu1 %v3544_v4 }
 0x3b9   : > { %3836 = vmatprep.mubr.bf16.mxu1 %v6209_v3  ;;  %v3925_v3 = vld [vmem:[%s8709_s7 + $0x8] sm:$0xff] }
 0x3ba   : > { %v5608_v13 = vpack.c.bf16 %v3925_v3, %v3924_v21 }
 0x3bc   : > { %5609 = vmatpush3.bf16.msra.mxu0 %v5608_v13  ;;  %v8980_v13 = vld [vmem:[#allocation15_spill] sm:$0xff] }
 0x3bd   : > { %5611 = vmatprep.subr.bf16.mxu0 %v5610_v32  ;;  %v7757_v15 = vsub.s32 0, %v8980_v13  ;;  %v8789_v32 = vsub.s32 1, %v8980_v13 }
 0x3bf   : > { %v7764_v63 = vrot.slane %v3562_v0, %v7757_v15 }
 0x3c0   : > { %3837 = vmatmul.mubr.bf16.gmra.mrb[204].mxu1 %v3545_v31  ;;  %5613 = vmatpush3.bf16.msra.mxu0 %v5612_v60  ;;  %v4030_v31 = vld [vmem:[%s8711_s9 + $0x10] sm:$0xff]  ;;  %v7768_v60 = vrot.slane %v3562_v0, %v8789_v32 }
 0x3c1   : > { %4112 = vmatprep.mubr.f32.mxu1 %v6006_v22  ;;  %5615 = vmatprep.subr.bf16.mxu0 %v5614_v34  ;;  %v5640_v22 = vpack.c.bf16 %v4030_v31, %v4028_v8 }
 0x3c3   : > { %5641 = vmatpush1.bf16.msra.mxu1 %v5640_v22 }
 0x3c4   : > { %5617 = vmatpush3.bf16.msra.mxu0 %v5616_v56 }
 0x3c5   : > { %5619 = vmatprep.subr.bf16.mxu0 %v5618_v40 }
 0x3c8   : > { %5621 = vmatpush3.bf16.msra.mxu0 %v5620_v33 }
 0x3c9   : > { %5623 = vmatprep.subr.bf16.mxu0 %v5622_v18 }
 0x3cc   : > { %5625 = vmatpush3.bf16.msra.mxu0 %v5624_v43 }
 0x3cd   : > { %5627 = vmatprep.subr.bf16.mxu0 %v5626_v23 }
 0x3d0   : > { %5629 = vmatpush3.bf16.msra.mxu0 %v5628_v20 }
 0x3d1   : > { %5631 = vmatprep.subr.bf16.mxu0 %v5630_v49 }
 0x3d4   : > { %5633 = vmatpush3.bf16.msra.mxu0 %v5632_v62 }
 0x3d5   : > { %5635 = vmatprep.subr.bf16.mxu0 %v5634_v57 }
 0x3d8   : > { %5637 = vmatpush3.bf16.msra.mxu0 %v5636_v28 }
 0x41b   : > { %v3688_v16 = vpop.f32.mrb[144].mxu1 }
 0x41c   : > { %v3690_v30 = vpop.f32.mrb[145].mxu1  ;;  %v7777_v56 = vadd.f32 %v3688_v16, %v7764_v63 }
 0x41d   : > { %v3692_v42 = vpop.f32.mrb[146].mxu1  ;;  %v7783_v5 = vadd.f32 %v3690_v30, %v7768_v60 }
 0x41e   : > { %v3694_v51 = vpop.f32.mrb[147].mxu1  ;;  %v7771_v24 = vadd.f32 %v3692_v42, %v7764_v63 }
 0x41f   : > { %v7774_v34 = vadd.f32 %v3694_v51, %v7768_v60 }
 0x420   : > { %v3847_v58 = vadd.f32 %v7771_v24, %v7777_v56 }
 0x421   : > { %v3884_v33 = vadd.f32 %v7774_v34, %v7783_v5 }
 0x423   : > { %v3698_v61 = vpop.f32.mrb[148].mxu1 }
 0x424   : > { %v3700_v37 = vpop.f32.mrb[149].mxu1  ;;  %v7780_v29 = vadd.f32 %v3698_v61, %v7764_v63 }
 0x425   : > { %v3702_v7 = vpop.f32.mrb[150].mxu1  ;;  %v7786_v40 = vadd.f32 %v3700_v37, %v7768_v60 }
 0x426   : > { %v3704_v2 = vpop.f32.mrb[151].mxu1  ;;  %v3848_v10 = vadd.f32 %v3847_v58, %v7780_v29  ;;  %v7794_v53 = vadd.f32 %v3702_v7, %v7764_v63 }
 0x427   : > { %v3885_v45 = vadd.f32 %v3884_v33, %v7786_v40  ;;  %v7798_v18 = vadd.f32 %v3704_v2, %v7768_v60 }
 0x428   : > { %v3849_v23 = vadd.f32 %v3848_v10, %v7794_v53 }
 0x429   : > { %v3886_v20 = vadd.f32 %v3885_v45, %v7798_v18 }
 0x42b   : > { %v3708_v26 = vpop.f32.mrb[152].mxu1 }
 0x42c   : > { %v3710_v4 = vpop.f32.mrb[153].mxu1  ;;  %v7801_v43 = vadd.f32 %v3708_v26, %v7764_v63 }
 0x42d   : > { %v3712_v59 = vpop.f32.mrb[154].mxu1  ;;  %v7804_v44 = vadd.f32 %v3710_v4, %v7768_v60 }
 0x42e   : > { %v3714_v39 = vpop.f32.mrb[155].mxu1  ;;  %v3850_v16 = vadd.f32 %v3849_v23, %v7801_v43  ;;  %v7810_v30 = vadd.f32 %v3712_v59, %v7764_v63 }
 0x42f   : > { %v3887_v42 = vadd.f32 %v3886_v20, %v7804_v44  ;;  %v7814_v51 = vadd.f32 %v3714_v39, %v7768_v60 }
 0x430   : > { %v3851_v52 = vadd.f32 %v3850_v16, %v7810_v30 }
 0x431   : > { %v3888_v61 = vadd.f32 %v3887_v42, %v7814_v51 }
 0x433   : > { %v3718_v21 = vpop.f32.mrb[156].mxu1 }
 0x434   : > { %v3720_v6 = vpop.f32.mrb[157].mxu1  ;;  %v7817_v55 = vadd.f32 %v3718_v21, %v7764_v63 }
 0x435   : > { %v3722_v3 = vpop.f32.mrb[158].mxu1  ;;  %v7820_v35 = vadd.f32 %v3720_v6, %v7768_v60 }
 0x436   : > { %v3724_v11 = vpop.f32.mrb[159].mxu1  ;;  %v3852_v37 = vadd.f32 %v3851_v52, %v7817_v55  ;;  %v7826_v7 = vadd.f32 %v3722_v3, %v7764_v63 }
 0x437   : > { %v3889_v14 = vadd.f32 %v3888_v61, %v7820_v35  ;;  %v7830_v2 = vadd.f32 %v3724_v11, %v7768_v60 }
 0x438   : > { %v3853_v48 = vadd.f32 %v3852_v37, %v7826_v7 }
 0x439   : > { %v3890_v28 = vadd.f32 %v3889_v14, %v7830_v2 }
 0x43b   : > { %v3728_v9 = vpop.f32.mrb[160].mxu1 }
 0x43c   : > { %v3730_v25 = vpop.f32.mrb[161].mxu1  ;;  %v7833_v57 = vadd.f32 %v3728_v9, %v7764_v63 }
 0x43d   : > { %v3732_v12 = vpop.f32.mrb[162].mxu1  ;;  %v7836_v38 = vadd.f32 %v3730_v25, %v7768_v60 }
 0x43e   : > { %v3734_v54 = vpop.f32.mrb[163].mxu1  ;;  %v3854_v1 = vadd.f32 %v3853_v48, %v7833_v57  ;;  %v7842_v8 = vadd.f32 %v3732_v12, %v7764_v63 }
 0x43f   : > { %v3891_v19 = vadd.f32 %v3890_v28, %v7836_v38  ;;  %v7846_v31 = vadd.f32 %v3734_v54, %v7768_v60 }
 0x440   : > { %v3855_v21 = vadd.f32 %v3854_v1, %v7842_v8 }
 0x441   : > { %8981 = vst [vmem:[#allocation31_spill] sm:$0xff] %v7846_v31  ;;  %v3892_v6 = vadd.f32 %v3891_v19, %v7846_v31 }
 0x443   : > { %v3738_v47 = vpop.f32.mrb[164].mxu1 }
 0x444   : > { %v3740_v17 = vpop.f32.mrb[165].mxu1  ;;  %v7849_v22 = vadd.f32 %v3738_v47, %v7764_v63 }
 0x445   : > { %v3742_v50 = vpop.f32.mrb[166].mxu1  ;;  %v7852_v39 = vadd.f32 %v3740_v17, %v7768_v60 }
 0x446   : > { %v3744_v41 = vpop.f32.mrb[167].mxu1  ;;  %v3856_v3 = vadd.f32 %v3855_v21, %v7849_v22  ;;  %v7858_v11 = vadd.f32 %v3742_v50, %v7764_v63 }
 0x447   : > { %8982 = vst [vmem:[#allocation27_spill] sm:$0xff] %v7852_v39  ;;  %v3893_v0 = vadd.f32 %v3892_v6, %v7852_v39  ;;  %v7862_v9 = vadd.f32 %v3744_v41, %v7768_v60 }
 0x448   : > { %v3857_v10 = vadd.f32 %v3856_v3, %v7858_v11 }
 0x449   : > { %8983 = vst [vmem:[#allocation32_spill] sm:$0xff] %v7862_v9  ;;  %v3894_v47 = vadd.f32 %v3893_v0, %v7862_v9 }
 0x44b   : > { %v3748_v49 = vpop.f32.mrb[168].mxu1 }
 0x44c   : > { %v3750_v36 = vpop.f32.mrb[169].mxu1  ;;  %v7865_v12 = vadd.f32 %v3748_v49, %v7764_v63 }
 0x44d   : > { %v3752_v62 = vpop.f32.mrb[170].mxu1  ;;  %v7868_v58 = vadd.f32 %v3750_v36, %v7768_v60 }
 0x44e   : > { %v3754_v27 = vpop.f32.mrb[171].mxu1  ;;  %v3858_v17 = vadd.f32 %v3857_v10, %v7865_v12  ;;  %v7874_v50 = vadd.f32 %v3752_v62, %v7764_v63 }
 0x44f   : > { %8984 = vst [vmem:[#allocation24_spill] sm:$0xff] %v7868_v58  ;;  %v3895_v23 = vadd.f32 %v3894_v47, %v7868_v58  ;;  %v7878_v41 = vadd.f32 %v3754_v27, %v7768_v60 }
 0x450   : > { %v3859_v49 = vadd.f32 %v3858_v17, %v7874_v50 }
 0x451   : > { %8985 = vst [vmem:[#allocation35_spill] sm:$0xff] %v7878_v41  ;;  %v3896_v36 = vadd.f32 %v3895_v23, %v7878_v41 }
 0x453   : > { %v3758_v46 = vpop.f32.mrb[172].mxu1 }
 0x454   : > { %v3760_v26 = vpop.f32.mrb[173].mxu1  ;;  %v7881_v20 = vadd.f32 %v3758_v46, %v7764_v63 }
 0x455   : > { %v3762_v4 = vpop.f32.mrb[174].mxu1  ;;  %v7884_v16 = vadd.f32 %v3760_v26, %v7768_v60 }
 0x456   : > { %v3764_v59 = vpop.f32.mrb[175].mxu1  ;;  %v3860_v62 = vadd.f32 %v3859_v49, %v7881_v20  ;;  %v7890_v37 = vadd.f32 %v3762_v4, %v7764_v63 }
 0x457   : > { %8986 = vst [vmem:[#allocation30_spill] sm:$0xff] %v7884_v16  ;;  %v3897_v14 = vadd.f32 %v3896_v36, %v7884_v16  ;;  %v7894_v48 = vadd.f32 %v3764_v59, %v7768_v60 }
 0x458   : > { %v3861_v1 = vadd.f32 %v3860_v62, %v7890_v37 }
 0x459   : > { %8987 = vst [vmem:[#allocation36_spill] sm:$0xff] %v7894_v48  ;;  %v3898_v26 = vadd.f32 %v3897_v14, %v7894_v48 }
 0x45b   : > { %v3768_v25 = vpop.f32.mrb[176].mxu1 }
 0x45c   : > { %v3770_v54 = vpop.f32.mrb[177].mxu1  ;;  %v7897_v28 = vadd.f32 %v3768_v25, %v7764_v63 }
 0x45d   : > { %v3772_v33 = vpop.f32.mrb[178].mxu1  ;;  %v7900_v46 = vadd.f32 %v3770_v54, %v7768_v60 }
 0x45e   : > { %v3774_v45 = vpop.f32.mrb[179].mxu1  ;;  %v3862_v4 = vadd.f32 %v3861_v1, %v7897_v28  ;;  %v7906_v21 = vadd.f32 %v3772_v33, %v7764_v63 }
 0x45f   : > { %8988 = vst [vmem:[#allocation25_spill] sm:$0xff] %v7900_v46  ;;  %v3899_v59 = vadd.f32 %v3898_v26, %v7900_v46  ;;  %v7910_v3 = vadd.f32 %v3774_v45, %v7768_v60 }
 0x460   : > { %v3863_v47 = vadd.f32 %v3862_v4, %v7906_v21 }
 0x461   : > { %8989 = vst [vmem:[#allocation41_spill] sm:$0xff] %v7910_v3  ;;  %v3900_v17 = vadd.f32 %v3899_v59, %v7910_v3 }
 0x463   : > { %v3778_v42 = vpop.f32.mrb[180].mxu1 }
 0x464   : > { %v3780_v52 = vpop.f32.mrb[181].mxu1  ;;  %v7913_v25 = vadd.f32 %v3778_v42, %v7764_v63 }
 0x465   : > { %v3782_v61 = vpop.f32.mrb[182].mxu1  ;;  %v7916_v10 = vadd.f32 %v3780_v52, %v7768_v60 }
 0x466   : > { %v3784_v27 = vpop.f32.mrb[183].mxu1  ;;  %v3864_v33 = vadd.f32 %v3863_v47, %v7913_v25  ;;  %v7922_v23 = vadd.f32 %v3782_v61, %v7764_v63 }
 0x467   : > { %8990 = vst [vmem:[#allocation34_spill] sm:$0xff] %v7916_v10  ;;  %v3901_v45 = vadd.f32 %v3900_v17, %v7916_v10  ;;  %v7926_v49 = vadd.f32 %v3784_v27, %v7768_v60 }
 0x468   : > { %v3865_v1 = vadd.f32 %v3864_v33, %v7922_v23 }
 0x469   : > { %8991 = vst [vmem:[#allocation40_spill] sm:$0xff] %v7926_v49  ;;  %v3902_v61 = vadd.f32 %v3901_v45, %v7926_v49 }
 0x46b   : > { %v3788_v19 = vpop.f32.mrb[184].mxu1 }
 0x46c   : > { %v3790_v6 = vpop.f32.mrb[185].mxu1  ;;  %v7929_v36 = vadd.f32 %v3788_v19, %v7764_v63 }
 0x46d   : > { %v3792_v0 = vpop.f32.mrb[186].mxu1  ;;  %v7932_v62 = vadd.f32 %v3790_v6, %v7768_v60 }
 0x46e   : > { %v3794_v54 = vpop.f32.mrb[187].mxu1  ;;  %v3866_v4 = vadd.f32 %v3865_v1, %v7929_v36  ;;  %v7938_v59 = vadd.f32 %v3792_v0, %v7764_v63 }
 0x46f   : > { %8992 = vst [vmem:[#allocation16_spill] sm:$0xff] %v7932_v62  ;;  %v3903_v27 = vadd.f32 %v3902_v61, %v7932_v62  ;;  %v7942_v19 = vadd.f32 %v3794_v54, %v7768_v60 }
 0x470   : > { %v3867_v33 = vadd.f32 %v3866_v4, %v7938_v59 }
 0x471   : > { %8993 = vst [vmem:[#allocation17_spill] sm:$0xff] %v7942_v19  ;;  %v3904_v1 = vadd.f32 %v3903_v27, %v7942_v19 }
 0x473   : > { %v3798_v42 = vpop.f32.mrb[188].mxu1 }
 0x474   : > { %v3800_v52 = vpop.f32.mrb[189].mxu1  ;;  %v7945_v47 = vadd.f32 %v3798_v42, %v7764_v63 }
 0x475   : > { %v3802_v14 = vpop.f32.mrb[190].mxu1  ;;  %v7948_v6 = vadd.f32 %v3800_v52, %v7768_v60 }
 0x476   : > { %v3804_v26 = vpop.f32.mrb[191].mxu1  ;;  %v3868_v0 = vadd.f32 %v3867_v33, %v7945_v47  ;;  %v7954_v61 = vadd.f32 %v3802_v14, %v7764_v63 }
 0x477   : > { %8994 = vst [vmem:[#allocation18_spill] sm:$0xff] %v7948_v6  ;;  %v3905_v62 = vadd.f32 %v3904_v1, %v7948_v6  ;;  %v7958_v42 = vadd.f32 %v3804_v26, %v7768_v60 }
 0x478   : > { %v3869_v27 = vadd.f32 %v3868_v0, %v7954_v61 }
 0x479   : > { %8995 = vst [vmem:[#allocation19_spill] sm:$0xff] %v7958_v42  ;;  %v3906_v19 = vadd.f32 %v3905_v62, %v7958_v42 }
 0x47b   : > { %v3808_v17 = vpop.f32.mrb[192].mxu1 }
 0x47c   : > { %v3810_v45 = vpop.f32.mrb[193].mxu1  ;;  %v7961_v52 = vadd.f32 %v3808_v17, %v7764_v63 }
 0x47d   : > { %v3812_v32 = vpop.f32.mrb[194].mxu1  ;;  %v7964_v4 = vadd.f32 %v3810_v45, %v7768_v60 }
 0x47e   : > { %v3814_v54 = vpop.f32.mrb[195].mxu1  ;;  %v3870_v14 = vadd.f32 %v3869_v27, %v7961_v52  ;;  %v7970_v49 = vadd.f32 %v3812_v32, %v7764_v63 }
 0x47f   : > { %8996 = vst [vmem:[#allocation20_spill] sm:$0xff] %v7964_v4  ;;  %v3907_v26 = vadd.f32 %v3906_v19, %v7964_v4  ;;  %v7974_v6 = vadd.f32 %v3814_v54, %v7768_v60 }
 0x480   : > { %v3871_v62 = vadd.f32 %v3870_v14, %v7970_v49 }
 0x481   : > { %8997 = vst [vmem:[#allocation21_spill] sm:$0xff] %v7974_v6  ;;  %v3908_v27 = vadd.f32 %v3907_v26, %v7974_v6 }
 0x483   : > { %v3818_v33 = vpop.f32.mrb[196].mxu1 }
 0x484   : > { %v3820_v1 = vpop.f32.mrb[197].mxu1  ;;  %v7977_v45 = vadd.f32 %v3818_v33, %v7764_v63 }
 0x485   : > { %v3822_v17 = vpop.f32.mrb[198].mxu1  ;;  %v7980_v0 = vadd.f32 %v3820_v1, %v7768_v60 }
 0x486   : > { %v3824_v10 = vpop.f32.mrb[199].mxu1  ;;  %v3872_v32 = vadd.f32 %v3871_v62, %v7977_v45  ;;  %v7986_v42 = vadd.f32 %v3822_v17, %v7764_v63 }
 0x487   : > { %8998 = vst [vmem:[#allocation22_spill] sm:$0xff] %v7980_v0  ;;  %v3909_v19 = vadd.f32 %v3908_v27, %v7980_v0  ;;  %v7990_v54 = vadd.f32 %v3824_v10, %v7768_v60 }
 0x488   : > { %v3873_v26 = vadd.f32 %v3872_v32, %v7986_v42 }
 0x489   : > { %8999 = vst [vmem:[#allocation29_spill] sm:$0xff] %v7990_v54  ;;  %v3910_v17 = vadd.f32 %v3909_v19, %v7990_v54 }
 0x48b   : > { %v3828_v33 = vpop.f32.mrb[200].mxu1 }
 0x48c   : > { %v7993_v4 = vadd.f32 %v3828_v33, %v7764_v63  ;;  %v3830_v1 = vpop.f32.mrb[201].mxu1 }
 0x48d   : > { %v7996_v3 = vadd.f32 %v3830_v1, %v7768_v60  ;;  %v3832_v14 = vpop.f32.mrb[202].mxu1 }
 0x48e   : > { %v3834_v62 = vpop.f32.mrb[203].mxu1  ;;  %v3874_v6 = vadd.f32 %v3873_v26, %v7993_v4  ;;  %v8002_v27 = vadd.f32 %v3832_v14, %v7764_v63 }
 0x48f   : > { %9000 = vst [vmem:[#allocation23_spill] sm:$0xff] %v7996_v3  ;;  %v3911_v10 = vadd.f32 %v3910_v17, %v7996_v3  ;;  %v8006_v33 = vadd.f32 %v3834_v62, %v7768_v60 }
 0x490   : > { %v3875_v1 = vadd.f32 %v3874_v6, %v8002_v27 }
 0x491   : > { %9001 = vst [vmem:[#allocation26_spill] sm:$0xff] %v8006_v33  ;;  %v3912_v48 = vadd.f32 %v3911_v10, %v8006_v33 }
 0x493   : > { %v3838_v0 = vpop.f32.mrb[204].mxu1 }
 0x494   : > { %v8010_v46 = vadd.f32 %v3838_v0, %v7764_v63  ;;  %v3840_v32 = vpop.f32.mrb[205].mxu1 }
 0x495   : > { %v8014_v19 = vadd.f32 %v3840_v32, %v7768_v60  ;;  %v3842_v26 = vpop.f32.mrb[206].mxu1 }
 0x496   : > { %v3876_v14 = vadd.f32 %v3875_v1, %v8010_v46  ;;  %v8018_v17 = vadd.f32 %v3842_v26, %v7764_v63  ;;  %v3844_v62 = vpop.f32.mrb[207].mxu1 }
 0x497   : > { %9002 = vst [vmem:[#allocation28_spill] sm:$0xff] %v8014_v19  ;;  %v3913_v3 = vadd.f32 %v3912_v48, %v8014_v19  ;;  %v8022_v6 = vadd.f32 %v3844_v62, %v7768_v60 }
 0x498   : > { %v3877_v0 = vadd.f32 %v3876_v14, %v8018_v17 }
 0x499   : > { %v3914_v54 = vadd.f32 %v3913_v3, %v8022_v6  ;;  %v3956_v3 = vld [vmem:[%s8710_s8] sm:$0x1] }
 0x49a   : > { %v3878_v10 = vrot.slane %v3877_v0, 4 }
 0x49b   : > { %v3915_v33 = vrot.slane %v3914_v54, 4 }
 0x49c   : > { %v3879_v32 = vadd.f32 %v3878_v10, %v3877_v0 }
 0x49d   : > { %v3916_v16 = vadd.f32 %v3915_v33, %v3914_v54 }
 0x49e   : > { %v3880_v41 = vrot.slane %v3879_v32, 2 }
 0x49f   : > { %v3917_v58 = vrot.slane %v3916_v16, 2 }
 0x4a0   : > { %v3881_v1 = vadd.f32 %v3880_v41, %v3879_v32 }
 0x4a1   : > { %v3918_v9 = vadd.f32 %v3917_v58, %v3916_v16  ;;  %v4032_v58 = vld [vmem:[%s8712_s10] sm:$0x3] }
 0x4a2   : > { %v3882_v63 = vrot.slane %v3881_v1, 1 }
 0x4a3   : > { %v3919_v26 = vrot.slane %v3918_v9, 1 }
 0x4a4   : > { %v3883_v39 = vadd.f32 %v3882_v63, %v3881_v1 }
 0x4a5   : > { %v3920_v31 = vadd.f32 %v3919_v26, %v3918_v9 }
 0x4a6   : > { %v3922_v19 = vmul.f32 0.00390625, %v3883_v39  ;;  %v9003_v39 = vsub.s32 1, %v8980_v13 }
 0x4a7   : > { %v3923_v48 = vmul.f32 0.00390625, %v3920_v31  ;;  %v4037_v31 = vrot.slane %v4032_v58, %v7757_v15 }
 0x4a8   : > { %v4041_v9 = vrot.slane %v4032_v58, %v9003_v39 }
 0x4a9   : > { %4021 = vmatprep.mubr.f32.mxu0 %v3923_v48 }
 0x4aa   : > { %4022 = vmatmul.mubr.f32.vlgmr.msra.gmra.mrb[160].mxu0 %v3922_v19 }
 0x57d   : > { %v5459_v60 = vpop.f32.mrb[160].mxu0 }
 0x57e   : > { %v5460_v14 = vpop.f32.mrb[161].mxu0 }
 0x57f   : > { %v5461_v62 = vadd.f32 %v5460_v14, %v5459_v60 }
 0x581   : > { %v4024_v54 = vadd.f32 %v5461_v62, %v3956_v3 }
 0x583   : > { %v4027_v33 = vmax.f32 %v4024_v54, 0.0 }
 0x585   : > { %4897 = vmatmul.mubr.msk.f32.vlgmr.msra.gmra.mrb[208].mxu1 %vm4044_vm5, %v4027_v33 }
 0x658   : > { %v4114_v41 = vpop.f32.mrb[208].mxu1 }
 0x659   : > { %v4115_v16 = vadd.f32 %v4114_v41, %v4037_v31  ;;  %v4116_v19 = vpop.f32.mrb[209].mxu1  ;;  %v9007_v41 = vld [vmem:[#allocation24_spill] sm:$0xff] }
 0x65a   : > { %v4117_v0 = vadd.f32 %v4116_v19, %v4041_v9  ;;  %v9006_v9 = vld [vmem:[#allocation32_spill] sm:$0xff]  ;;  %v9009_v19 = vld [vmem:[#allocation30_spill] sm:$0xff] }
 0x65b   : > { %v4898_v10 = vmul.f32 -1.442695, %v4115_v16  ;;  %v9008_v16 = vld [vmem:[#allocation35_spill] sm:$0xff] }
 0x65c   : > { %v4899_v32 = vmul.f32 -1.442695, %v4117_v0 }
 0x65d   : > { %5996 = vpow2.f32 %v4898_v10  ;;  %v9010_v10 = vld [vmem:[#allocation36_spill] sm:$0xff] }
 0x65e   : > { %5998 = vpow2.f32 %v4899_v32 }
 0x667   : > { %v5997_v1 = vpop.eup %5996 }
 0x668   : > { %v5999_v63 = vpop.eup %5998  ;;  %v4125_v26 = vadd.f32 1.0, %v5997_v1  ;;  %v9011_v1 = vld [vmem:[#allocation25_spill] sm:$0xff] }
 0x669   : > { %v4126_v48 = vadd.f32 1.0, %v5999_v63 }
 0x66a   : > { %6000 = vrcp.f32 %v4125_v26  ;;  %v9012_v26 = vld [vmem:[#allocation41_spill] sm:$0xff] }
 0x66b   : > { %6002 = vrcp.f32 %v4126_v48 }
 0x674   : > { %v6001_v60 = vpop.eup %6000 }
 0x675   : > { %v6003_v3 = vpop.eup %6002  ;;  %v4134_v14 = vrot.slane %v6001_v60, %v7757_v15  ;;  %v9013_v60 = vld [vmem:[#allocation34_spill] sm:$0xff] }
 0x676   : > { %v8037_v13 = vrot.slane %v6003_v3, %v7757_v15 }
 0x677   : > { %v8040_v62 = vmul.f32 %v4134_v14, %v7777_v56  ;;  %v8043_v54 = vmul.f32 %v4134_v14, %v7771_v24  ;;  %v8046_v33 = vmul.f32 %v4134_v14, %v7780_v29  ;;  %v8049_v58 = vmul.f32 %v4134_v14, %v7794_v53 }
 0x678   : > { %v8052_v31 = vmul.f32 %v4134_v14, %v7801_v43  ;;  %v8055_v39 = vmul.f32 %v4134_v14, %v7810_v30  ;;  %v8058_v15 = vmul.f32 %v4134_v14, %v7817_v55  ;;  %v8061_v56 = vmul.f32 %v4134_v14, %v7826_v7 }
 0x679   : > { %v8064_v24 = vmul.f32 %v4134_v14, %v7833_v57  ;;  %v8067_v29 = vmul.f32 %v4134_v14, %v7842_v8  ;;  %v8070_v53 = vmul.f32 %v4134_v14, %v7849_v22  ;;  %v8073_v43 = vmul.f32 %v4134_v14, %v7858_v11 }
 0x67a   : > { %v8076_v30 = vmul.f32 %v4134_v14, %v7865_v12  ;;  %v8079_v55 = vmul.f32 %v4134_v14, %v7874_v50  ;;  %v8082_v7 = vmul.f32 %v4134_v14, %v7881_v20  ;;  %v8085_v57 = vmul.f32 %v4134_v14, %v7890_v37 }
 0x67b   : > { %v8088_v8 = vmul.f32 %v4134_v14, %v7897_v28  ;;  %v8091_v22 = vmul.f32 %v4134_v14, %v7906_v21  ;;  %v8094_v11 = vmul.f32 %v4134_v14, %v7913_v25  ;;  %v8097_v12 = vmul.f32 %v4134_v14, %v7922_v23 }
 0x67c   : > { %v8100_v50 = vmul.f32 %v4134_v14, %v7929_v36  ;;  %v8103_v20 = vmul.f32 %v4134_v14, %v7938_v59  ;;  %v8106_v37 = vmul.f32 %v4134_v14, %v7945_v47  ;;  %v8109_v28 = vmul.f32 %v4134_v14, %v7954_v61 }
 0x67d   : > { %v8112_v21 = vmul.f32 %v4134_v14, %v7961_v52  ;;  %v8115_v25 = vmul.f32 %v4134_v14, %v7970_v49  ;;  %v8118_v23 = vmul.f32 %v4134_v14, %v7977_v45  ;;  %v8121_v36 = vmul.f32 %v4134_v14, %v7986_v42 }
 0x67e   : > { %v8124_v59 = vmul.f32 %v4134_v14, %v7993_v4  ;;  %v8127_v47 = vmul.f32 %v4134_v14, %v8002_v27  ;;  %v8130_v61 = vmul.f32 %v4134_v14, %v8010_v46  ;;  %v8133_v52 = vmul.f32 %v4134_v14, %v8018_v17  ;;  %v9004_v27 = vld [vmem:[#allocation31_spill] sm:$0xff]  ;;  %v9014_v14 = vld [vmem:[#allocation40_spill] sm:$0xff] }
 0x67f   : > { %v8137_v49 = vmul.f32 %v8037_v13, %v7783_v5  ;;  %v8141_v42 = vmul.f32 %v8037_v13, %v7774_v34  ;;  %v8145_v4 = vmul.f32 %v8037_v13, %v7786_v40  ;;  %v8149_v45 = vmul.f32 %v8037_v13, %v7798_v18  ;;  %v9005_v17 = vld [vmem:[#allocation27_spill] sm:$0xff] }
 0x680   : > { %v8153_v46 = vmul.f32 %v8037_v13, %v7804_v44  ;;  %v8157_v5 = vmul.f32 %v8037_v13, %v7814_v51  ;;  %v8161_v34 = vmul.f32 %v8037_v13, %v7820_v35  ;;  %v8165_v40 = vmul.f32 %v8037_v13, %v7830_v2 }
 0x681   : > { %v8169_v18 = vmul.f32 %v8037_v13, %v7836_v38  ;;  %v8173_v44 = vmul.f32 %v8037_v13, %v9004_v27  ;;  %v8177_v51 = vmul.f32 %v8037_v13, %v9005_v17  ;;  %v8181_v35 = vmul.f32 %v8037_v13, %v9006_v9  ;;  %v9015_v17 = vld [vmem:[#allocation16_spill] sm:$0xff] }
 0x682   : > { %v8185_v2 = vmul.f32 %v8037_v13, %v9007_v41  ;;  %v8189_v38 = vmul.f32 %v8037_v13, %v9008_v16  ;;  %v8193_v0 = vmul.f32 %v8037_v13, %v9009_v19  ;;  %v8197_v32 = vmul.f32 %v8037_v13, %v9010_v10  ;;  %v9017_v41 = vld [vmem:[#allocation17_spill] sm:$0xff]  ;;  %v9019_v19 = vld [vmem:[#allocation18_spill] sm:$0xff] }
 0x683   : > { %v8201_v63 = vmul.f32 %v8037_v13, %v9011_v1  ;;  %v8205_v48 = vmul.f32 %v8037_v13, %v9012_v26  ;;  %v8209_v3 = vmul.f32 %v8037_v13, %v9013_v60  ;;  %v8213_v27 = vmul.f32 %v8037_v13, %v9014_v14  ;;  %v9021_v1 = vld [vmem:[#allocation19_spill] sm:$0xff]  ;;  %v9023_v60 = vld [vmem:[#allocation20_spill] sm:$0xff] }
 0x684   : > { %v8217_v9 = vmul.f32 %v8037_v13, %v9015_v17  ;;  %v8221_v16 = vmul.f32 %v8037_v13, %v9017_v41  ;;  %v8225_v10 = vmul.f32 %v8037_v13, %v9019_v19  ;;  %v8229_v26 = vmul.f32 %v8037_v13, %v9021_v1  ;;  %v9025_v17 = vld [vmem:[#allocation21_spill] sm:$0xff]  ;;  %v9027_v41 = vld [vmem:[#allocation22_spill] sm:$0xff]  ;;  %v9030_v1 = vld [vmem:[#allocation23_spill] sm:$0xff] }
 0x685   : > { %v8233_v14 = vmul.f32 %v8037_v13, %v9023_v60  ;;  %v9028_v19 = vld [vmem:[#allocation29_spill] sm:$0xff]  ;;  %v9032_v60 = vld [vmem:[#allocation26_spill] sm:$0xff] }
 0x686   : > { %9016 = vst [vmem:[#allocation39_spill] sm:$0xff] %v8217_v9  ;;  %9018 = vst [vmem:[#allocation33_spill] sm:$0xff] %v8221_v16  ;;  %v8237_v9 = vmul.f32 %v8037_v13, %v9025_v17  ;;  %v8241_v16 = vmul.f32 %v8037_v13, %v9027_v41  ;;  %v9033_v17 = vld [vmem:[#allocation28_spill] sm:$0xff]  ;;  %v8261_v41 = vmul.f32 %v8037_v13, %v8022_v6 }
 0x687   : > { %9020 = vst [vmem:[#allocation37_spill] sm:$0xff] %v8225_v10  ;;  %9022 = vst [vmem:[#allocation38_spill] sm:$0xff] %v8229_v26  ;;  %v8245_v10 = vmul.f32 %v8037_v13, %v9028_v19  ;;  %v8249_v26 = vmul.f32 %v8037_v13, %v9030_v1  ;;  %v6007_v19 = vld [vmem:[%s6418_s27] sm:$0xff]  ;;  %v6008_v1 = vld [vmem:[%s6418_s27 + $0x10] sm:$0xff] }
 0x688   : > { %9024 = vst [vmem:[#allocation15_spill] sm:$0xff] %v8233_v14  ;;  %9026 = vst [vmem:[#allocation31_spill] sm:$0xff] %v8237_v9  ;;  %v8253_v14 = vmul.f32 %v8037_v13, %v9032_v60  ;;  %v8257_v9 = vmul.f32 %v8037_v13, %v9033_v17  ;;  %v6009_v60 = vld [vmem:[%s6418_s27 + $0x20] sm:$0xff] }
 0x689   : > { %9029 = vst [vmem:[#allocation27_spill] sm:$0xff] %v8245_v10  ;;  %9031 = vst [vmem:[#allocation32_spill] sm:$0xff] %v8249_v26  ;;  %v8265_v10 = vadd.f32 %v6007_v19, %v8040_v62  ;;  %v8269_v26 = vadd.f32 %v6008_v1, %v8043_v54  ;;  %v8273_v17 = vadd.f32 %v6009_v60, %v8046_v33  ;;  %v6011_v13 = vld [vmem:[%s6418_s27 + $0x40] sm:$0xff]  ;;  %v6012_v19 = vld [vmem:[%s6418_s27 + $0x50] sm:$0xff] }
 0x68a   : > { %9034 = vst [vmem:[#allocation24_spill] sm:$0xff] %v8257_v9  ;;  %v6010_v9 = vld [vmem:[%s6418_s27 + $0x30] sm:$0xff]  ;;  %v8281_v62 = vadd.f32 %v6011_v13, %v8052_v31  ;;  %v8285_v54 = vadd.f32 %v6012_v19, %v8055_v39  ;;  %v6013_v1 = vld [vmem:[%s6418_s27 + $0x60] sm:$0xff] }
 0x68b   : > { %v8277_v6 = vadd.f32 %v6010_v9, %v8049_v58  ;;  %v8289_v33 = vadd.f32 %v6013_v1, %v8058_v15  ;;  %v6014_v60 = vld [vmem:[%s6418_s27 + $0x70] sm:$0xff]  ;;  %v6015_v9 = vld [vmem:[%s6418_s27 + $0x80] sm:$0xff] }
 0x68c   : > { %v8293_v58 = vadd.f32 %v6014_v60, %v8061_v56  ;;  %v8297_v31 = vadd.f32 %v6015_v9, %v8064_v24  ;;  %v6016_v13 = vld [vmem:[%s6418_s27 + $0x90] sm:$0xff]  ;;  %v6017_v19 = vld [vmem:[%s6418_s27 + $0xa0] sm:$0xff] }
 0x68d   : > { %v8301_v39 = vadd.f32 %v6016_v13, %v8067_v29  ;;  %v8305_v15 = vadd.f32 %v6017_v19, %v8070_v53  ;;  %v6018_v1 = vld [vmem:[%s6418_s27 + $0xb0] sm:$0xff]  ;;  %v6019_v60 = vld [vmem:[%s6418_s27 + $0xc0] sm:$0xff] }
 0x68e   : > { %v8309_v56 = vadd.f32 %v6018_v1, %v8073_v43  ;;  %v8313_v24 = vadd.f32 %v6019_v60, %v8076_v30  ;;  %v6020_v9 = vld [vmem:[%s6418_s27 + $0xd0] sm:$0xff]  ;;  %v6021_v13 = vld [vmem:[%s6418_s27 + $0xe0] sm:$0xff] }
 0x68f   : > { %v8317_v29 = vadd.f32 %v6020_v9, %v8079_v55  ;;  %v8321_v53 = vadd.f32 %v6021_v13, %v8082_v7  ;;  %v6022_v19 = vld [vmem:[%s6418_s27 + $0xf0] sm:$0xff]  ;;  %v6023_v1 = vld [vmem:[%s6418_s27 + $0x100] sm:$0xff] }
 0x690   : > { %v8325_v43 = vadd.f32 %v6022_v19, %v8085_v57  ;;  %v8329_v30 = vadd.f32 %v6023_v1, %v8088_v8  ;;  %v6024_v60 = vld [vmem:[%s6418_s27 + $0x110] sm:$0xff]  ;;  %v6025_v9 = vld [vmem:[%s6418_s27 + $0x120] sm:$0xff] }
 0x691   : > { %v8333_v55 = vadd.f32 %v6024_v60, %v8091_v22  ;;  %v8337_v7 = vadd.f32 %v6025_v9, %v8094_v11  ;;  %v6026_v13 = vld [vmem:[%s6418_s27 + $0x130] sm:$0xff]  ;;  %v6027_v19 = vld [vmem:[%s6418_s27 + $0x140] sm:$0xff] }
 0x692   : > { %v8341_v57 = vadd.f32 %v6026_v13, %v8097_v12  ;;  %v8345_v8 = vadd.f32 %v6027_v19, %v8100_v50  ;;  %v6028_v1 = vld [vmem:[%s6418_s27 + $0x150] sm:$0xff]  ;;  %v6029_v60 = vld [vmem:[%s6418_s27 + $0x160] sm:$0xff] }
 0x693   : > { %v8349_v22 = vadd.f32 %v6028_v1, %v8103_v20  ;;  %v8353_v11 = vadd.f32 %v6029_v60, %v8106_v37  ;;  %v6030_v9 = vld [vmem:[%s6418_s27 + $0x170] sm:$0xff]  ;;  %v6031_v13 = vld [vmem:[%s6418_s27 + $0x180] sm:$0xff] }
 0x694   : > { %v8357_v12 = vadd.f32 %v6030_v9, %v8109_v28  ;;  %v8361_v50 = vadd.f32 %v6031_v13, %v8112_v21  ;;  %v6032_v19 = vld [vmem:[%s6418_s27 + $0x190] sm:$0xff]  ;;  %v6033_v1 = vld [vmem:[%s6418_s27 + $0x1a0] sm:$0xff] }
 0x695   : > { %v8365_v20 = vadd.f32 %v6032_v19, %v8115_v25  ;;  %v8369_v37 = vadd.f32 %v6033_v1, %v8118_v23  ;;  %v6034_v60 = vld [vmem:[%s6418_s27 + $0x1b0] sm:$0xff]  ;;  %v6035_v9 = vld [vmem:[%s6418_s27 + $0x1c0] sm:$0xff] }
 0x696   : > { %9035 = vst [vmem:[#allocation35_spill] sm:$0xff] %v8357_v12  ;;  %9036 = vst [vmem:[#allocation30_spill] sm:$0xff] %v8361_v50  ;;  %v8373_v28 = vadd.f32 %v6034_v60, %v8121_v36  ;;  %v8377_v21 = vadd.f32 %v6035_v9, %v8124_v59  ;;  %v6036_v13 = vld [vmem:[%s6418_s27 + $0x1d0] sm:$0xff]  ;;  %v6037_v19 = vld [vmem:[%s6418_s27 + $0x1e0] sm:$0xff] }
 0x697   : > { %9037 = vst [vmem:[#allocation36_spill] sm:$0xff] %v8365_v20  ;;  %9038 = vst [vmem:[#allocation25_spill] sm:$0xff] %v8369_v37  ;;  %v8381_v25 = vadd.f32 %v6036_v13, %v8127_v47  ;;  %v8385_v23 = vadd.f32 %v6037_v19, %v8130_v61  ;;  %v6038_v1 = vld [vmem:[%s6418_s27 + $0x1f0] sm:$0xff]  ;;  %v6039_v60 = vld [vmem:[%s6418_s27 + $0x8] sm:$0xff] }
 0x698   : > { %9039 = vst [vmem:[#allocation41_spill] sm:$0xff] %v8373_v28  ;;  %9040 = vst [vmem:[#allocation34_spill] sm:$0xff] %v8377_v21  ;;  %v8389_v36 = vadd.f32 %v6038_v1, %v8133_v52  ;;  %v8393_v59 = vadd.f32 %v6039_v60, %v8137_v49  ;;  %v6040_v9 = vld [vmem:[%s6418_s27 + $0x18] sm:$0xff]  ;;  %v6041_v13 = vld [vmem:[%s6418_s27 + $0x28] sm:$0xff] }
 0x699   : > { %9041 = vst [vmem:[#allocation40_spill] sm:$0xff] %v8381_v25  ;;  %9042 = vst [vmem:[#allocation16_spill] sm:$0xff] %v8385_v23  ;;  %v8397_v47 = vadd.f32 %v6040_v9, %v8141_v42  ;;  %v8401_v61 = vadd.f32 %v6041_v13, %v8145_v4  ;;  %v6042_v19 = vld [vmem:[%s6418_s27 + $0x38] sm:$0xff]  ;;  %v6043_v1 = vld [vmem:[%s6418_s27 + $0x48] sm:$0xff] }
 0x69a   : > { %9043 = vst [vmem:[#allocation17_spill] sm:$0xff] %v8389_v36  ;;  %v8405_v52 = vadd.f32 %v6042_v19, %v8149_v45  ;;  %v8409_v49 = vadd.f32 %v6043_v1, %v8153_v46  ;;  %v6044_v60 = vld [vmem:[%s6418_s27 + $0x58] sm:$0xff]  ;;  %v6045_v9 = vld [vmem:[%s6418_s27 + $0x68] sm:$0xff]  ;;  %v9044_v36 = vld [vmem:[#allocation39_spill] sm:$0xff] }
 0x69b   : > { %v8413_v42 = vadd.f32 %v6044_v60, %v8157_v5  ;;  %v8417_v4 = vadd.f32 %v6045_v9, %v8161_v34  ;;  %v6046_v13 = vld [vmem:[%s6418_s27 + $0x78] sm:$0xff]  ;;  %v6047_v19 = vld [vmem:[%s6418_s27 + $0x88] sm:$0xff]  ;;  %v9045_v23 = vld [vmem:[#allocation33_spill] sm:$0xff] }
 0x69c   : > { %v8421_v45 = vadd.f32 %v6046_v13, %v8165_v40  ;;  %v8425_v46 = vadd.f32 %v6047_v19, %v8169_v18  ;;  %v6048_v1 = vld [vmem:[%s6418_s27 + $0x98] sm:$0xff]  ;;  %v6049_v60 = vld [vmem:[%s6418_s27 + $0xa8] sm:$0xff]  ;;  %v9046_v25 = vld [vmem:[#allocation37_spill] sm:$0xff] }
 0x69d   : > { %v8429_v5 = vadd.f32 %v6048_v1, %v8173_v44  ;;  %v8433_v34 = vadd.f32 %v6049_v60, %v8177_v51  ;;  %v6050_v9 = vld [vmem:[%s6418_s27 + $0xb8] sm:$0xff]  ;;  %v6051_v13 = vld [vmem:[%s6418_s27 + $0xc8] sm:$0xff]  ;;  %v9049_v28 = vld [vmem:[#allocation15_spill] sm:$0xff] }
 0x69e   : > { %v8437_v40 = vadd.f32 %v6050_v9, %v8181_v35  ;;  %v8441_v18 = vadd.f32 %v6051_v13, %v8185_v2  ;;  %v6052_v19 = vld [vmem:[%s6418_s27 + $0xd8] sm:$0xff]  ;;  %v6053_v1 = vld [vmem:[%s6418_s27 + $0xe8] sm:$0xff] }
 0x69f   : > { %v8445_v44 = vadd.f32 %v6052_v19, %v8189_v38  ;;  %v8449_v51 = vadd.f32 %v6053_v1, %v8193_v0  ;;  %v6054_v60 = vld [vmem:[%s6418_s27 + $0xf8] sm:$0xff]  ;;  %v6055_v9 = vld [vmem:[%s6418_s27 + $0x108] sm:$0xff] }
 0x6a0   : > { %v8453_v35 = vadd.f32 %v6054_v60, %v8197_v32  ;;  %v8457_v2 = vadd.f32 %v6055_v9, %v8201_v63  ;;  %v6056_v13 = vld [vmem:[%s6418_s27 + $0x118] sm:$0xff]  ;;  %v6057_v19 = vld [vmem:[%s6418_s27 + $0x128] sm:$0xff] }
 0x6a1   : > { %v8461_v38 = vadd.f32 %v6056_v13, %v8205_v48  ;;  %v8465_v0 = vadd.f32 %v6057_v19, %v8209_v3  ;;  %v6058_v1 = vld [vmem:[%s6418_s27 + $0x138] sm:$0xff]  ;;  %v6059_v60 = vld [vmem:[%s6418_s27 + $0x148] sm:$0xff] }
 0x6a2   : > { %v8469_v32 = vadd.f32 %v6058_v1, %v8213_v27  ;;  %v8473_v63 = vadd.f32 %v6059_v60, %v9044_v36  ;;  %v6060_v9 = vld [vmem:[%s6418_s27 + $0x158] sm:$0xff]  ;;  %v6061_v13 = vld [vmem:[%s6418_s27 + $0x168] sm:$0xff]  ;;  %v9051_v60 = vld [vmem:[#allocation31_spill] sm:$0xff] }
 0x6a3   : > { %v8477_v48 = vadd.f32 %v6060_v9, %v9045_v23  ;;  %v8481_v3 = vadd.f32 %v6061_v13, %v9046_v25  ;;  %v6062_v19 = vld [vmem:[%s6418_s27 + $0x178] sm:$0xff]  ;;  %v6063_v1 = vld [vmem:[%s6418_s27 + $0x188] sm:$0xff]  ;;  %v9052_v25 = vld [vmem:[#allocation27_spill] sm:$0xff] }
 0x6a4   : > { %v9048_v21 = vld [vmem:[#allocation38_spill] sm:$0xff]  ;;  %v8489_v37 = vadd.f32 %v6063_v1, %v9049_v28  ;;  %v6065_v23 = vld [vmem:[%s6418_s27 + $0x1a8] sm:$0xff] }
 0x6a5   : > { %9047 = vst [vmem:[#allocation18_spill] sm:$0xff] %v8481_v3  ;;  %v8485_v27 = vadd.f32 %v6062_v19, %v9048_v21  ;;  %v6064_v36 = vld [vmem:[%s6418_s27 + $0x198] sm:$0xff]  ;;  %v8497_v9 = vadd.f32 %v6065_v23, %v8241_v16  ;;  %v6067_v12 = vld [vmem:[%s6418_s27 + $0x1c8] sm:$0xff]  ;;  %v4268_v23 = vmax.f32 %v8393_v59, 0.0  ;;  %v4278_v59 = vmax.f32 %v8413_v42, 0.0 }
 0x6a6   : > { %9050 = vst [vmem:[#allocation19_spill] sm:$0xff] %v8489_v37  ;;  %v8493_v20 = vadd.f32 %v6064_v36, %v9051_v60  ;;  %v6066_v50 = vld [vmem:[%s6418_s27 + $0x1b8] sm:$0xff]  ;;  %v9053_v3 = vld [vmem:[#allocation32_spill] sm:$0xff]  ;;  %v4292_v42 = vmax.f32 %v8441_v18, 0.0  ;;  %v4306_v18 = vmax.f32 %v8469_v32, 0.0 }
 0x6a7   : > { %v8501_v13 = vadd.f32 %v6066_v50, %v9052_v25  ;;  %v8505_v21 = vadd.f32 %v6067_v12, %v9053_v3  ;;  %v6068_v19 = vld [vmem:[%s6418_s27 + $0x1d8] sm:$0xff]  ;;  %v6069_v1 = vld [vmem:[%s6418_s27 + $0x1e8] sm:$0xff]  ;;  %v4267_v50 = vmax.f32 %v8265_v10, 0.0  ;;  %v4269_v12 = vmax.f32 %v8269_v26, 0.0 }
 0x6a8   : > { %v8509_v28 = vadd.f32 %v6068_v19, %v8253_v14  ;;  %v9054_v37 = vld [vmem:[#allocation24_spill] sm:$0xff]  ;;  %v6070_v60 = vld [vmem:[%s6418_s27 + $0x1f8] sm:$0xff]  ;;  %v4270_v3 = vmax.f32 %v8397_v47, 0.0  ;;  %v4271_v14 = vmax.f32 %v8273_v17, 0.0  ;;  %v4272_v25 = vmax.f32 %v8401_v61, 0.0  ;;  %s8533_s27 = scalar_lea.vmem [#allocation8], %s4500_s28 }
 0x6a9   : > { %v8513_v36 = vadd.f32 %v6069_v1, %v9054_v37  ;;  %v8517_v16 = vadd.f32 %v6070_v60, %v8261_v41  ;;  %v4273_v19 = vmax.f32 %v8277_v6, 0.0  ;;  %v4274_v37 = vmax.f32 %v8405_v52, 0.0  ;;  %4331 = vst [vmem:[%s8533_s27] sm:$0xff] %v4267_v50  ;;  %4332 = vst [vmem:[%s8533_s27 + $0x8] sm:$0xff] %v4268_v23  ;;  %s4906_s28 = sshll.u32 %s6294_s21, 13  ;;  %s4409_s11 = sshll.u32 %s8533_s27, 4  ;;  %s8642_s11 = int_to_ptr.vmem [resolvable:$true] %s4409_s11 }
 0x6aa   : > { %v4275_v1 = vmax.f32 %v8281_v62, 0.0  ;;  %v4276_v41 = vmax.f32 %v8409_v49, 0.0  ;;  %v4277_v10 = vmax.f32 %v8285_v54, 0.0  ;;  %4333 = vst [vmem:[%s8533_s27 + $0x10] sm:$0xff] %v4269_v12  ;;  %4334 = vst [vmem:[%s8533_s27 + $0x18] sm:$0xff] %v4270_v3  ;;  %v4279_v26 = vmax.f32 %v8289_v33, 0.0  ;;  %s8640_s15 = scalar_lea.hbm %s9064_s17, %s4906_s28  ;;  %p6136_p10 = scmp.lt.s32.totalorder %s8642_s11, %s6134_s30 }
 0x6ab   : > { %v4280_v17 = vmax.f32 %v8417_v4, 0.0  ;;  %v4281_v6 = vmax.f32 %v8293_v58, 0.0  ;;  %v4282_v62 = vmax.f32 %v8421_v45, 0.0  ;;  %4335 = vst [vmem:[%s8533_s27 + $0x20] sm:$0xff] %v4271_v14  ;;  %4336 = vst [vmem:[%s8533_s27 + $0x28] sm:$0xff] %v4272_v25  ;;  %v4283_v54 = vmax.f32 %v8297_v31, 0.0 }
 0x6ac   : > { %4337 = vst [vmem:[%s8533_s27 + $0x30] sm:$0xff] %v4273_v19  ;;  %4338 = vst [vmem:[%s8533_s27 + $0x38] sm:$0xff] %v4274_v37  ;;  %v4284_v47 = vmax.f32 %v8425_v46, 0.0  ;;  %v4285_v33 = vmax.f32 %v8301_v39, 0.0  ;;  %v4286_v61 = vmax.f32 %v8429_v5, 0.0  ;;  %v4287_v58 = vmax.f32 %v8305_v15, 0.0 }
 0x6ad   : > { %4339 = vst [vmem:[%s8533_s27 + $0x40] sm:$0xff] %v4275_v1  ;;  %4340 = vst [vmem:[%s8533_s27 + $0x48] sm:$0xff] %v4276_v41  ;;  %v4288_v52 = vmax.f32 %v8433_v34, 0.0  ;;  %v4289_v31 = vmax.f32 %v8309_v56, 0.0  ;;  %v4290_v49 = vmax.f32 %v8437_v40, 0.0  ;;  %v4291_v39 = vmax.f32 %v8313_v24, 0.0 }
 0x6ae   : > { %4341 = vst [vmem:[%s8533_s27 + $0x50] sm:$0xff] %v4277_v10  ;;  %4342 = vst [vmem:[%s8533_s27 + $0x58] sm:$0xff] %v4278_v59  ;;  %v4293_v15 = vmax.f32 %v8317_v29, 0.0  ;;  %v4294_v4 = vmax.f32 %v8445_v44, 0.0  ;;  %v4295_v56 = vmax.f32 %v8321_v53, 0.0  ;;  %v4296_v45 = vmax.f32 %v8449_v51, 0.0 }
 0x6af   : > { %4343 = vst [vmem:[%s8533_s27 + $0x60] sm:$0xff] %v4279_v26  ;;  %4344 = vst [vmem:[%s8533_s27 + $0x68] sm:$0xff] %v4280_v17  ;;  %v4297_v24 = vmax.f32 %v8325_v43, 0.0  ;;  %v4298_v46 = vmax.f32 %v8453_v35, 0.0  ;;  %v4299_v29 = vmax.f32 %v8329_v30, 0.0  ;;  %v4300_v5 = vmax.f32 %v8457_v2, 0.0 }
 0x6b0   : > { %4345 = vst [vmem:[%s8533_s27 + $0x70] sm:$0xff] %v4281_v6  ;;  %4346 = vst [vmem:[%s8533_s27 + $0x78] sm:$0xff] %v4282_v62  ;;  %v4301_v53 = vmax.f32 %v8333_v55, 0.0  ;;  %v4302_v34 = vmax.f32 %v8461_v38, 0.0  ;;  %v4303_v43 = vmax.f32 %v8337_v7, 0.0  ;;  %v4304_v40 = vmax.f32 %v8465_v0, 0.0 }
 0x6b1   : > { %4347 = vst [vmem:[%s8533_s27 + $0x80] sm:$0xff] %v4283_v54  ;;  %4348 = vst [vmem:[%s8533_s27 + $0x88] sm:$0xff] %v4284_v47  ;;  %v4305_v30 = vmax.f32 %v8341_v57, 0.0  ;;  %v4307_v55 = vmax.f32 %v8345_v8, 0.0  ;;  %v4308_v44 = vmax.f32 %v8473_v63, 0.0  ;;  %v4309_v7 = vmax.f32 %v8349_v22, 0.0 }
 0x6b2   : > { %4349 = vst [vmem:[%s8533_s27 + $0x90] sm:$0xff] %v4285_v33  ;;  %4350 = vst [vmem:[%s8533_s27 + $0x98] sm:$0xff] %v4286_v61  ;;  %v4310_v57 = vmax.f32 %v8477_v48, 0.0  ;;  %v4311_v51 = vmax.f32 %v8353_v11, 0.0  ;;  %v9055_v35 = vld [vmem:[#allocation18_spill] sm:$0xff]  ;;  %v9056_v8 = vld [vmem:[#allocation35_spill] sm:$0xff] }
 0x6b3   : > { %4351 = vst [vmem:[%s8533_s27 + $0xa0] sm:$0xff] %v4287_v58  ;;  %4352 = vst [vmem:[%s8533_s27 + $0xa8] sm:$0xff] %v4288_v52  ;;  %v4312_v2 = vmax.f32 %v9055_v35, 0.0  ;;  %v4313_v38 = vmax.f32 %v9056_v8, 0.0  ;;  %v4314_v0 = vmax.f32 %v8485_v27, 0.0  ;;  %v9057_v22 = vld [vmem:[#allocation30_spill] sm:$0xff] }
 0x6b4   : > { %4353 = vst [vmem:[%s8533_s27 + $0xb0] sm:$0xff] %v4289_v31  ;;  %4354 = vst [vmem:[%s8533_s27 + $0xb8] sm:$0xff] %v4290_v49  ;;  %v4315_v11 = vmax.f32 %v9057_v22, 0.0  ;;  %v9058_v32 = vld [vmem:[#allocation19_spill] sm:$0xff]  ;;  %v9059_v48 = vld [vmem:[#allocation36_spill] sm:$0xff]  ;;  %v4318_v50 = vmax.f32 %v8493_v20, 0.0 }
 0x6b5   : > { %4355 = vst [vmem:[%s8533_s27 + $0xc0] sm:$0xff] %v4291_v39  ;;  %4356 = vst [vmem:[%s8533_s27 + $0xc8] sm:$0xff] %v4292_v42  ;;  %v4316_v63 = vmax.f32 %v9058_v32, 0.0  ;;  %v4317_v60 = vmax.f32 %v9059_v48, 0.0  ;;  %v9060_v27 = vld [vmem:[#allocation25_spill] sm:$0xff]  ;;  %v4320_v12 = vmax.f32 %v8497_v9, 0.0 }
 0x6b6   : > { %4357 = vst [vmem:[%s8533_s27 + $0xd0] sm:$0xff] %v4293_v15  ;;  %4358 = vst [vmem:[%s8533_s27 + $0xd8] sm:$0xff] %v4294_v4  ;;  %v4319_v23 = vmax.f32 %v9060_v27, 0.0  ;;  %v9061_v3 = vld [vmem:[#allocation41_spill] sm:$0xff]  ;;  %v4322_v25 = vmax.f32 %v8501_v13, 0.0  ;;  %v9062_v20 = vld [vmem:[#allocation34_spill] sm:$0xff] }
 0x6b7   : > { %4359 = vst [vmem:[%s8533_s27 + $0xe0] sm:$0xff] %v4295_v56  ;;  %4360 = vst [vmem:[%s8533_s27 + $0xe8] sm:$0xff] %v4296_v45  ;;  %v4321_v14 = vmax.f32 %v9061_v3, 0.0  ;;  %v4323_v19 = vmax.f32 %v9062_v20, 0.0  ;;  %v4324_v37 = vmax.f32 %v8505_v21, 0.0  ;;  %v9063_v1 = vld [vmem:[#allocation40_spill] sm:$0xff] }
 0x6b8   : > { %4361 = vst [vmem:[%s8533_s27 + $0xf0] sm:$0xff] %v4297_v24  ;;  %4362 = vst [vmem:[%s8533_s27 + $0xf8] sm:$0xff] %v4298_v46  ;;  %v4325_v41 = vmax.f32 %v9063_v1, 0.0  ;;  %v4326_v9 = vmax.f32 %v8509_v28, 0.0  ;;  %v9066_v13 = vld [vmem:[#allocation16_spill] sm:$0xff]  ;;  %v4328_v28 = vmax.f32 %v8513_v36, 0.0 }
 0x6b9   : > { %4363 = vst [vmem:[%s8533_s27 + $0x100] sm:$0xff] %v4299_v29  ;;  %4364 = vst [vmem:[%s8533_s27 + $0x108] sm:$0xff] %v4300_v5  ;;  %v4327_v21 = vmax.f32 %v9066_v13, 0.0  ;;  %v9067_v10 = vld [vmem:[#allocation17_spill] sm:$0xff]  ;;  %v4330_v26 = vmax.f32 %v8517_v16, 0.0  ;;  %s6129_s25 = scalar_lea.vmem %s8642_s11, 8192 }
 0x6ba   : > { %4365 = vst [vmem:[%s8533_s27 + $0x110] sm:$0xff] %v4301_v53  ;;  %4366 = vst [vmem:[%s8533_s27 + $0x118] sm:$0xff] %v4302_v34  ;;  %v4329_v59 = vmax.f32 %v9067_v10, 0.0  ;;  %p6130_p4 = scmp.ne.s32.totalorder %s8642_s11, %s6129_s25  ;;  %p6137_p13 = scmp.lt.s32.totalorder %s6135_s12, %s6129_s25 }
 0x6bb   : > { %4367 = vst [vmem:[%s8533_s27 + $0x120] sm:$0xff] %v4303_v43  ;;  %4368 = vst [vmem:[%s8533_s27 + $0x128] sm:$0xff] %v4304_v40 }
 0x6bc   : > { %4369 = vst [vmem:[%s8533_s27 + $0x130] sm:$0xff] %v4305_v30  ;;  %4370 = vst [vmem:[%s8533_s27 + $0x138] sm:$0xff] %v4306_v18  ;;  %p6131_p6 = pnand %p6130_p4, %p6364_p12  ;;  %p6138_p3 = por %p6137_p13, %p6136_p10 }
 0x6bd   : > { %4371 = vst [vmem:[%s8533_s27 + $0x140] sm:$0xff] %v4307_v55  ;;  %4372 = vst [vmem:[%s8533_s27 + $0x148] sm:$0xff] %v4308_v44 }
 0x6be   : > { %4373 = vst [vmem:[%s8533_s27 + $0x150] sm:$0xff] %v4309_v7  ;;  %4374 = vst [vmem:[%s8533_s27 + $0x158] sm:$0xff] %v4310_v57  ;;  %p6132_p8 = pneg %p6131_p6 }
 0x6bf   : > { %4375 = vst [vmem:[%s8533_s27 + $0x160] sm:$0xff] %v4311_v51  ;;  %4376 = vst [vmem:[%s8533_s27 + $0x168] sm:$0xff] %v4312_v2 }
 0x6c0   : > { %4377 = vst [vmem:[%s8533_s27 + $0x170] sm:$0xff] %v4313_v38  ;;  %4378 = vst [vmem:[%s8533_s27 + $0x178] sm:$0xff] %v4314_v0  ;;  %p6139_p7 = pnand %p6138_p3, %p6132_p8 }
 0x6c1   : > { %4379 = vst [vmem:[%s8533_s27 + $0x180] sm:$0xff] %v4315_v11  ;;  %4380 = vst [vmem:[%s8533_s27 + $0x188] sm:$0xff] %v4316_v63 }
 0x6c2   : > { %4381 = vst [vmem:[%s8533_s27 + $0x190] sm:$0xff] %v4317_v60  ;;  %4382 = vst [vmem:[%s8533_s27 + $0x198] sm:$0xff] %v4318_v50 }
 0x6c3   : > { %4383 = vst [vmem:[%s8533_s27 + $0x1a0] sm:$0xff] %v4319_v23  ;;  %4384 = vst [vmem:[%s8533_s27 + $0x1a8] sm:$0xff] %v4320_v12 }
 0x6c4   : > { %4385 = vst [vmem:[%s8533_s27 + $0x1b0] sm:$0xff] %v4321_v14  ;;  %4386 = vst [vmem:[%s8533_s27 + $0x1b8] sm:$0xff] %v4322_v25 }
 0x6c5   : > { %4387 = vst [vmem:[%s8533_s27 + $0x1c0] sm:$0xff] %v4323_v19  ;;  %4388 = vst [vmem:[%s8533_s27 + $0x1c8] sm:$0xff] %v4324_v37 }
 0x6c6   : > { %4389 = vst [vmem:[%s8533_s27 + $0x1d0] sm:$0xff] %v4325_v41  ;;  %4390 = vst [vmem:[%s8533_s27 + $0x1d8] sm:$0xff] %v4326_v9 }
 0x6c7   : > { %4391 = vst [vmem:[%s8533_s27 + $0x1e0] sm:$0xff] %v4327_v21  ;;  %4392 = vst [vmem:[%s8533_s27 + $0x1e8] sm:$0xff] %v4328_v28 }
 0x6c8   : > { %4393 = vst [vmem:[%s8533_s27 + $0x1f0] sm:$0xff] %v4329_v59  ;;  %4394 = vst [vmem:[%s8533_s27 + $0x1f8] sm:$0xff] %v4330_v26 }
 0x6c9   : > { %6142 = shalt.err (!%p6139_p7)
}
 0x6ca   : > { %s6143_s13 = scalar_lea.hbm %s8640_s15, 8192  ;;  %s6147_s21 = scalar_lea.hbm %s9065_s24, 16384 }
 0x6cb   : > { %p6144_p9 = scmp.ne.s32.totalorder %s8640_s15, %s6143_s13  ;;  %p6148_p5 = scmp.lt.u32.totalorder %s8640_s15, %s9065_s24 }
 0x6cc   : > { %p6149_p11 = scmp.lt.u32.totalorder %s6147_s21, %s6143_s13  ;;  %p6151_p4 = scmp.lt.u32.totalorder %s6143_s13, %s8640_s15 }
 0x6cd   : > { %p6145_p2 = pnand %p6144_p9, %p6364_p12 }
 0x6ce   : > { %p6150_p1 = por %p6149_p11, %p6148_p5 }
 0x6cf   : > { %p6146_p0 = pneg %p6145_p2 }
 0x6d0   : > { %p6152_p6 = por %p6151_p4, %p6150_p1 }
 0x6d2   : > { %p6153_p8 = pnand %p6152_p6, %p6146_p0 }
 0x6d4   : > { %6156 = shalt.err (!%p6153_p8)
}
 0x6d5   : > { %s6211_s25 = smov 256   ;;  %s6212_s14 = smov 16  }
 0x6d6   : > { %5824 = dma.vmem_to_hbm [thread:$0]  (%p6364_p12), %s8642_s11, 8192, %s8640_s15, %s4396_s22, %s6211_s25, %s6211_s25, %s6212_s14  }
 0x6d7 PF: > { %s9068_s30 = sld [smem:[#allocation12_spill]]  ;;  %s9069_s12 = sld [smem:[#allocation13_spill]] }
 0x6d8   : > { %p9071_p13 = scmp.ge.s32.totalorder %s6199_s20, 2 }
 0x6dd   : > { %s4424_s27 = sand.u32 1, %s9068_s30   ;;  %p9070_p10 = scmp.ne.s32.totalorder %s9069_s12, 0 }
 0x6de   : > { %s4425_s13 = scalar_lea.sflag [#allocation5], %s4424_s27 }
 0x6df   : > { %p5835_p3 = pnand %p9071_p13, %p9070_p10 }
 0x6e1   : > { %6182 = dma.done.wait (!%p5835_p3), %s4425_s13, 8192  }
 0x6e2   : > { %6184 = vsyncadd (!%p5835_p3), %s4425_s13, 4294959104  ;;  %s9072_s20 = sld [smem:[#allocation14_spill]]  ;;  %s9073_s17 = smov %s6191_s18 }
 0x6e3   : > { %s9074_s18 = smov %s6195_s19  ;;  %s9075_s19 = smov %s6360_s29 }
 0x6e8   : > { %p25_p7 = scmp.ge.s32.totalorder %s9072_s20, 4  }
 0x6ea   :  { %27 = sbr.rel (!%p25_p7) target bundleno = 8 (0x8), region = 115 }
 0x6f1   :  { %4430 = vsyncpa [#allocation4], 1 }
 0x6f2   :  { %4432 = vsyncpa [#allocation4 + $0x1], 1 }
 0x6f3   :  { %4433 = vsyncpa [#allocation7], 1 }
 0x6f4   :  { %4434 = vsyncpa [#allocation5], 1 }
 0x6f5   :  { %4436 = vsyncpa [#allocation5 + $0x1], 1 }

</bundles_post_ra>
